<compile_context>
chip_gen: v7x
topology: tpu7x:2x2x1
jax: 0.10.0
libtpu: 0.0.40
codegen_flags: <defaults>
</compile_context>

<pallas_src>
import functools

import jax
import jax.numpy as jnp
from jax.experimental import pallas as pl
from jax.experimental.pallas import tpu as pltpu
import numpy as np


def _round_up(x, m):
    return (x + m - 1) // m * m


# Order of weight arguments passed to the kernel (after v, q, c).
_WEIGHT_NAMES = ("wih", "whh", "bgi", "bhn",
                 "wc", "bc", "wv", "bv",
                 "w1", "b1", "w2", "b2")


def predictor_kernel(v_ref, q_ref, c_ref,
                     wih_ref, whh_ref, bgi_ref, bhn_ref,
                     wc_ref, bc_ref, wv_ref, bv_ref,
                     w1_ref, b1_ref, w2_ref, b2_ref,
                     out_ref, *, seq_len):
    f32 = jnp.float32
    bf16 = jnp.bfloat16

    TB = q_ref.shape[0]
    Sp = c_ref.shape[1]              # seq padded to a multiple of 8 -> trivial flatten
    De = c_ref.shape[2]
    H = whh_ref.shape[0]

    # ---- hoisted, packed GRU input-to-hidden projection -----------------------
    # One (TB*Sp, De) @ (De, 3H) MXU matmul covers every timestep and gate.
    # r/z bias slots hold the offline-folded (b_ih + b_hh); the n slot holds b_in
    # only (b_hn must stay inside r * (.) below).  The slab is stored in bf16 to
    # halve its live VMEM footprint (the matmul operands were already bf16).
    c2d = c_ref[...].reshape(TB * Sp, De)                                 # bf16
    gi = (jnp.dot(c2d, wih_ref[...], preferred_element_type=f32)
          + bgi_ref[...]).astype(bf16).reshape(TB, Sp, 3 * H)

    whh = whh_ref[...]                                                    # (H, 3H) bf16
    bhn_b = jnp.broadcast_to(bhn_ref[...], (TB, H))                       # hoisted broadcast

    # ---- recurrence: fully unrolled over the REAL seq_len ---------------------
    # One packed h @ (H, 3H) matmul per step (single MXU push/drain) plus f32
    # VPU/EUP gate math; column slices at multiples of H are lane-aligned when
    # H % 128 == 0.
    h = jnp.zeros((TB, H), f32)
    for t in range(seq_len):
        gh = jnp.dot(h.astype(bf16), whh, preferred_element_type=f32)    # (TB, 3H)
        gi_t = gi[:, t, :].astype(f32)                                    # (TB, 3H)
        r = jax.nn.sigmoid(gi_t[:, 0:H] + gh[:, 0:H])
        z = jax.nn.sigmoid(gi_t[:, H:2 * H] + gh[:, H:2 * H])
        n = jnp.tanh(gi_t[:, 2 * H:] + r * (gh[:, 2 * H:] + bhn_b))
        h = (1.0 - z) * n + z * h

    # ---- c_net / v_net: Linear + ReLU ------------------------------------------
    c_feat = jnp.maximum(
        jnp.dot(h.astype(bf16), wc_ref[...], preferred_element_type=f32)
        + bc_ref[...], 0.0)                                               # (TB, H)
    v_feat = jnp.maximum(
        jnp.dot(v_ref[...], wv_ref[...], preferred_element_type=f32)      # v already bf16
        + bv_ref[...], 0.0)                                               # (TB, H)

    # ---- joint = q * (c + v) -----------------------------------------------------
    joint = q_ref[...] * (c_feat + v_feat)                                # (TB, H) f32

    # ---- classifier: Linear(H, 2H) + ReLU -> Linear(2H, ans_pad) -----------------
    hid = jnp.maximum(
        jnp.dot(joint.astype(bf16), w1_ref[...], preferred_element_type=f32)
        + b1_ref[...], 0.0)                                               # (TB, 2H)
    out_ref[...] = (jnp.dot(hid.astype(bf16), w2_ref[...],
                            preferred_element_type=f32)
                    + b2_ref[...])                                        # (TB, ans_pad)


def _tpu_vmem_capacity_bytes():
    """Best-effort per-core VMEM capacity; None if it cannot be determined."""
    try:
        info = pltpu.get_tpu_info()
    except Exception:
        return None
    for attr in ("vmem_capacity_bytes", "vmem_bytes", "vmem_size_bytes"):
        val = getattr(info, attr, None)
        if isinstance(val, (int, np.integer)) and int(val) > 0:
            return int(val)
    return None


def _weight_spec(shape):
    # Constant block index -> weight is fetched once and stays VMEM-resident
    # across the batch grid.  Single-buffer it: double-buffering a resident
    # operand buys nothing and doubles ~33 MB of weights at production sizes.
    index_map = lambda i: (0, 0)
    try:
        return pl.BlockSpec(shape, index_map, pipeline_mode=pl.Buffered(1))
    except Exception:
        return pl.BlockSpec(shape, index_map)   # fallback: default buffering


def prepare_inference_params(p, ans_pad):
    """Fold r/z GRU biases, keep b_in / b_hn separate, cast matmul weights to bf16
    (matmuls still accumulate in f32), pad classifier output to lane width."""
    H = p["whh"].shape[0]
    ans_dim = p["w2"].shape[1]
    bf16 = jnp.bfloat16
    f32 = jnp.float32

    bih, bhh = p["bih"], p["bhh"]
    # Packed gi bias (gate order r, z, n): fold b_ih + b_hh for r/z; n keeps b_in only.
    bgi = jnp.concatenate(
        [bih[:, 0:H] + bhh[:, 0:H],
         bih[:, H:2 * H] + bhh[:, H:2 * H],
         bih[:, 2 * H:]], axis=1).astype(f32)
    bhn = bhh[:, 2 * H:].astype(f32)           # stays inside r * (W_hn h + b_hn)

    pad_n = ans_pad - ans_dim
    w2p = jnp.pad(p["w2"], ((0, 0), (0, pad_n)))
    b2p = jnp.pad(p["b2"], ((0, 0), (0, pad_n)))

    return {
        "wih": p["wih"].astype(bf16),          # (De, 3H) packed
        "whh": p["whh"].astype(bf16),          # (H, 3H) packed
        "bgi": bgi, "bhn": bhn,
        "wc": p["wc"].astype(bf16), "bc": p["bc"].astype(f32),
        "wv": p["wv"].astype(bf16), "bv": p["bv"].astype(f32),
        "w1": p["w1"].astype(bf16), "b1": p["b1"].astype(f32),
        "w2": w2p.astype(bf16), "b2": b2p.astype(f32),
    }


def predictor_with_caption(v, q, c, params):
    """v: (B, O, Dv) f32, q: (B, H) f32, c: (B, S, De) f32 -> logits (B, ans_dim) f32."""
    B, O, Dv = v.shape
    _, S, De = c.shape
    H = params["whh"].shape[0]
    ans_dim = params["w2"].shape[1]
    ans_pad = _round_up(ans_dim, 128)          # lane-dense output stores
    Sp = _round_up(S, 8)                       # layout-trivial in-kernel flatten

    # Generation-aware tile / VMEM plan.
    vmem_cap = _tpu_vmem_capacity_bytes()
    if vmem_cap is not None and vmem_cap <= 96 * 1024 * 1024:
        # v7x-class: 64 MiB per TensorCore, 2 cores.
        tb_target = 128
        vmem_limit = min(56 * 1024 * 1024, (vmem_cap * 7) // 8)
        small_vmem = True
    elif vmem_cap is not None:
        # v5e / v6e: 128 MiB VMEM -> bigger batch tile to feed the MXU.
        tb_target = 256
        vmem_limit = 104 * 1024 * 1024
        small_vmem = False
    else:
        # Unknown device: conservative settings that fit every generation.
        tb_target = 128
        vmem_limit = 48 * 1024 * 1024
        small_vmem = True

    # Batch tile: clamp to the (padded) batch, multiple of 8 for tiny demos.
    tb = max(8, min(tb_target, _round_up(B, 8)))
    if small_vmem:
        # Guarantee >= 2 batch tiles when possible so ("parallel",) shards the
        # grid across both v7x TensorCores.
        half = _round_up(-(-B // 2), 8)
        if 8 <= half < tb:
            tb = half
    Bp = _round_up(B, tb)

    def pad_batch(x):
        if Bp == B:
            return x
        return jnp.pad(x, ((0, Bp - B),) + ((0, 0),) * (x.ndim - 1))

    # Pre-sum v over objects in the wrapper (free XLA reduction at HBM bandwidth);
    # accumulate in f32, then hand the kernel a bf16 MXU operand (same numerics as
    # the previous in-kernel sum + cast).
    v_sum = jnp.sum(v, axis=1, dtype=jnp.float32)                 # (B, Dv) f32
    vp = pad_batch(v_sum).astype(jnp.bfloat16)                    # (Bp, Dv) bf16
    qp = pad_batch(q)                                             # (Bp, H) f32
    cp = pad_batch(jnp.pad(c, ((0, 0), (0, Sp - S), (0, 0)))
                   ).astype(jnp.bfloat16)                         # (Bp, Sp, De) bf16

    wp = prepare_inference_params(params, ans_pad)
    weights = [wp[name] for name in _WEIGHT_NAMES]

    grid = (Bp // tb,)

    data_specs = [
        pl.BlockSpec((tb, Dv), lambda i: (i, 0)),                 # pre-summed v
        pl.BlockSpec((tb, H), lambda i: (i, 0)),                  # q
        pl.BlockSpec((tb, Sp, De), lambda i: (i, 0, 0)),          # c (natural layout)
    ]
    weight_specs = [_weight_spec(w.shape) for w in weights]       # resident, single-buffered
    out_spec = pl.BlockSpec((tb, ans_pad), lambda i: (i, 0))

    # Advisory cost estimate for XLA scheduling around the custom call.
    flops = 2 * Bp * Sp * De * 3 * H                              # hoisted input projection
    flops += 2 * Bp * S * H * 3 * H                               # recurrent projection
    flops += 2 * Bp * (H * H + Dv * H + H * 2 * H + 2 * H * ans_pad)
    transcendentals = 3 * Bp * S * H                              # 2 sigmoid + tanh / step
    bytes_accessed = int(sum(x.size * x.dtype.itemsize
                             for x in [vp, qp, cp] + weights)
                         + Bp * ans_pad * 4)

    out = pl.pallas_call(
        functools.partial(predictor_kernel, seq_len=S),
        out_shape=jax.ShapeDtypeStruct((Bp, ans_pad), jnp.float32),
        grid_spec=pltpu.PrefetchScalarGridSpec(
            num_scalar_prefetch=0,
            grid=grid,
            in_specs=data_specs + weight_specs,
            out_specs=out_spec,
        ),
        compiler_params=pltpu.CompilerParams(
            # Batch tiles are independent -> shard across TensorCores on v7x.
            dimension_semantics=("parallel",),
            vmem_limit_bytes=int(vmem_limit),
        ),
        cost_estimate=pl.CostEstimate(
            flops=int(flops),
            transcendentals=int(transcendentals),
            bytes_accessed=bytes_accessed,
        ),
    )(vp, qp, cp, *weights)

    return out[:B, :ans_dim]


def init_params(key, v_dim, embed_dim, hidden_dim, ans_dim):
    """Canonical (PyTorch-like packed) parameters in f32."""
    ks = jax.random.split(key, 16)
    s = 0.1
    H = hidden_dim
    return {
        # GRU (gate order r, z, n), weights stored (in, 3H)
        "wih": jax.random.normal(ks[0], (embed_dim, 3 * H), jnp.float32) * s,
        "whh": jax.random.normal(ks[1], (H, 3 * H), jnp.float32) * s,
        "bih": jax.random.normal(ks[2], (1, 3 * H), jnp.float32) * s,
        "bhh": jax.random.normal(ks[3], (1, 3 * H), jnp.float32) * s,
        # c_net: Linear(H, H)
        "wc": jax.random.normal(ks[4], (H, H), jnp.float32) * s,
        "bc": jax.random.normal(ks[5], (1, H), jnp.float32) * s,
        # v_net: Linear(v_dim, H)
        "wv": jax.random.normal(ks[6], (v_dim, H), jnp.float32) * s,
        "bv": jax.random.normal(ks[7], (1, H), jnp.float32) * s,
        # classifier: Linear(H, 2H) + ReLU, Linear(2H, ans_dim)
        "w1": jax.random.normal(ks[8], (H, 2 * H), jnp.float32) * s,
        "b1": jax.random.normal(ks[9], (1, 2 * H), jnp.float32) * s,
        "w2": jax.random.normal(ks[10], (2 * H, ans_dim), jnp.float32) * s,
        "b2": jax.random.normal(ks[11], (1, ans_dim), jnp.float32) * s,
    }


def reference_forward(v, q, c, p):
    """Pure-JAX f32 reference with identical semantics (sanity check)."""
    H = p["whh"].shape[0]
    v_sum = jnp.sum(v, axis=1)
    h = jnp.zeros((v.shape[0], H), jnp.float32)
    for t in range(c.shape[1]):
        x = c[:, t, :]
        gi = x @ p["wih"] + p["bih"]
        gh = h @ p["whh"] + p["bhh"]
        r = jax.nn.sigmoid(gi[:, :H] + gh[:, :H])
        z = jax.nn.sigmoid(gi[:, H:2 * H] + gh[:, H:2 * H])
        n = jnp.tanh(gi[:, 2 * H:] + r * gh[:, 2 * H:])
        h = (1.0 - z) * n + z * h
    c_feat = jax.nn.relu(h @ p["wc"] + p["bc"])
    v_feat = jax.nn.relu(v_sum @ p["wv"] + p["bv"])
    joint = q * (c_feat + v_feat)
    hid = jax.nn.relu(joint @ p["w1"] + p["b1"])
    return hid @ p["w2"] + p["b2"]


if __name__ == "__main__":
    B, num_objs, v_dim = 2, 4, 32
    embed_dim, hidden_dim, ans_dim, seq = 16, 32, 16, 8

    key = jax.random.PRNGKey(0)
    kv, kq, kc, kp = jax.random.split(key, 4)
    v = jax.random.normal(kv, (B, num_objs, v_dim), jnp.float32)
    q = jax.random.normal(kq, (B, hidden_dim), jnp.float32)
    c = jax.random.normal(kc, (B, seq, embed_dim), jnp.float32)
    params = init_params(kp, v_dim, embed_dim, hidden_dim, ans_dim)

    out = predictor_with_caption(v, q, c, params)
    out = jax.block_until_ready(out)

    ref = jax.block_until_ready(reference_forward(v, q, c, params))
    assert out.shape == (B, ans_dim)
    # bf16 matmul operands / bf16 gi slab -> relaxed tolerance vs. the f32 reference.
    assert np.allclose(np.asarray(out), np.asarray(ref), atol=5e-2, rtol=5e-2)

    print("KERNEL_OK")
</pallas_src>

<mosaic_0001>
module attributes {stable_mosaic.version = 11 : i64} {
  func.func @predictor_kernel(%arg0: i32, %arg1: memref<8x32xbf16, #tpu.memory_space<vmem>>, %arg2: memref<8x32xf32, #tpu.memory_space<vmem>>, %arg3: memref<8x8x16xbf16, #tpu.memory_space<vmem>>, %arg4: memref<16x96xbf16, #tpu.memory_space<vmem>>, %arg5: memref<32x96xbf16, #tpu.memory_space<vmem>>, %arg6: memref<1x96xf32, #tpu.memory_space<vmem>>, %arg7: memref<1x32xf32, #tpu.memory_space<vmem>>, %arg8: memref<32x32xbf16, #tpu.memory_space<vmem>>, %arg9: memref<1x32xf32, #tpu.memory_space<vmem>>, %arg10: memref<32x32xbf16, #tpu.memory_space<vmem>>, %arg11: memref<1x32xf32, #tpu.memory_space<vmem>>, %arg12: memref<32x64xbf16, #tpu.memory_space<vmem>>, %arg13: memref<1x64xf32, #tpu.memory_space<vmem>>, %arg14: memref<64x128xbf16, #tpu.memory_space<vmem>>, %arg15: memref<1x128xf32, #tpu.memory_space<vmem>>, %arg16: memref<8x128xf32, #tpu.memory_space<vmem>>) attributes {dimension_semantics = [#tpu.dimension_semantics<parallel>], iteration_bounds = array<i64: 1>, scalar_prefetch = 0 : i64, scratch_operands = 0 : i64, tpu.core_type = #tpu.core_type<tc>, window_params = [{transform_indices = @transform_0, window_bounds = array<i64: 8, 32>}, {transform_indices = @transform_1, window_bounds = array<i64: 8, 32>}, {transform_indices = @transform_2, window_bounds = array<i64: 8, 8, 16>}, {pipeline_mode = #tpu.pipeline_mode<synchronous>, transform_indices = @transform_3, window_bounds = array<i64: 16, 96>}, {pipeline_mode = #tpu.pipeline_mode<synchronous>, transform_indices = @transform_4, window_bounds = array<i64: 32, 96>}, {pipeline_mode = #tpu.pipeline_mode<synchronous>, transform_indices = @transform_5, window_bounds = array<i64: 1, 96>}, {pipeline_mode = #tpu.pipeline_mode<synchronous>, transform_indices = @transform_6, window_bounds = array<i64: 1, 32>}, {pipeline_mode = #tpu.pipeline_mode<synchronous>, transform_indices = @transform_7, window_bounds = array<i64: 32, 32>}, {pipeline_mode = #tpu.pipeline_mode<synchronous>, transform_indices = @transform_8, window_bounds = array<i64: 1, 32>}, {pipeline_mode = #tpu.pipeline_mode<synchronous>, transform_indices = @transform_9, window_bounds = array<i64: 32, 32>}, {pipeline_mode = #tpu.pipeline_mode<synchronous>, transform_indices = @transform_10, window_bounds = array<i64: 1, 32>}, {pipeline_mode = #tpu.pipeline_mode<synchronous>, transform_indices = @transform_11, window_bounds = array<i64: 32, 64>}, {pipeline_mode = #tpu.pipeline_mode<synchronous>, transform_indices = @transform_12, window_bounds = array<i64: 1, 64>}, {pipeline_mode = #tpu.pipeline_mode<synchronous>, transform_indices = @transform_13, window_bounds = array<i64: 64, 128>}, {pipeline_mode = #tpu.pipeline_mode<synchronous>, transform_indices = @transform_14, window_bounds = array<i64: 1, 128>}, {transform_indices = @transform_15, window_bounds = array<i64: 8, 128>}]} {
    %c0 = arith.constant 0 : index
    %c0_0 = arith.constant 0 : index
    %c0_1 = arith.constant 0 : index
    %0 = vector.load %arg3[%c0, %c0_0, %c0_1] : memref<8x8x16xbf16, #tpu.memory_space<vmem>>, vector<8x8x16xbf16>
    %1 = vector.shape_cast %0 : vector<8x8x16xbf16> to vector<64x16xbf16>
    %c0_2 = arith.constant 0 : index
    %c0_3 = arith.constant 0 : index
    %2 = vector.load %arg4[%c0_2, %c0_3] : memref<16x96xbf16, #tpu.memory_space<vmem>>, vector<16x96xbf16>
    %cst = arith.constant dense<0.000000e+00> : vector<64x96xf32>
    %3 = tpu.matmul %1, %2, %cst {dimension_numbers = #tpu.dot_dimension_numbers<[1], [0], [0], [1], [0, 0, 1, 1], [], []>} : vector<64x16xbf16>, vector<16x96xbf16>, vector<64x96xf32> -> vector<64x96xf32>
    %c0_4 = arith.constant 0 : index
    %c0_5 = arith.constant 0 : index
    %4 = vector.load %arg6[%c0_4, %c0_5] : memref<1x96xf32, #tpu.memory_space<vmem>>, vector<1x96xf32>
    %5 = vector.broadcast %4 : vector<1x96xf32> to vector<64x96xf32>
    %6 = arith.addf %3, %5 : vector<64x96xf32>
    %7 = arith.truncf %6 : vector<64x96xf32> to vector<64x96xbf16>
    %8 = vector.shape_cast %7 : vector<64x96xbf16> to vector<8x8x96xbf16>
    %c0_6 = arith.constant 0 : index
    %c0_7 = arith.constant 0 : index
    %9 = vector.load %arg5[%c0_6, %c0_7] : memref<32x96xbf16, #tpu.memory_space<vmem>>, vector<32x96xbf16>
    %c0_8 = arith.constant 0 : index
    %c0_9 = arith.constant 0 : index
    %10 = vector.load %arg7[%c0_8, %c0_9] : memref<1x32xf32, #tpu.memory_space<vmem>>, vector<1x32xf32>
    %11 = vector.shape_cast %10 : vector<1x32xf32> to vector<1x32xf32>
    %12 = vector.broadcast %11 : vector<1x32xf32> to vector<8x32xf32>
    %cst_10 = arith.constant 0.000000e+00 : f32
    %13 = vector.broadcast %cst_10 : f32 to vector<8x32xf32>
    %14 = arith.truncf %13 : vector<8x32xf32> to vector<8x32xbf16>
    %cst_11 = arith.constant dense<0.000000e+00> : vector<8x96xf32>
    %15 = tpu.matmul %14, %9, %cst_11 {dimension_numbers = #tpu.dot_dimension_numbers<[1], [0], [0], [1], [0, 0, 1, 1], [], []>} : vector<8x32xbf16>, vector<32x96xbf16>, vector<8x96xf32> -> vector<8x96xf32>
    %16 = vector.extract_strided_slice %8 {offsets = [0, 0, 0], sizes = [8, 1, 96], strides = [1, 1, 1]} : vector<8x8x96xbf16> to vector<8x1x96xbf16>
    %17 = vector.shape_cast %16 : vector<8x1x96xbf16> to vector<8x96xbf16>
    %18 = arith.extf %17 : vector<8x96xbf16> to vector<8x96xf32>
    %19 = vector.extract_strided_slice %18 {offsets = [0, 0], sizes = [8, 32], strides = [1, 1]} : vector<8x96xf32> to vector<8x32xf32>
    %20 = vector.extract_strided_slice %15 {offsets = [0, 0], sizes = [8, 32], strides = [1, 1]} : vector<8x96xf32> to vector<8x32xf32>
    %21 = arith.addf %19, %20 : vector<8x32xf32>
    %22 = arith.negf %21 : vector<8x32xf32>
    %23 = math.exp %22 : vector<8x32xf32>
    %cst_12 = arith.constant 1.000000e+00 : f32
    %24 = vector.broadcast %cst_12 : f32 to vector<8x32xf32>
    %25 = arith.addf %24, %23 : vector<8x32xf32>
    %26 = arith.divf %24, %25 : vector<8x32xf32>
    %27 = vector.extract_strided_slice %18 {offsets = [0, 32], sizes = [8, 32], strides = [1, 1]} : vector<8x96xf32> to vector<8x32xf32>
    %28 = vector.extract_strided_slice %15 {offsets = [0, 32], sizes = [8, 32], strides = [1, 1]} : vector<8x96xf32> to vector<8x32xf32>
    %29 = arith.addf %27, %28 : vector<8x32xf32>
    %30 = arith.negf %29 : vector<8x32xf32>
    %31 = math.exp %30 : vector<8x32xf32>
    %cst_13 = arith.constant 1.000000e+00 : f32
    %32 = vector.broadcast %cst_13 : f32 to vector<8x32xf32>
    %33 = arith.addf %32, %31 : vector<8x32xf32>
    %34 = arith.divf %32, %33 : vector<8x32xf32>
    %35 = vector.extract_strided_slice %18 {offsets = [0, 64], sizes = [8, 32], strides = [1, 1]} : vector<8x96xf32> to vector<8x32xf32>
    %36 = vector.extract_strided_slice %15 {offsets = [0, 64], sizes = [8, 32], strides = [1, 1]} : vector<8x96xf32> to vector<8x32xf32>
    %37 = arith.addf %36, %12 : vector<8x32xf32>
    %38 = arith.mulf %26, %37 : vector<8x32xf32>
    %39 = arith.addf %35, %38 : vector<8x32xf32>
    %40 = math.tanh %39 : vector<8x32xf32>
    %cst_14 = arith.constant 1.000000e+00 : f32
    %41 = vector.broadcast %cst_14 : f32 to vector<8x32xf32>
    %42 = arith.subf %41, %34 : vector<8x32xf32>
    %43 = arith.mulf %42, %40 : vector<8x32xf32>
    %44 = arith.mulf %34, %13 : vector<8x32xf32>
    %45 = arith.addf %43, %44 : vector<8x32xf32>
    %46 = arith.truncf %45 : vector<8x32xf32> to vector<8x32xbf16>
    %cst_15 = arith.constant dense<0.000000e+00> : vector<8x96xf32>
    %47 = tpu.matmul %46, %9, %cst_15 {dimension_numbers = #tpu.dot_dimension_numbers<[1], [0], [0], [1], [0, 0, 1, 1], [], []>} : vector<8x32xbf16>, vector<32x96xbf16>, vector<8x96xf32> -> vector<8x96xf32>
    %48 = vector.extract_strided_slice %8 {offsets = [0, 1, 0], sizes = [8, 1, 96], strides = [1, 1, 1]} : vector<8x8x96xbf16> to vector<8x1x96xbf16>
    %49 = vector.shape_cast %48 : vector<8x1x96xbf16> to vector<8x96xbf16>
    %50 = arith.extf %49 : vector<8x96xbf16> to vector<8x96xf32>
    %51 = vector.extract_strided_slice %50 {offsets = [0, 0], sizes = [8, 32], strides = [1, 1]} : vector<8x96xf32> to vector<8x32xf32>
    %52 = vector.extract_strided_slice %47 {offsets = [0, 0], sizes = [8, 32], strides = [1, 1]} : vector<8x96xf32> to vector<8x32xf32>
    %53 = arith.addf %51, %52 : vector<8x32xf32>
    %54 = arith.negf %53 : vector<8x32xf32>
    %55 = math.exp %54 : vector<8x32xf32>
    %cst_16 = arith.constant 1.000000e+00 : f32
    %56 = vector.broadcast %cst_16 : f32 to vector<8x32xf32>
    %57 = arith.addf %56, %55 : vector<8x32xf32>
    %58 = arith.divf %56, %57 : vector<8x32xf32>
    %59 = vector.extract_strided_slice %50 {offsets = [0, 32], sizes = [8, 32], strides = [1, 1]} : vector<8x96xf32> to vector<8x32xf32>
    %60 = vector.extract_strided_slice %47 {offsets = [0, 32], sizes = [8, 32], strides = [1, 1]} : vector<8x96xf32> to vector<8x32xf32>
    %61 = arith.addf %59, %60 : vector<8x32xf32>
    %62 = arith.negf %61 : vector<8x32xf32>
    %63 = math.exp %62 : vector<8x32xf32>
    %cst_17 = arith.constant 1.000000e+00 : f32
    %64 = vector.broadcast %cst_17 : f32 to vector<8x32xf32>
    %65 = arith.addf %64, %63 : vector<8x32xf32>
    %66 = arith.divf %64, %65 : vector<8x32xf32>
    %67 = vector.extract_strided_slice %50 {offsets = [0, 64], sizes = [8, 32], strides = [1, 1]} : vector<8x96xf32> to vector<8x32xf32>
    %68 = vector.extract_strided_slice %47 {offsets = [0, 64], sizes = [8, 32], strides = [1, 1]} : vector<8x96xf32> to vector<8x32xf32>
    %69 = arith.addf %68, %12 : vector<8x32xf32>
    %70 = arith.mulf %58, %69 : vector<8x32xf32>
    %71 = arith.addf %67, %70 : vector<8x32xf32>
    %72 = math.tanh %71 : vector<8x32xf32>
    %cst_18 = arith.constant 1.000000e+00 : f32
    %73 = vector.broadcast %cst_18 : f32 to vector<8x32xf32>
    %74 = arith.subf %73, %66 : vector<8x32xf32>
    %75 = arith.mulf %74, %72 : vector<8x32xf32>
    %76 = arith.mulf %66, %45 : vector<8x32xf32>
    %77 = arith.addf %75, %76 : vector<8x32xf32>
    %78 = arith.truncf %77 : vector<8x32xf32> to vector<8x32xbf16>
    %cst_19 = arith.constant dense<0.000000e+00> : vector<8x96xf32>
    %79 = tpu.matmul %78, %9, %cst_19 {dimension_numbers = #tpu.dot_dimension_numbers<[1], [0], [0], [1], [0, 0, 1, 1], [], []>} : vector<8x32xbf16>, vector<32x96xbf16>, vector<8x96xf32> -> vector<8x96xf32>
    %80 = vector.extract_strided_slice %8 {offsets = [0, 2, 0], sizes = [8, 1, 96], strides = [1, 1, 1]} : vector<8x8x96xbf16> to vector<8x1x96xbf16>
    %81 = vector.shape_cast %80 : vector<8x1x96xbf16> to vector<8x96xbf16>
    %82 = arith.extf %81 : vector<8x96xbf16> to vector<8x96xf32>
    %83 = vector.extract_strided_slice %82 {offsets = [0, 0], sizes = [8, 32], strides = [1, 1]} : vector<8x96xf32> to vector<8x32xf32>
    %84 = vector.extract_strided_slice %79 {offsets = [0, 0], sizes = [8, 32], strides = [1, 1]} : vector<8x96xf32> to vector<8x32xf32>
    %85 = arith.addf %83, %84 : vector<8x32xf32>
    %86 = arith.negf %85 : vector<8x32xf32>
    %87 = math.exp %86 : vector<8x32xf32>
    %cst_20 = arith.constant 1.000000e+00 : f32
    %88 = vector.broadcast %cst_20 : f32 to vector<8x32xf32>
    %89 = arith.addf %88, %87 : vector<8x32xf32>
    %90 = arith.divf %88, %89 : vector<8x32xf32>
    %91 = vector.extract_strided_slice %82 {offsets = [0, 32], sizes = [8, 32], strides = [1, 1]} : vector<8x96xf32> to vector<8x32xf32>
    %92 = vector.extract_strided_slice %79 {offsets = [0, 32], sizes = [8, 32], strides = [1, 1]} : vector<8x96xf32> to vector<8x32xf32>
    %93 = arith.addf %91, %92 : vector<8x32xf32>
    %94 = arith.negf %93 : vector<8x32xf32>
    %95 = math.exp %94 : vector<8x32xf32>
    %cst_21 = arith.constant 1.000000e+00 : f32
    %96 = vector.broadcast %cst_21 : f32 to vector<8x32xf32>
    %97 = arith.addf %96, %95 : vector<8x32xf32>
    %98 = arith.divf %96, %97 : vector<8x32xf32>
    %99 = vector.extract_strided_slice %82 {offsets = [0, 64], sizes = [8, 32], strides = [1, 1]} : vector<8x96xf32> to vector<8x32xf32>
    %100 = vector.extract_strided_slice %79 {offsets = [0, 64], sizes = [8, 32], strides = [1, 1]} : vector<8x96xf32> to vector<8x32xf32>
    %101 = arith.addf %100, %12 : vector<8x32xf32>
    %102 = arith.mulf %90, %101 : vector<8x32xf32>
    %103 = arith.addf %99, %102 : vector<8x32xf32>
    %104 = math.tanh %103 : vector<8x32xf32>
    %cst_22 = arith.constant 1.000000e+00 : f32
    %105 = vector.broadcast %cst_22 : f32 to vector<8x32xf32>
    %106 = arith.subf %105, %98 : vector<8x32xf32>
    %107 = arith.mulf %106, %104 : vector<8x32xf32>
    %108 = arith.mulf %98, %77 : vector<8x32xf32>
    %109 = arith.addf %107, %108 : vector<8x32xf32>
    %110 = arith.truncf %109 : vector<8x32xf32> to vector<8x32xbf16>
    %cst_23 = arith.constant dense<0.000000e+00> : vector<8x96xf32>
    %111 = tpu.matmul %110, %9, %cst_23 {dimension_numbers = #tpu.dot_dimension_numbers<[1], [0], [0], [1], [0, 0, 1, 1], [], []>} : vector<8x32xbf16>, vector<32x96xbf16>, vector<8x96xf32> -> vector<8x96xf32>
    %112 = vector.extract_strided_slice %8 {offsets = [0, 3, 0], sizes = [8, 1, 96], strides = [1, 1, 1]} : vector<8x8x96xbf16> to vector<8x1x96xbf16>
    %113 = vector.shape_cast %112 : vector<8x1x96xbf16> to vector<8x96xbf16>
    %114 = arith.extf %113 : vector<8x96xbf16> to vector<8x96xf32>
    %115 = vector.extract_strided_slice %114 {offsets = [0, 0], sizes = [8, 32], strides = [1, 1]} : vector<8x96xf32> to vector<8x32xf32>
    %116 = vector.extract_strided_slice %111 {offsets = [0, 0], sizes = [8, 32], strides = [1, 1]} : vector<8x96xf32> to vector<8x32xf32>
    %117 = arith.addf %115, %116 : vector<8x32xf32>
    %118 = arith.negf %117 : vector<8x32xf32>
    %119 = math.exp %118 : vector<8x32xf32>
    %cst_24 = arith.constant 1.000000e+00 : f32
    %120 = vector.broadcast %cst_24 : f32 to vector<8x32xf32>
    %121 = arith.addf %120, %119 : vector<8x32xf32>
    %122 = arith.divf %120, %121 : vector<8x32xf32>
    %123 = vector.extract_strided_slice %114 {offsets = [0, 32], sizes = [8, 32], strides = [1, 1]} : vector<8x96xf32> to vector<8x32xf32>
    %124 = vector.extract_strided_slice %111 {offsets = [0, 32], sizes = [8, 32], strides = [1, 1]} : vector<8x96xf32> to vector<8x32xf32>
    %125 = arith.addf %123, %124 : vector<8x32xf32>
    %126 = arith.negf %125 : vector<8x32xf32>
    %127 = math.exp %126 : vector<8x32xf32>
    %cst_25 = arith.constant 1.000000e+00 : f32
    %128 = vector.broadcast %cst_25 : f32 to vector<8x32xf32>
    %129 = arith.addf %128, %127 : vector<8x32xf32>
    %130 = arith.divf %128, %129 : vector<8x32xf32>
    %131 = vector.extract_strided_slice %114 {offsets = [0, 64], sizes = [8, 32], strides = [1, 1]} : vector<8x96xf32> to vector<8x32xf32>
    %132 = vector.extract_strided_slice %111 {offsets = [0, 64], sizes = [8, 32], strides = [1, 1]} : vector<8x96xf32> to vector<8x32xf32>
    %133 = arith.addf %132, %12 : vector<8x32xf32>
    %134 = arith.mulf %122, %133 : vector<8x32xf32>
    %135 = arith.addf %131, %134 : vector<8x32xf32>
    %136 = math.tanh %135 : vector<8x32xf32>
    %cst_26 = arith.constant 1.000000e+00 : f32
    %137 = vector.broadcast %cst_26 : f32 to vector<8x32xf32>
    %138 = arith.subf %137, %130 : vector<8x32xf32>
    %139 = arith.mulf %138, %136 : vector<8x32xf32>
    %140 = arith.mulf %130, %109 : vector<8x32xf32>
    %141 = arith.addf %139, %140 : vector<8x32xf32>
    %142 = arith.truncf %141 : vector<8x32xf32> to vector<8x32xbf16>
    %cst_27 = arith.constant dense<0.000000e+00> : vector<8x96xf32>
    %143 = tpu.matmul %142, %9, %cst_27 {dimension_numbers = #tpu.dot_dimension_numbers<[1], [0], [0], [1], [0, 0, 1, 1], [], []>} : vector<8x32xbf16>, vector<32x96xbf16>, vector<8x96xf32> -> vector<8x96xf32>
    %144 = vector.extract_strided_slice %8 {offsets = [0, 4, 0], sizes = [8, 1, 96], strides = [1, 1, 1]} : vector<8x8x96xbf16> to vector<8x1x96xbf16>
    %145 = vector.shape_cast %144 : vector<8x1x96xbf16> to vector<8x96xbf16>
    %146 = arith.extf %145 : vector<8x96xbf16> to vector<8x96xf32>
    %147 = vector.extract_strided_slice %146 {offsets = [0, 0], sizes = [8, 32], strides = [1, 1]} : vector<8x96xf32> to vector<8x32xf32>
    %148 = vector.extract_strided_slice %143 {offsets = [0, 0], sizes = [8, 32], strides = [1, 1]} : vector<8x96xf32> to vector<8x32xf32>
    %149 = arith.addf %147, %148 : vector<8x32xf32>
    %150 = arith.negf %149 : vector<8x32xf32>
    %151 = math.exp %150 : vector<8x32xf32>
    %cst_28 = arith.constant 1.000000e+00 : f32
    %152 = vector.broadcast %cst_28 : f32 to vector<8x32xf32>
    %153 = arith.addf %152, %151 : vector<8x32xf32>
    %154 = arith.divf %152, %153 : vector<8x32xf32>
    %155 = vector.extract_strided_slice %146 {offsets = [0, 32], sizes = [8, 32], strides = [1, 1]} : vector<8x96xf32> to vector<8x32xf32>
    %156 = vector.extract_strided_slice %143 {offsets = [0, 32], sizes = [8, 32], strides = [1, 1]} : vector<8x96xf32> to vector<8x32xf32>
    %157 = arith.addf %155, %156 : vector<8x32xf32>
    %158 = arith.negf %157 : vector<8x32xf32>
    %159 = math.exp %158 : vector<8x32xf32>
    %cst_29 = arith.constant 1.000000e+00 : f32
    %160 = vector.broadcast %cst_29 : f32 to vector<8x32xf32>
    %161 = arith.addf %160, %159 : vector<8x32xf32>
    %162 = arith.divf %160, %161 : vector<8x32xf32>
    %163 = vector.extract_strided_slice %146 {offsets = [0, 64], sizes = [8, 32], strides = [1, 1]} : vector<8x96xf32> to vector<8x32xf32>
    %164 = vector.extract_strided_slice %143 {offsets = [0, 64], sizes = [8, 32], strides = [1, 1]} : vector<8x96xf32> to vector<8x32xf32>
    %165 = arith.addf %164, %12 : vector<8x32xf32>
    %166 = arith.mulf %154, %165 : vector<8x32xf32>
    %167 = arith.addf %163, %166 : vector<8x32xf32>
    %168 = math.tanh %167 : vector<8x32xf32>
    %cst_30 = arith.constant 1.000000e+00 : f32
    %169 = vector.broadcast %cst_30 : f32 to vector<8x32xf32>
    %170 = arith.subf %169, %162 : vector<8x32xf32>
    %171 = arith.mulf %170, %168 : vector<8x32xf32>
    %172 = arith.mulf %162, %141 : vector<8x32xf32>
    %173 = arith.addf %171, %172 : vector<8x32xf32>
    %174 = arith.truncf %173 : vector<8x32xf32> to vector<8x32xbf16>
    %cst_31 = arith.constant dense<0.000000e+00> : vector<8x96xf32>
    %175 = tpu.matmul %174, %9, %cst_31 {dimension_numbers = #tpu.dot_dimension_numbers<[1], [0], [0], [1], [0, 0, 1, 1], [], []>} : vector<8x32xbf16>, vector<32x96xbf16>, vector<8x96xf32> -> vector<8x96xf32>
    %176 = vector.extract_strided_slice %8 {offsets = [0, 5, 0], sizes = [8, 1, 96], strides = [1, 1, 1]} : vector<8x8x96xbf16> to vector<8x1x96xbf16>
    %177 = vector.shape_cast %176 : vector<8x1x96xbf16> to vector<8x96xbf16>
    %178 = arith.extf %177 : vector<8x96xbf16> to vector<8x96xf32>
    %179 = vector.extract_strided_slice %178 {offsets = [0, 0], sizes = [8, 32], strides = [1, 1]} : vector<8x96xf32> to vector<8x32xf32>
    %180 = vector.extract_strided_slice %175 {offsets = [0, 0], sizes = [8, 32], strides = [1, 1]} : vector<8x96xf32> to vector<8x32xf32>
    %181 = arith.addf %179, %180 : vector<8x32xf32>
    %182 = arith.negf %181 : vector<8x32xf32>
    %183 = math.exp %182 : vector<8x32xf32>
    %cst_32 = arith.constant 1.000000e+00 : f32
    %184 = vector.broadcast %cst_32 : f32 to vector<8x32xf32>
    %185 = arith.addf %184, %183 : vector<8x32xf32>
    %186 = arith.divf %184, %185 : vector<8x32xf32>
    %187 = vector.extract_strided_slice %178 {offsets = [0, 32], sizes = [8, 32], strides = [1, 1]} : vector<8x96xf32> to vector<8x32xf32>
    %188 = vector.extract_strided_slice %175 {offsets = [0, 32], sizes = [8, 32], strides = [1, 1]} : vector<8x96xf32> to vector<8x32xf32>
    %189 = arith.addf %187, %188 : vector<8x32xf32>
    %190 = arith.negf %189 : vector<8x32xf32>
    %191 = math.exp %190 : vector<8x32xf32>
    %cst_33 = arith.constant 1.000000e+00 : f32
    %192 = vector.broadcast %cst_33 : f32 to vector<8x32xf32>
    %193 = arith.addf %192, %191 : vector<8x32xf32>
    %194 = arith.divf %192, %193 : vector<8x32xf32>
    %195 = vector.extract_strided_slice %178 {offsets = [0, 64], sizes = [8, 32], strides = [1, 1]} : vector<8x96xf32> to vector<8x32xf32>
    %196 = vector.extract_strided_slice %175 {offsets = [0, 64], sizes = [8, 32], strides = [1, 1]} : vector<8x96xf32> to vector<8x32xf32>
    %197 = arith.addf %196, %12 : vector<8x32xf32>
    %198 = arith.mulf %186, %197 : vector<8x32xf32>
    %199 = arith.addf %195, %198 : vector<8x32xf32>
    %200 = math.tanh %199 : vector<8x32xf32>
    %cst_34 = arith.constant 1.000000e+00 : f32
    %201 = vector.broadcast %cst_34 : f32 to vector<8x32xf32>
    %202 = arith.subf %201, %194 : vector<8x32xf32>
    %203 = arith.mulf %202, %200 : vector<8x32xf32>
    %204 = arith.mulf %194, %173 : vector<8x32xf32>
    %205 = arith.addf %203, %204 : vector<8x32xf32>
    %206 = arith.truncf %205 : vector<8x32xf32> to vector<8x32xbf16>
    %cst_35 = arith.constant dense<0.000000e+00> : vector<8x96xf32>
    %207 = tpu.matmul %206, %9, %cst_35 {dimension_numbers = #tpu.dot_dimension_numbers<[1], [0], [0], [1], [0, 0, 1, 1], [], []>} : vector<8x32xbf16>, vector<32x96xbf16>, vector<8x96xf32> -> vector<8x96xf32>
    %208 = vector.extract_strided_slice %8 {offsets = [0, 6, 0], sizes = [8, 1, 96], strides = [1, 1, 1]} : vector<8x8x96xbf16> to vector<8x1x96xbf16>
    %209 = vector.shape_cast %208 : vector<8x1x96xbf16> to vector<8x96xbf16>
    %210 = arith.extf %209 : vector<8x96xbf16> to vector<8x96xf32>
    %211 = vector.extract_strided_slice %210 {offsets = [0, 0], sizes = [8, 32], strides = [1, 1]} : vector<8x96xf32> to vector<8x32xf32>
    %212 = vector.extract_strided_slice %207 {offsets = [0, 0], sizes = [8, 32], strides = [1, 1]} : vector<8x96xf32> to vector<8x32xf32>
    %213 = arith.addf %211, %212 : vector<8x32xf32>
    %214 = arith.negf %213 : vector<8x32xf32>
    %215 = math.exp %214 : vector<8x32xf32>
    %cst_36 = arith.constant 1.000000e+00 : f32
    %216 = vector.broadcast %cst_36 : f32 to vector<8x32xf32>
    %217 = arith.addf %216, %215 : vector<8x32xf32>
    %218 = arith.divf %216, %217 : vector<8x32xf32>
    %219 = vector.extract_strided_slice %210 {offsets = [0, 32], sizes = [8, 32], strides = [1, 1]} : vector<8x96xf32> to vector<8x32xf32>
    %220 = vector.extract_strided_slice %207 {offsets = [0, 32], sizes = [8, 32], strides = [1, 1]} : vector<8x96xf32> to vector<8x32xf32>
    %221 = arith.addf %219, %220 : vector<8x32xf32>
    %222 = arith.negf %221 : vector<8x32xf32>
    %223 = math.exp %222 : vector<8x32xf32>
    %cst_37 = arith.constant 1.000000e+00 : f32
    %224 = vector.broadcast %cst_37 : f32 to vector<8x32xf32>
    %225 = arith.addf %224, %223 : vector<8x32xf32>
    %226 = arith.divf %224, %225 : vector<8x32xf32>
    %227 = vector.extract_strided_slice %210 {offsets = [0, 64], sizes = [8, 32], strides = [1, 1]} : vector<8x96xf32> to vector<8x32xf32>
    %228 = vector.extract_strided_slice %207 {offsets = [0, 64], sizes = [8, 32], strides = [1, 1]} : vector<8x96xf32> to vector<8x32xf32>
    %229 = arith.addf %228, %12 : vector<8x32xf32>
    %230 = arith.mulf %218, %229 : vector<8x32xf32>
    %231 = arith.addf %227, %230 : vector<8x32xf32>
    %232 = math.tanh %231 : vector<8x32xf32>
    %cst_38 = arith.constant 1.000000e+00 : f32
    %233 = vector.broadcast %cst_38 : f32 to vector<8x32xf32>
    %234 = arith.subf %233, %226 : vector<8x32xf32>
    %235 = arith.mulf %234, %232 : vector<8x32xf32>
    %236 = arith.mulf %226, %205 : vector<8x32xf32>
    %237 = arith.addf %235, %236 : vector<8x32xf32>
    %238 = arith.truncf %237 : vector<8x32xf32> to vector<8x32xbf16>
    %cst_39 = arith.constant dense<0.000000e+00> : vector<8x96xf32>
    %239 = tpu.matmul %238, %9, %cst_39 {dimension_numbers = #tpu.dot_dimension_numbers<[1], [0], [0], [1], [0, 0, 1, 1], [], []>} : vector<8x32xbf16>, vector<32x96xbf16>, vector<8x96xf32> -> vector<8x96xf32>
    %240 = vector.extract_strided_slice %8 {offsets = [0, 7, 0], sizes = [8, 1, 96], strides = [1, 1, 1]} : vector<8x8x96xbf16> to vector<8x1x96xbf16>
    %241 = vector.shape_cast %240 : vector<8x1x96xbf16> to vector<8x96xbf16>
    %242 = arith.extf %241 : vector<8x96xbf16> to vector<8x96xf32>
    %243 = vector.extract_strided_slice %242 {offsets = [0, 0], sizes = [8, 32], strides = [1, 1]} : vector<8x96xf32> to vector<8x32xf32>
    %244 = vector.extract_strided_slice %239 {offsets = [0, 0], sizes = [8, 32], strides = [1, 1]} : vector<8x96xf32> to vector<8x32xf32>
    %245 = arith.addf %243, %244 : vector<8x32xf32>
    %246 = arith.negf %245 : vector<8x32xf32>
    %247 = math.exp %246 : vector<8x32xf32>
    %cst_40 = arith.constant 1.000000e+00 : f32
    %248 = vector.broadcast %cst_40 : f32 to vector<8x32xf32>
    %249 = arith.addf %248, %247 : vector<8x32xf32>
    %250 = arith.divf %248, %249 : vector<8x32xf32>
    %251 = vector.extract_strided_slice %242 {offsets = [0, 32], sizes = [8, 32], strides = [1, 1]} : vector<8x96xf32> to vector<8x32xf32>
    %252 = vector.extract_strided_slice %239 {offsets = [0, 32], sizes = [8, 32], strides = [1, 1]} : vector<8x96xf32> to vector<8x32xf32>
    %253 = arith.addf %251, %252 : vector<8x32xf32>
    %254 = arith.negf %253 : vector<8x32xf32>
    %255 = math.exp %254 : vector<8x32xf32>
    %cst_41 = arith.constant 1.000000e+00 : f32
    %256 = vector.broadcast %cst_41 : f32 to vector<8x32xf32>
    %257 = arith.addf %256, %255 : vector<8x32xf32>
    %258 = arith.divf %256, %257 : vector<8x32xf32>
    %259 = vector.extract_strided_slice %242 {offsets = [0, 64], sizes = [8, 32], strides = [1, 1]} : vector<8x96xf32> to vector<8x32xf32>
    %260 = vector.extract_strided_slice %239 {offsets = [0, 64], sizes = [8, 32], strides = [1, 1]} : vector<8x96xf32> to vector<8x32xf32>
    %261 = arith.addf %260, %12 : vector<8x32xf32>
    %262 = arith.mulf %250, %261 : vector<8x32xf32>
    %263 = arith.addf %259, %262 : vector<8x32xf32>
    %264 = math.tanh %263 : vector<8x32xf32>
    %cst_42 = arith.constant 1.000000e+00 : f32
    %265 = vector.broadcast %cst_42 : f32 to vector<8x32xf32>
    %266 = arith.subf %265, %258 : vector<8x32xf32>
    %267 = arith.mulf %266, %264 : vector<8x32xf32>
    %268 = arith.mulf %258, %237 : vector<8x32xf32>
    %269 = arith.addf %267, %268 : vector<8x32xf32>
    %270 = arith.truncf %269 : vector<8x32xf32> to vector<8x32xbf16>
    %c0_43 = arith.constant 0 : index
    %c0_44 = arith.constant 0 : index
    %271 = vector.load %arg8[%c0_43, %c0_44] : memref<32x32xbf16, #tpu.memory_space<vmem>>, vector<32x32xbf16>
    %cst_45 = arith.constant dense<0.000000e+00> : vector<8x32xf32>
    %272 = tpu.matmul %270, %271, %cst_45 {dimension_numbers = #tpu.dot_dimension_numbers<[1], [0], [0], [1], [0, 0, 1, 1], [], []>} : vector<8x32xbf16>, vector<32x32xbf16>, vector<8x32xf32> -> vector<8x32xf32>
    %c0_46 = arith.constant 0 : index
    %c0_47 = arith.constant 0 : index
    %273 = vector.load %arg9[%c0_46, %c0_47] : memref<1x32xf32, #tpu.memory_space<vmem>>, vector<1x32xf32>
    %274 = vector.broadcast %273 : vector<1x32xf32> to vector<8x32xf32>
    %275 = arith.addf %272, %274 : vector<8x32xf32>
    %cst_48 = arith.constant 0.000000e+00 : f32
    %276 = vector.broadcast %cst_48 : f32 to vector<8x32xf32>
    %277 = arith.maximumf %275, %276 : vector<8x32xf32>
    %c0_49 = arith.constant 0 : index
    %c0_50 = arith.constant 0 : index
    %278 = vector.load %arg1[%c0_49, %c0_50] : memref<8x32xbf16, #tpu.memory_space<vmem>>, vector<8x32xbf16>
    %c0_51 = arith.constant 0 : index
    %c0_52 = arith.constant 0 : index
    %279 = vector.load %arg10[%c0_51, %c0_52] : memref<32x32xbf16, #tpu.memory_space<vmem>>, vector<32x32xbf16>
    %cst_53 = arith.constant dense<0.000000e+00> : vector<8x32xf32>
    %280 = tpu.matmul %278, %279, %cst_53 {dimension_numbers = #tpu.dot_dimension_numbers<[1], [0], [0], [1], [0, 0, 1, 1], [], []>} : vector<8x32xbf16>, vector<32x32xbf16>, vector<8x32xf32> -> vector<8x32xf32>
    %c0_54 = arith.constant 0 : index
    %c0_55 = arith.constant 0 : index
    %281 = vector.load %arg11[%c0_54, %c0_55] : memref<1x32xf32, #tpu.memory_space<vmem>>, vector<1x32xf32>
    %282 = vector.broadcast %281 : vector<1x32xf32> to vector<8x32xf32>
    %283 = arith.addf %280, %282 : vector<8x32xf32>
    %cst_56 = arith.constant 0.000000e+00 : f32
    %284 = vector.broadcast %cst_56 : f32 to vector<8x32xf32>
    %285 = arith.maximumf %283, %284 : vector<8x32xf32>
    %c0_57 = arith.constant 0 : index
    %c0_58 = arith.constant 0 : index
    %286 = vector.load %arg2[%c0_57, %c0_58] : memref<8x32xf32, #tpu.memory_space<vmem>>, vector<8x32xf32>
    %287 = arith.addf %277, %285 : vector<8x32xf32>
    %288 = arith.mulf %286, %287 : vector<8x32xf32>
    %289 = arith.truncf %288 : vector<8x32xf32> to vector<8x32xbf16>
    %c0_59 = arith.constant 0 : index
    %c0_60 = arith.constant 0 : index
    %290 = vector.load %arg12[%c0_59, %c0_60] : memref<32x64xbf16, #tpu.memory_space<vmem>>, vector<32x64xbf16>
    %cst_61 = arith.constant dense<0.000000e+00> : vector<8x64xf32>
    %291 = tpu.matmul %289, %290, %cst_61 {dimension_numbers = #tpu.dot_dimension_numbers<[1], [0], [0], [1], [0, 0, 1, 1], [], []>} : vector<8x32xbf16>, vector<32x64xbf16>, vector<8x64xf32> -> vector<8x64xf32>
    %c0_62 = arith.constant 0 : index
    %c0_63 = arith.constant 0 : index
    %292 = vector.load %arg13[%c0_62, %c0_63] : memref<1x64xf32, #tpu.memory_space<vmem>>, vector<1x64xf32>
    %293 = vector.broadcast %292 : vector<1x64xf32> to vector<8x64xf32>
    %294 = arith.addf %291, %293 : vector<8x64xf32>
    %cst_64 = arith.constant 0.000000e+00 : f32
    %295 = vector.broadcast %cst_64 : f32 to vector<8x64xf32>
    %296 = arith.maximumf %294, %295 : vector<8x64xf32>
    %297 = arith.truncf %296 : vector<8x64xf32> to vector<8x64xbf16>
    %c0_65 = arith.constant 0 : index
    %c0_66 = arith.constant 0 : index
    %298 = vector.load %arg14[%c0_65, %c0_66] : memref<64x128xbf16, #tpu.memory_space<vmem>>, vector<64x128xbf16>
    %cst_67 = arith.constant dense<0.000000e+00> : vector<8x128xf32>
    %299 = tpu.matmul %297, %298, %cst_67 {dimension_numbers = #tpu.dot_dimension_numbers<[1], [0], [0], [1], [0, 0, 1, 1], [], []>} : vector<8x64xbf16>, vector<64x128xbf16>, vector<8x128xf32> -> vector<8x128xf32>
    %c0_68 = arith.constant 0 : index
    %c0_69 = arith.constant 0 : index
    %300 = vector.load %arg15[%c0_68, %c0_69] : memref<1x128xf32, #tpu.memory_space<vmem>>, vector<1x128xf32>
    %301 = vector.broadcast %300 : vector<1x128xf32> to vector<8x128xf32>
    %302 = arith.addf %299, %301 : vector<8x128xf32>
    %c0_70 = arith.constant 0 : index
    %c0_71 = arith.constant 0 : index
    %303 = vector.load %arg16[%c0_70, %c0_71] : memref<8x128xf32, #tpu.memory_space<vmem>>, vector<8x128xf32>
    tpu.vector_store %arg16[%c0_70, %c0_71], %302 {strides = array<i32>} : memref<8x128xf32, #tpu.memory_space<vmem>>, vector<8x128xf32>,
    return
  }
  func.func @transform_0(%arg0: i32) -> (i32, i32) {
    %c0_i32 = arith.constant 0 : i32
    %c0_i32_0 = arith.constant 0 : i32
    return %arg0, %c0_i32 : i32, i32
  }
  func.func @transform_1(%arg0: i32) -> (i32, i32) {
    %c0_i32 = arith.constant 0 : i32
    %c0_i32_0 = arith.constant 0 : i32
    return %arg0, %c0_i32 : i32, i32
  }
  func.func @transform_2(%arg0: i32) -> (i32, i32, i32) {
    %c0_i32 = arith.constant 0 : i32
    %c0_i32_0 = arith.constant 0 : i32
    %c0_i32_1 = arith.constant 0 : i32
    return %arg0, %c0_i32, %c0_i32_0 : i32, i32, i32
  }
  func.func @transform_3(%arg0: i32) -> (i32, i32) {
    %c0_i32 = arith.constant 0 : i32
    %c0_i32_0 = arith.constant 0 : i32
    %c0_i32_1 = arith.constant 0 : i32
    return %c0_i32, %c0_i32_0 : i32, i32
  }
  func.func @transform_4(%arg0: i32) -> (i32, i32) {
    %c0_i32 = arith.constant 0 : i32
    %c0_i32_0 = arith.constant 0 : i32
    %c0_i32_1 = arith.constant 0 : i32
    return %c0_i32, %c0_i32_0 : i32, i32
  }
  func.func @transform_5(%arg0: i32) -> (i32, i32) {
    %c0_i32 = arith.constant 0 : i32
    %c0_i32_0 = arith.constant 0 : i32
    %c0_i32_1 = arith.constant 0 : i32
    return %c0_i32, %c0_i32_0 : i32, i32
  }
  func.func @transform_6(%arg0: i32) -> (i32, i32) {
    %c0_i32 = arith.constant 0 : i32
    %c0_i32_0 = arith.constant 0 : i32
    %c0_i32_1 = arith.constant 0 : i32
    return %c0_i32, %c0_i32_0 : i32, i32
  }
  func.func @transform_7(%arg0: i32) -> (i32, i32) {
    %c0_i32 = arith.constant 0 : i32
    %c0_i32_0 = arith.constant 0 : i32
    %c0_i32_1 = arith.constant 0 : i32
    return %c0_i32, %c0_i32_0 : i32, i32
  }
  func.func @transform_8(%arg0: i32) -> (i32, i32) {
    %c0_i32 = arith.constant 0 : i32
    %c0_i32_0 = arith.constant 0 : i32
    %c0_i32_1 = arith.constant 0 : i32
    return %c0_i32, %c0_i32_0 : i32, i32
  }
  func.func @transform_9(%arg0: i32) -> (i32, i32) {
    %c0_i32 = arith.constant 0 : i32
    %c0_i32_0 = arith.constant 0 : i32
    %c0_i32_1 = arith.constant 0 : i32
    return %c0_i32, %c0_i32_0 : i32, i32
  }
  func.func @transform_10(%arg0: i32) -> (i32, i32) {
    %c0_i32 = arith.constant 0 : i32
    %c0_i32_0 = arith.constant 0 : i32
    %c0_i32_1 = arith.constant 0 : i32
    return %c0_i32, %c0_i32_0 : i32, i32
  }
  func.func @transform_11(%arg0: i32) -> (i32, i32) {
    %c0_i32 = arith.constant 0 : i32
    %c0_i32_0 = arith.constant 0 : i32
    %c0_i32_1 = arith.constant 0 : i32
    return %c0_i32, %c0_i32_0 : i32, i32
  }
  func.func @transform_12(%arg0: i32) -> (i32, i32) {
    %c0_i32 = arith.constant 0 : i32
    %c0_i32_0 = arith.constant 0 : i32
    %c0_i32_1 = arith.constant 0 : i32
    return %c0_i32, %c0_i32_0 : i32, i32
  }
  func.func @transform_13(%arg0: i32) -> (i32, i32) {
    %c0_i32 = arith.constant 0 : i32
    %c0_i32_0 = arith.constant 0 : i32
    %c0_i32_1 = arith.constant 0 : i32
    return %c0_i32, %c0_i32_0 : i32, i32
  }
  func.func @transform_14(%arg0: i32) -> (i32, i32) {
    %c0_i32 = arith.constant 0 : i32
    %c0_i32_0 = arith.constant 0 : i32
    %c0_i32_1 = arith.constant 0 : i32
    return %c0_i32, %c0_i32_0 : i32, i32
  }
  func.func @transform_15(%arg0: i32) -> (i32, i32) {
    %c0_i32 = arith.constant 0 : i32
    %c0_i32_0 = arith.constant 0 : i32
    return %arg0, %c0_i32 : i32, i32
  }
}

</mosaic_0001>

<bundles_post_ra>
// kernel: tpu_custom_call.1
= control target key start
LH: loop header
LB: loop body
LE: loop exit
PB: predicated region body
PF: predicated region fallthrough
CT: control target
= control target key end

     0   :  { %20 = vsyncpa [#allocation3], 0  ;;  %s5695_s0 = inlined_call_operand.hbm [shape: bf16[8,32], index: 0, kind: input, shape index: {}]   ;;  %s5696_s1 = inlined_call_operand.hbm [shape: f32[8,32], index: 1, kind: input, shape index: {}]   ;;  %s5697_s2 = inlined_call_operand.hbm [shape: bf16[8,8,16], index: 2, kind: input, shape index: {}]   ;;  %s5698_s3 = inlined_call_operand.hbm [shape: bf16[16,96], index: 3, kind: input, shape index: {}]   ;;  %s5699_s4 = inlined_call_operand.hbm [shape: bf16[32,96], index: 4, kind: input, shape index: {}]   ;;  %s5700_s5 = inlined_call_operand.vmem [shape: f32[1,96], index: 5, kind: input, shape index: {}]   ;;  %s5701_s6 = inlined_call_operand.hbm [shape: f32[1,32], index: 6, kind: input, shape index: {}]   ;;  %s5702_s7 = inlined_call_operand.vmem [shape: bf16[32,32], index: 7, kind: input, shape index: {}]   ;;  %s5703_s8 = inlined_call_operand.hbm [shape: f32[1,32], index: 8, kind: input, shape index: {}]   ;;  %s5704_s9 = inlined_call_operand.hbm [shape: bf16[32,32], index: 9, kind: input, shape index: {}]   ;;  %s5705_s10 = inlined_call_operand.hbm [shape: f32[1,32], index: 10, kind: input, shape index: {}]   ;;  %s5706_s11 = inlined_call_operand.hbm [shape: bf16[32,64], index: 11, kind: input, shape index: {}]   ;;  %s5707_s12 = inlined_call_operand.hbm [shape: f32[1,64], index: 12, kind: input, shape index: {}]   ;;  %s5708_s13 = inlined_call_operand.vmem [shape: bf16[64,128], index: 13, kind: input, shape index: {}]   ;;  %s5709_s14 = inlined_call_operand.vmem [shape: f32[1,128], index: 14, kind: input, shape index: {}]   ;;  %s5710_s15 = inlined_call_operand.hbm [shape: f32[8,128], index: 15, kind: output, shape index: {}]  }
   0x1   :  { %21 = vsyncpa [#allocation6], 0 }
   0x2   :  { %22 = vsyncpa [#allocation9], 0 }
   0x3   :  { %23 = vsyncpa [#allocation12], 0 }
   0x4   :  { %24 = vsyncpa [#allocation15], 0 }
   0x5   :  { %25 = vsyncpa [#allocation18], 0 }
   0x6   :  { %26 = vsyncpa [#allocation4], 0  ;;  %s4306_s18 = smov [#allocation5]   ;;  %s4028_s22 = scalar_lea.hbm %s5696_s1, 128 }
   0x7   :  { %s43_s19 = sshll.u32 %s4306_s18, 4  ;;  %p4029_p0 = scmp.ne.s32.totalorder %s5696_s1, %s4028_s22  ;;  %s44_s19 = int_to_ptr.vmem [resolvable:$true] %s43_s19 }
   0x8   :  { %p4032_p1 = scmp.lt.u32.totalorder %s4028_s22, %s5696_s1 }
   0xa   :  { %p4034_p2 = pnand %p4032_p1, %p4029_p0 }
   0xc   :  { %4037 = shalt.err (!%p4034_p2)
}
   0xd   :  { %s4038_s27 = scalar_lea.vmem %s44_s19, 128  ;;  %p4043_p4 = scmp.lt.s32.totalorder %s44_s19, %s44_s19 }
   0xe   :  { %p4039_p3 = scmp.ne.s32.totalorder %s44_s19, %s4038_s27  ;;  %p4044_p5 = scmp.lt.s32.totalorder %s4038_s27, %s4038_s27 }
  0x10   :  { %p4045_p6 = por %p4044_p5, %p4043_p4 }
  0x12   :  { %p4046_p7 = pnand %p4045_p6, %p4039_p3 }
  0x14   :  { %4049 = shalt.err (!%p4046_p7)
}
  0x15   :  { %46 = dma.hbm_to_vmem [thread:$0]  %s5696_s1, 128, %s44_s19, [#allocation6]  }
  0x16   :  { %s4307_s30 = smov [#allocation8]   ;;  %s4308_s17 = smov [#allocation11]  }
  0x17   :  { %s64_s16 = sshll.u32 %s4307_s30, 4  ;;  %s91_s18 = sshll.u32 %s4308_s17, 4  ;;  %s65_s16 = int_to_ptr.vmem [resolvable:$true] %s64_s16  ;;  %s92_s18 = int_to_ptr.vmem [resolvable:$true] %s91_s18 }
  0x18   :  { %s4050_s22 = scalar_lea.hbm %s5698_s3, 128 }
  0x19   :  { %p4051_p8 = scmp.ne.s32.totalorder %s5698_s3, %s4050_s22  ;;  %p4054_p9 = scmp.lt.u32.totalorder %s4050_s22, %s5698_s3 }
  0x1b   :  { %p4056_p10 = pnand %p4054_p9, %p4051_p8 }
  0x1d   :  { %4059 = shalt.err (!%p4056_p10)
}
  0x1e   :  { %s4060_s1 = scalar_lea.vmem %s65_s16, 128  ;;  %p4065_p12 = scmp.lt.s32.totalorder %s65_s16, %s65_s16 }
  0x1f   :  { %p4061_p11 = scmp.ne.s32.totalorder %s65_s16, %s4060_s1  ;;  %p4066_p13 = scmp.lt.s32.totalorder %s4060_s1, %s4060_s1 }
  0x21   :  { %p4067_p0 = por %p4066_p13, %p4065_p12 }
  0x23   :  { %p4068_p1 = pnand %p4067_p0, %p4061_p11 }
  0x25   :  { %4071 = shalt.err (!%p4068_p1)
}
  0x26   :  { %s4309_s19 = smov 64   ;;  %s4310_s27 = smov 4  }
  0x27   :  { %70 = dma.hbm_to_vmem [thread:$0]  %s5698_s3, 128, %s65_s16, [#allocation9], %s4309_s19, %s4309_s19, %s4310_s27  }
  0x28   :  { %s4072_s20 = scalar_lea.hbm %s5701_s6, 16 }
  0x29   :  { %p4073_p2 = scmp.ne.s32.totalorder %s5701_s6, %s4072_s20  ;;  %p4076_p3 = scmp.lt.u32.totalorder %s4072_s20, %s5701_s6 }
  0x2b   :  { %p4078_p4 = pnand %p4076_p3, %p4073_p2 }
  0x2d   :  { %4081 = shalt.err (!%p4078_p4)
}
  0x2e   :  { %s4082_s25 = scalar_lea.vmem %s92_s18, 16  ;;  %s4086_s26 = scalar_lea.vmem %s92_s18, 32 }
  0x2f   :  { %p4083_p5 = scmp.ne.s32.totalorder %s92_s18, %s4082_s25  ;;  %p4087_p6 = scmp.lt.s32.totalorder %s92_s18, %s92_s18 }
  0x30   :  { %p4088_p7 = scmp.lt.s32.totalorder %s4086_s26, %s4082_s25 }
  0x32   :  { %p4089_p8 = por %p4088_p7, %p4087_p6 }
  0x34   :  { %p4090_p9 = pnand %p4089_p8, %p4083_p5 }
  0x36   :  { %4093 = shalt.err (!%p4090_p9)
}
  0x37   :  { %94 = dma.hbm_to_vmem [thread:$0]  %s5701_s6, 16, %s92_s18, [#allocation12]  }
  0x38   :  { %s4311_s1 = smov [#allocation14]   ;;  %s4312_s29 = smov [#allocation17]  }
  0x39   :  { %s112_s28 = sshll.u32 %s4311_s1, 4  ;;  %s134_s30 = sshll.u32 %s4312_s29, 4  ;;  %s113_s28 = int_to_ptr.vmem [resolvable:$true] %s112_s28  ;;  %s135_s30 = int_to_ptr.vmem [resolvable:$true] %s134_s30 }
  0x3a   :  { %s4094_s21 = scalar_lea.hbm %s5704_s9, 256 }
  0x3b   :  { %p4095_p10 = scmp.ne.s32.totalorder %s5704_s9, %s4094_s21  ;;  %p4098_p11 = scmp.lt.u32.totalorder %s4094_s21, %s5704_s9 }
  0x3d   :  { %p4100_p12 = pnand %p4098_p11, %p4095_p10 }
  0x3f   :  { %4103 = shalt.err (!%p4100_p12)
}
  0x40   :  { %s4104_s6 = scalar_lea.vmem %s113_s28, 256  ;;  %p4109_p0 = scmp.lt.s32.totalorder %s113_s28, %s113_s28 }
  0x41   :  { %p4105_p13 = scmp.ne.s32.totalorder %s113_s28, %s4104_s6  ;;  %p4110_p1 = scmp.lt.s32.totalorder %s4104_s6, %s4104_s6 }
  0x43   :  { %p4111_p2 = por %p4110_p1, %p4109_p0 }
  0x45   :  { %p4112_p3 = pnand %p4111_p2, %p4105_p13 }
  0x47   :  { %4115 = shalt.err (!%p4112_p3)
}
  0x48   :  { %118 = dma.hbm_to_vmem [thread:$0]  %s5704_s9, 256, %s113_s28, [#allocation15], %s4309_s19, %s4309_s19, %s4310_s27  }
  0x49   :  { %s4116_s1 = scalar_lea.hbm %s5706_s11, 256 }
  0x4a   :  { %p4117_p4 = scmp.ne.s32.totalorder %s5706_s11, %s4116_s1  ;;  %p4120_p5 = scmp.lt.u32.totalorder %s4116_s1, %s5706_s11 }
  0x4c   :  { %p4122_p6 = pnand %p4120_p5, %p4117_p4 }
  0x4e   :  { %4125 = shalt.err (!%p4122_p6)
}
  0x4f   :  { %s4126_s22 = scalar_lea.vmem %s135_s30, 256  ;;  %p4131_p8 = scmp.lt.s32.totalorder %s135_s30, %s135_s30 }
  0x50   :  { %p4127_p7 = scmp.ne.s32.totalorder %s135_s30, %s4126_s22  ;;  %p4132_p9 = scmp.lt.s32.totalorder %s4126_s22, %s4126_s22 }
  0x52   :  { %p4133_p10 = por %p4132_p9, %p4131_p8 }
  0x54   :  { %p4134_p11 = pnand %p4133_p10, %p4127_p7 }
  0x56   :  { %4137 = shalt.err (!%p4134_p11)
}
  0x57   :  { %140 = dma.hbm_to_vmem [thread:$0]  %s5706_s11, 256, %s135_s30, [#allocation18], %s4309_s19, %s4309_s19, %s4310_s27  }
  0x58   :  { %s4313_s23 = smov [#allocation2]   ;;  %s4314_s25 = smov [#allocation7]  }
  0x59   :  { %s33_s24 = sshll.u32 %s4313_s23, 4  ;;  %s52_s6 = sshll.u32 %s4314_s25, 4  ;;  %s34_s24 = int_to_ptr.vmem [resolvable:$true] %s33_s24  ;;  %s53_s6 = int_to_ptr.vmem [resolvable:$true] %s52_s6 }
  0x5a   :  { %s4138_s3 = scalar_lea.hbm %s5695_s0, 64 }
  0x5b   :  { %p4139_p12 = scmp.ne.s32.totalorder %s5695_s0, %s4138_s3  ;;  %p4142_p13 = scmp.lt.u32.totalorder %s4138_s3, %s5695_s0 }
  0x5d   :  { %p4144_p0 = pnand %p4142_p13, %p4139_p12 }
  0x5f   :  { %4147 = shalt.err (!%p4144_p0)
}
  0x60   :  { %s4148_s11 = scalar_lea.vmem %s34_s24, 64  ;;  %p4153_p2 = scmp.lt.s32.totalorder %s34_s24, %s34_s24 }
  0x61   :  { %p4149_p1 = scmp.ne.s32.totalorder %s34_s24, %s4148_s11  ;;  %p4154_p3 = scmp.lt.s32.totalorder %s4148_s11, %s4148_s11 }
  0x63   :  { %p4155_p4 = por %p4154_p3, %p4153_p2 }
  0x65   :  { %p4156_p5 = pnand %p4155_p4, %p4149_p1 }
  0x67   :  { %4159 = shalt.err (!%p4156_p5)
}
  0x68   :  { %36 = dma.hbm_to_vmem [thread:$0]  %s5695_s0, 64, %s34_s24, [#allocation3]  }
  0x69   :  { %s4160_s9 = scalar_lea.hbm %s5697_s2, 512 }
  0x6a   :  { %p4161_p6 = scmp.ne.s32.totalorder %s5697_s2, %s4160_s9  ;;  %p4164_p7 = scmp.lt.u32.totalorder %s4160_s9, %s5697_s2 }
  0x6c   :  { %p4166_p8 = pnand %p4164_p7, %p4161_p6 }
  0x6e   :  { %4169 = shalt.err (!%p4166_p8)
}
  0x6f   :  { %s4170_s26 = scalar_lea.vmem %s53_s6, 512  ;;  %p4175_p10 = scmp.lt.s32.totalorder %s53_s6, %s53_s6 }
  0x70   :  { %p4171_p9 = scmp.ne.s32.totalorder %s53_s6, %s4170_s26  ;;  %p4176_p11 = scmp.lt.s32.totalorder %s4170_s26, %s4170_s26 }
  0x72   :  { %p4177_p12 = por %p4176_p11, %p4175_p10 }
  0x74   :  { %p4178_p13 = pnand %p4177_p12, %p4171_p9 }
  0x76   :  { %4181 = shalt.err (!%p4178_p13)
}
  0x77   :  { %58 = dma.hbm_to_vmem [thread:$0]  %s5697_s2, 512, %s53_s6, [#allocation6], %s4309_s19, %s4309_s19, %s4310_s27  }
  0x78   :  { %s4315_s3 = smov [#allocation10]   ;;  %s4316_s1 = smov [#allocation13]  }
  0x79   :  { %s76_s16 = sshll.u32 %s4315_s3, 4  ;;  %s103_s29 = sshll.u32 %s4316_s1, 4  ;;  %s77_s16 = int_to_ptr.vmem [resolvable:$true] %s76_s16  ;;  %s104_s29 = int_to_ptr.vmem [resolvable:$true] %s103_s29 }
  0x7a   :  { %s4182_s30 = scalar_lea.hbm %s5699_s4, 256 }
  0x7b   :  { %p4183_p0 = scmp.ne.s32.totalorder %s5699_s4, %s4182_s30  ;;  %p4186_p1 = scmp.lt.u32.totalorder %s4182_s30, %s5699_s4 }
  0x7d   :  { %p4188_p2 = pnand %p4186_p1, %p4183_p0 }
  0x7f   :  { %4191 = shalt.err (!%p4188_p2)
}
  0x80   :  { %s4192_s2 = scalar_lea.vmem %s77_s16, 256  ;;  %p4197_p4 = scmp.lt.s32.totalorder %s77_s16, %s77_s16 }
  0x81   :  { %p4193_p3 = scmp.ne.s32.totalorder %s77_s16, %s4192_s2  ;;  %p4198_p5 = scmp.lt.s32.totalorder %s4192_s2, %s4192_s2 }
  0x83   :  { %p4199_p6 = por %p4198_p5, %p4197_p4 }
  0x85   :  { %p4200_p7 = pnand %p4199_p6, %p4193_p3 }
  0x87   :  { %4203 = shalt.err (!%p4200_p7)
}
  0x88   :  { %82 = dma.hbm_to_vmem [thread:$0]  %s5699_s4, 256, %s77_s16, [#allocation9], %s4309_s19, %s4309_s19, %s4310_s27  }
  0x89   :  { %s4204_s18 = scalar_lea.hbm %s5703_s8, 16 }
  0x8a   :  { %p4205_p8 = scmp.ne.s32.totalorder %s5703_s8, %s4204_s18  ;;  %p4208_p9 = scmp.lt.u32.totalorder %s4204_s18, %s5703_s8 }
  0x8c   :  { %p4210_p10 = pnand %p4208_p9, %p4205_p8 }
  0x8e   :  { %4213 = shalt.err (!%p4210_p10)
}
  0x8f   :  { %s4214_s1 = scalar_lea.vmem %s104_s29, 16  ;;  %s4218_s17 = scalar_lea.vmem %s104_s29, 32 }
  0x90   :  { %p4215_p11 = scmp.ne.s32.totalorder %s104_s29, %s4214_s1  ;;  %p4219_p12 = scmp.lt.s32.totalorder %s104_s29, %s104_s29 }
  0x91   :  { %p4220_p13 = scmp.lt.s32.totalorder %s4218_s17, %s4214_s1 }
  0x93   :  { %p4221_p0 = por %p4220_p13, %p4219_p12 }
  0x95   :  { %p4222_p1 = pnand %p4221_p0, %p4215_p11 }
  0x97   :  { %4225 = shalt.err (!%p4222_p1)
}
  0x98   :  { %106 = dma.hbm_to_vmem [thread:$0]  %s5703_s8, 16, %s104_s29, [#allocation12]  }
  0x99   :  { %s4317_s16 = smov [#allocation16]   ;;  %s4318_s30 = smov [#allocation19]  }
  0x9a   :  { %s125_s11 = sshll.u32 %s4317_s16, 4  ;;  %s147_s20 = sshll.u32 %s4318_s30, 4  ;;  %s126_s11 = int_to_ptr.vmem [resolvable:$true] %s125_s11  ;;  %s148_s20 = int_to_ptr.vmem [resolvable:$true] %s147_s20 }
  0x9b   :  { %s4226_s9 = scalar_lea.hbm %s5705_s10, 16 }
  0x9c   :  { %p4227_p2 = scmp.ne.s32.totalorder %s5705_s10, %s4226_s9  ;;  %p4230_p3 = scmp.lt.u32.totalorder %s4226_s9, %s5705_s10 }
  0x9e   :  { %p4232_p4 = pnand %p4230_p3, %p4227_p2 }
  0xa0   :  { %4235 = shalt.err (!%p4232_p4)
}
  0xa1   :  { %s4236_s8 = scalar_lea.vmem %s126_s11, 16  ;;  %s4240_s29 = scalar_lea.vmem %s126_s11, 32 }
  0xa2   :  { %p4237_p5 = scmp.ne.s32.totalorder %s126_s11, %s4236_s8  ;;  %p4241_p6 = scmp.lt.s32.totalorder %s126_s11, %s126_s11 }
  0xa3   :  { %p4242_p7 = scmp.lt.s32.totalorder %s4240_s29, %s4236_s8 }
  0xa5   :  { %p4243_p8 = por %p4242_p7, %p4241_p6 }
  0xa7   :  { %p4244_p9 = pnand %p4243_p8, %p4237_p5 }
  0xa9   :  { %4247 = shalt.err (!%p4244_p9)
}
  0xaa   :  { %128 = dma.hbm_to_vmem [thread:$0]  %s5705_s10, 16, %s126_s11, [#allocation15]  }
  0xab   :  { %s4248_s24 = scalar_lea.hbm %s5707_s12, 16 }
  0xac   :  { %p4249_p10 = scmp.ne.s32.totalorder %s5707_s12, %s4248_s24  ;;  %p4252_p11 = scmp.lt.u32.totalorder %s4248_s24, %s5707_s12 }
  0xae   :  { %p4254_p12 = pnand %p4252_p11, %p4249_p10 }
  0xb0   :  { %4257 = shalt.err (!%p4254_p12)
}
  0xb1   :  { %s4258_s27 = scalar_lea.vmem %s148_s20, 16  ;;  %s4262_s16 = scalar_lea.vmem %s148_s20, 32 }
  0xb2   :  { %p4259_p13 = scmp.ne.s32.totalorder %s148_s20, %s4258_s27  ;;  %p4263_p0 = scmp.lt.s32.totalorder %s148_s20, %s148_s20 }
  0xb3   :  { %p4264_p1 = scmp.lt.s32.totalorder %s4262_s16, %s4258_s27 }
  0xb5   :  { %p4265_p2 = por %p4264_p1, %p4263_p0 }
  0xb7   :  { %p4266_p3 = pnand %p4265_p2, %p4259_p13 }
  0xb9   :  { %4269 = shalt.err (!%p4266_p3)
}
  0xba   :  { %150 = dma.hbm_to_vmem [thread:$0]  %s5707_s12, 16, %s148_s20, [#allocation18]  }
  0xbb   :  { %4292 = dma.done.wait [#allocation3], 64  }
  0xbc   :  { %4293 = vsyncadd [#allocation3], 4294967232 }
  0xbd   :  { %4294 = dma.done.wait [#allocation6], 640  }
  0xbe   :  { %4295 = vsyncadd [#allocation6], 4294966656 }
  0xbf   :  { %4296 = dma.done.wait [#allocation9], 384  }
  0xc0   :  { %4297 = vsyncadd [#allocation9], 4294966912 }
  0xc1   :  { %4298 = dma.done.wait [#allocation12], 32  }
  0xc2   :  { %4299 = vsyncadd [#allocation12], 4294967264 }
  0xc3   :  { %4300 = dma.done.wait [#allocation15], 272  }
  0xc4   :  { %4301 = vsyncadd [#allocation15], 4294967024 }
  0xc5   :  { %4302 = dma.done.wait [#allocation18], 272  }
  0xc6   :  { %4303 = vsyncadd [#allocation18], 4294967024  ;;  %v4319_v0 = vmov 0.0   ;;  %vm4320_vm0 = vmmov 0   ;;  %v3623_v1 = vld [vmem:[#allocation8] sm:$0xff]   ;;  %vm232_vm1 = vcmask 130048  }
  0xc7   :  { %3513 = vmatprep.subr.bf16.mxu1 %v4319_v0  ;;  %3517 = vmatprep.mubr.msk.bf16.mxu1 %vm4320_vm0, %v4319_v0  ;;  %v3624_v2 = vld [vmem:[#allocation7] sm:$0xff]   ;;  %v3625_v3 = vld [vmem:[#allocation7 + $0x8] sm:$0xff]   ;;  %v3627_v5 = vld [vmem:[#allocation7 + $0x10] sm:$0xff]   ;;  %v4321_v9 = vmov 0   ;;  %vm669_vm2 = vcmask 1041409   ;;  %vm672_vm3 = vcmask 1042434  }
  0xc8   :  { %3495 = vmatprep.subr.bf16.mxu0 %v3623_v1  ;;  %3497 = vmatprep.mubr.msk.bf16.mxu0 %vm232_vm1, %v3624_v2  ;;  %v4555_v4 = vld [vmem:[#allocation10] sm:$0xff]   ;;  %v4560_v6 = vld [vmem:[#allocation10 + $0x8] sm:$0xff]   ;;  %v3352_v7 = vld [vmem:[#allocation11] ss:$0 sm:$0xff]  ;;  %vm675_vm4 = vcmask 1043459   ;;  %vm678_vm5 = vcmask 1044484  }
  0xc9   :  { %3496 = vmatpush3.bf16.msra.mxu0 %v3623_v1  ;;  %3514 = vmatpush3.bf16.msra.mxu1 %v4555_v4  ;;  %v3628_v8 = vld [vmem:[#allocation7 + $0x18] sm:$0xff]   ;;  %v3334_v31 = vld [vmem:[%s5700_s5] ss:$0 sm:$0xff]  ;;  %s4322_s5 = smov 96   ;;  %vm681_vm6 = vcmask 1045509   ;;  %vm684_vm7 = vcmask 1046534  }
  0xca   :  { %3505 = vmatprep.subr.bf16.mxu0 %v4319_v0  ;;  %3515 = vmatprep.subr.bf16.mxu1 %v4319_v0  ;;  %vm687_vm8 = vcmask 1047559   ;;  %vm364_vm9 = vcmask 261120   ;;  %vm3269_vm10 = vcmask 523264   ;;  %s4323_s26 = smov [#allocation20]  }
  0xcb   :  { %488 = vrot.lane.b32.xlu0 %v3352_v7, %s4309_s19  ;;  %s3320_s0 = sshll.u32 %s4323_s26, 4  ;;  %s3321_s0 = int_to_ptr.vmem [resolvable:$true] %s3320_s0 }
  0xcc   :  { %3498 = vmatmul.mubr.msk.bf16.vlgmr.msra.gmra.mrb[0].mxu0 %vm232_vm1, %v3625_v3  ;;  %p4275_p5 = scmp.lt.s32.totalorder %s3321_s0, %s3321_s0 }
  0xcd   :  { %3506 = vmatpush3.bf16.msra.mxu0 %v4555_v4  ;;  %3501 = vmatprep.mubr.msk.bf16.mxu0 %vm232_vm1, %v3627_v5 }
  0xce   :  { %3507 = vmatprep.subr.bf16.mxu0 %v4319_v0  ;;  %3516 = vmatpush3.bf16.msra.mxu1 %v4560_v6 }
  0xcf   :  { %3529 = vmatprep.subr.bf16.mxu1 %v4319_v0 }
  0xd1   :  { %3508 = vmatpush3.bf16.msra.mxu0 %v4560_v6 }
  0xd2   :  { %3521 = vmatprep.subr.bf16.mxu0 %v4319_v0 }
  0xd4   :  { %3502 = vmatmul.mubr.msk.bf16.gmra.mrb[4].mxu0 %vm232_vm1, %v3628_v8 }
  0xd5   :  { %3509 = vmatprep.mubr.msk.bf16.mxu0 %vm4320_vm0, %v4319_v0 }
  0xdc   :  { %3510 = vmatmul.mubr.bf16.vlgmr.msra.gmra.mrb[8].mxu0 %v4321_v9 }
  0xdd   :  { %3522 = vmatpush3.bf16.msra.mxu0 %v4555_v4  ;;  %3525 = vmatprep.mubr.msk.bf16.mxu0 %vm4320_vm0, %v4319_v0 }
  0xde   :  { %3523 = vmatprep.subr.bf16.mxu0 %v4319_v0 }
  0xe1   :  { %3524 = vmatpush3.bf16.msra.mxu0 %v4560_v6 }
  0xe2   :  { %3537 = vmatprep.subr.bf16.mxu0 %v4319_v0 }
 0x13d   :  { %v4582_v20 = vpop.permute.xlu0 %488 }
 0x19f   :  { %v3499_v10 = vpop.f32.mrb[0].mxu0 }
 0x1a0   :  { %v279_v11 = vpop.f32.mrb[1].mxu0  ;;  %v288_v34 = vadd.f32 %v3499_v10, %v3334_v31 }
 0x1a1   :  { %v3500_v12 = vpop.f32.mrb[2].mxu0  ;;  %v280_v32 = vadd.f32 %v3334_v31, %v279_v11 }
 0x1a2   :  { %v282_v13 = vpop.f32.mrb[3].mxu0  ;;  %v291_v36 = vadd.f32 %v3500_v12, %v3334_v31  ;;  %v3446_v38 = vpack.c.bf16 %v288_v34, %v288_v34 }
 0x1a3   :  { %v283_v33 = vadd.f32 %v3334_v31, %v282_v13  ;;  %v3444_v35 = vpack.c.bf16 %v280_v32, %v280_v32 }
 0x1a4   :  { %v3447_v45 = vpack.c.bf16 %v291_v36, %v291_v36  ;;  %v4605_v47 = vunpack.c.l.bf16 %v3446_v38 }
 0x1a5   :  { %v3445_v37 = vpack.c.bf16 %v283_v33, %v283_v33  ;;  %v4597_v39 = vunpack.c.l.bf16 %v3444_v35 }
 0x1a6   :  { %v4611_v56 = vunpack.c.l.bf16 %v3447_v45 }
 0x1a7   :  { %v3503_v14 = vpop.f32.mrb[4].mxu0  ;;  %v4603_v46 = vunpack.c.l.bf16 %v3445_v37 }
 0x1a8   :  { %v295_v15 = vpop.f32.mrb[5].mxu0  ;;  %v304_v48 = vadd.f32 %v3503_v14, %v3334_v31 }
 0x1a9   :  { %v3504_v16 = vpop.f32.mrb[6].mxu0  ;;  %v296_v40 = vadd.f32 %v3334_v31, %v295_v15 }
 0x1aa   :  { %v298_v17 = vpop.f32.mrb[7].mxu0  ;;  %v3450_v57 = vpack.c.bf16 %v304_v48, %v304_v48  ;;  %v307_v59 = vadd.f32 %v3504_v16, %v3334_v31 }
 0x1ab   :  { %v299_v41 = vadd.f32 %v3334_v31, %v298_v17  ;;  %v3448_v49 = vpack.c.bf16 %v296_v40, %v296_v40 }
 0x1ac   :  { %v4621_v5 = vunpack.c.l.bf16 %v3450_v57  ;;  %v3451_v7 = vpack.c.bf16 %v307_v59, %v307_v59 }
 0x1ad   :  { %v3449_v50 = vpack.c.bf16 %v299_v41, %v299_v41  ;;  %v4613_v58 = vunpack.c.l.bf16 %v3448_v49 }
 0x1ae   :  { %v4626_v13 = vunpack.c.l.bf16 %v3451_v7 }
 0x1af   :  { %v4580_v18 = vpop.f32.mrb[8].mxu0  ;;  %v4615_v60 = vunpack.c.l.bf16 %v3449_v50 }
 0x1b0   :  { %v3511_v19 = vpop.f32.mrb[9].mxu0  ;;  %v491_v23 = vadd.f32 %v4582_v20, %v4580_v18  ;;  %v417_v42 = vrot.slane %v4580_v18, 1  ;;  %v418_v43 = vrot.slane %v4580_v18, 2  ;;  %v432_v44 = vadd.f32 %v4597_v39, %v4580_v18 }
 0x1b1   :  { %v405_v21 = vpop.f32.mrb[10].mxu0  ;;  %v419_v51 = vrot.slane %v4580_v18, 3  ;;  %v420_v53 = vrot.slane %v4580_v18, 4  ;;  %v421_v61 = vrot.slane %v4580_v18, 5  ;;  %v422_v1 = vrot.slane %v4580_v18, 6 }
 0x1b2   :  { %v3512_v22 = vpop.f32.mrb[11].mxu0  ;;  %500 = vrot.lane.b32.xlu1 %v491_v23, %s4309_s19  ;;  %v493_v24 = vrot.slane %v491_v23, 1  ;;  %v494_v25 = vrot.slane %v491_v23, 2  ;;  %v495_v26 = vrot.slane %v491_v23, 3  ;;  %v496_v27 = vrot.slane %v491_v23, 4 }
 0x1b3   :  { %v497_v28 = vrot.slane %v491_v23, 5  ;;  %v498_v29 = vrot.slane %v491_v23, 6  ;;  %v499_v30 = vrot.slane %v491_v23, 7  ;;  %v433_v52 = vadd.f32 %v417_v42, %v4603_v46 }
 0x1b4   :  { %502 = vrot.lane.b32.xlu0 %v493_v24, %s4309_s19  ;;  %v434_v54 = vadd.f32 %v418_v43, %v4605_v47  ;;  %v3355_v55 = vmul.f32 -1.442695, %v432_v44  ;;  %v435_v62 = vadd.f32 %v419_v51, %v4611_v56  ;;  %v436_v2 = vadd.f32 %v420_v53, %v4613_v58 }
 0x1b5   :  { %v3356_v63 = vmul.f32 -1.442695, %v433_v52  ;;  %v437_v8 = vadd.f32 %v421_v61, %v4615_v60  ;;  %v423_v10 = vrot.slane %v4580_v18, 7  ;;  %v438_v11 = vadd.f32 %v422_v1, %v4621_v5 }
 0x1b6   :  { %504 = vrot.lane.b32.xlu1 %v494_v25, %s4309_s19  ;;  %3640 = vpow2.f32 %v3355_v55  ;;  %v3357_v3 = vmul.f32 -1.442695, %v434_v54  ;;  %v3358_v9 = vmul.f32 -1.442695, %v435_v62  ;;  %v3359_v12 = vmul.f32 -1.442695, %v436_v2 }
 0x1b7   :  { %3642 = vpow2.f32 %v3356_v63  ;;  %v3360_v14 = vmul.f32 -1.442695, %v437_v8  ;;  %v439_v15 = vadd.f32 %v423_v10, %v4626_v13  ;;  %v3361_v16 = vmul.f32 -1.442695, %v438_v11 }
 0x1b8   :  { %506 = vrot.lane.b32.xlu0 %v495_v26, %s4309_s19  ;;  %3644 = vpow2.f32 %v3357_v3 }
 0x1b9   :  { %3646 = vpow2.f32 %v3358_v9  ;;  %v3362_v19 = vmul.f32 -1.442695, %v439_v15 }
 0x1ba   :  { %508 = vrot.lane.b32.xlu1 %v496_v27, %s4309_s19  ;;  %3648 = vpow2.f32 %v3359_v12 }
 0x1bb   :  { %3650 = vpow2.f32 %v3360_v14 }
 0x1bc   :  { %510 = vrot.lane.b32.xlu0 %v497_v28, %s4309_s19  ;;  %3652 = vpow2.f32 %v3361_v16 }
 0x1bd   :  { %3654 = vpow2.f32 %v3362_v19 }
 0x1be   :  { %512 = vrot.lane.b32.xlu1 %v498_v29, %s4309_s19 }
 0x1c0   :  { %514 = vrot.lane.b32.xlu0 %v499_v30, %s4309_s19  ;;  %v3641_v17 = vpop.eup %3640 }
 0x1c1   :  { %v3643_v21 = vpop.eup %3642  ;;  %v464_v22 = vadd.f32 1.0, %v3641_v17 }
 0x1c2   :  { %v3645_v23 = vpop.eup %3644  ;;  %v465_v18 = vadd.f32 1.0, %v3643_v21 }
 0x1c3   :  { %v3647_v24 = vpop.eup %3646  ;;  %3656 = vrcp.f32 %v464_v22  ;;  %v466_v25 = vadd.f32 1.0, %v3645_v23 }
 0x1c4   :  { %v3649_v26 = vpop.eup %3648  ;;  %3658 = vrcp.f32 %v465_v18  ;;  %v467_v27 = vadd.f32 1.0, %v3647_v24 }
 0x1c5   :  { %v3651_v28 = vpop.eup %3650  ;;  %3660 = vrcp.f32 %v466_v25  ;;  %v468_v29 = vadd.f32 1.0, %v3649_v26 }
 0x1c6   :  { %v3653_v30 = vpop.eup %3652  ;;  %3662 = vrcp.f32 %v467_v27  ;;  %v469_v31 = vadd.f32 1.0, %v3651_v28 }
 0x1c7   :  { %3664 = vrcp.f32 %v468_v29  ;;  %v470_v32 = vadd.f32 1.0, %v3653_v30  ;;  %v3655_v33 = vpop.eup %3654 }
 0x1c8   :  { %3666 = vrcp.f32 %v469_v31  ;;  %v471_v38 = vadd.f32 1.0, %v3655_v33 }
 0x1c9   :  { %3668 = vrcp.f32 %v470_v32 }
 0x1ca   :  { %3670 = vrcp.f32 %v471_v38 }
 0x1cd   :  { %v4629_v34 = vpop.eup %3656 }
 0x1ce   :  { %v4632_v40 = vpop.eup %3658  ;;  %v580_v31 = vsub.f32 1.0, %v4629_v34 }
 0x1cf   :  { %v4635_v41 = vpop.eup %3660  ;;  %v581_v38 = vsub.f32 1.0, %v4632_v40 }
 0x1d0   :  { %v4639_v48 = vpop.eup %3662 }
 0x1d1   :  { %v4643_v49 = vpop.eup %3664 }
 0x1d2   :  { %v4647_v54 = vpop.eup %3666 }
 0x1d3   :  { %v4651_v55 = vpop.eup %3668 }
 0x1d4   :  { %v4657_v63 = vpop.eup %3670 }
 0x224   :  { %v501_v35 = vpop.permute.xlu1 %500 }
 0x225   :  { %v524_v36 = vmul.f32 %v4629_v34, %v501_v35  ;;  %v582_v35 = vsub.f32 1.0, %v4635_v41 }
 0x226   :  { %v503_v37 = vpop.permute.xlu0 %502 }
 0x227   :  { %540 = vrot.lane.b32.xlu1 %v524_v36, %s4309_s19  ;;  %v525_v44 = vmul.f32 %v4632_v40, %v503_v37  ;;  %v628_v36 = vmul.f32 0.0, %v4629_v34  ;;  %v584_v34 = vsub.f32 1.0, %v4643_v49 }
 0x228   :  { %v505_v42 = vpop.permute.xlu1 %504 }
 0x229   :  { %v526_v43 = vmul.f32 %v4635_v41, %v505_v42  ;;  %v630_v42 = vmul.f32 0.0, %v4635_v41  ;;  %v631_v41 = vmul.f32 0.0, %v4639_v48 }
 0x22a   :  { %v507_v45 = vpop.permute.xlu0 %506 }
 0x22b   :  { %544 = vrot.lane.b32.xlu0 %v526_v43, %s4309_s19  ;;  %542 = vrot.lane.b32.xlu1 %v525_v44, %s4309_s19  ;;  %v527_v51 = vmul.f32 %v4639_v48, %v507_v45 }
 0x22c   :  { %v509_v50 = vpop.permute.xlu1 %508 }
 0x22d   :  { %v528_v52 = vmul.f32 %v4643_v49, %v509_v50  ;;  %v629_v50 = vmul.f32 0.0, %v4632_v40 }
 0x22e   :  { %v511_v53 = vpop.permute.xlu0 %510 }
 0x22f   :  { %546 = vrot.lane.b32.xlu0 %v527_v51, %s4309_s19  ;;  %548 = vrot.lane.b32.xlu1 %v528_v52, %s4309_s19  ;;  %v529_v59 = vmul.f32 %v4647_v54, %v511_v53  ;;  %v583_v53 = vsub.f32 1.0, %v4639_v48  ;;  %v633_v48 = vmul.f32 0.0, %v4647_v54 }
 0x230   :  { %v513_v57 = vpop.permute.xlu1 %512 }
 0x231   :  { %v530_v61 = vmul.f32 %v4651_v55, %v513_v57 }
 0x232   :  { %v515_v62 = vpop.permute.xlu0 %514 }
 0x233   :  { %550 = vrot.lane.b32.xlu0 %v529_v59, %s4309_s19  ;;  %552 = vrot.lane.b32.xlu1 %v530_v61, %s4309_s19  ;;  %v531_v1 = vmul.f32 %v4657_v63, %v515_v62 }
 0x237   :  { %554 = vrot.lane.b32.xlu0 %v531_v1, %s4309_s19 }
 0x299   :  { %v541_v2 = vpop.permute.xlu1 %540 }
 0x29a   :  { %v564_v3 = vadd.f32 %v541_v2, %v4597_v39 }
 0x29c   :  { %3672 = vtanh.f32 %v564_v3  ;;  %v632_v3 = vmul.f32 0.0, %v4643_v49  ;;  %v634_v49 = vmul.f32 0.0, %v4651_v55 }
 0x29d   :  { %v545_v7 = vpop.permute.xlu0 %544  ;;  %v543_v8 = vpop.permute.xlu1 %542 }
 0x29e   :  { %v566_v9 = vadd.f32 %v545_v7, %v4605_v47  ;;  %v565_v10 = vadd.f32 %v543_v8, %v4603_v46 }
 0x2a0   :  { %3674 = vtanh.f32 %v566_v9 }
 0x2a1   :  { %3676 = vtanh.f32 %v565_v10  ;;  %v547_v11 = vpop.permute.xlu0 %546  ;;  %v549_v12 = vpop.permute.xlu1 %548  ;;  %v585_v10 = vsub.f32 1.0, %v4647_v54 }
 0x2a2   :  { %v567_v14 = vadd.f32 %v547_v11, %v4611_v56  ;;  %v568_v15 = vadd.f32 %v549_v12, %v4613_v58 }
 0x2a4   :  { %3678 = vtanh.f32 %v567_v14 }
 0x2a5   :  { %3680 = vtanh.f32 %v568_v15  ;;  %v551_v16 = vpop.permute.xlu0 %550  ;;  %v553_v17 = vpop.permute.xlu1 %552  ;;  %v586_v15 = vsub.f32 1.0, %v4651_v55 }
 0x2a6   :  { %v3673_v19 = vpop.eup %3672  ;;  %v569_v21 = vadd.f32 %v551_v16, %v4615_v60  ;;  %v570_v22 = vadd.f32 %v553_v17, %v4621_v5 }
 0x2a7   :  { %596 = vrot.lane.b32.xlu1 %v3673_v19, %s4322_s5 }
 0x2a8   :  { %3682 = vtanh.f32 %v569_v21 }
 0x2a9   :  { %3684 = vtanh.f32 %v570_v22  ;;  %v555_v23 = vpop.permute.xlu0 %554 }
 0x2aa   :  { %v3675_v18 = vpop.eup %3674  ;;  %v571_v24 = vadd.f32 %v555_v23, %v4626_v13 }
 0x2ab   :  { %v3677_v25 = vpop.eup %3676  ;;  %600 = vrot.lane.b32.xlu0 %v3675_v18, %s4322_s5 }
 0x2ac   :  { %3686 = vtanh.f32 %v571_v24  ;;  %598 = vrot.lane.b32.xlu1 %v3677_v25, %s4322_s5 }
 0x2ae   :  { %v3679_v26 = vpop.eup %3678 }
 0x2af   :  { %v3681_v27 = vpop.eup %3680  ;;  %602 = vrot.lane.b32.xlu0 %v3679_v26, %s4322_s5  ;;  %v587_v26 = vsub.f32 1.0, %v4657_v63 }
 0x2b0   :  { %604 = vrot.lane.b32.xlu1 %v3681_v27, %s4322_s5 }
 0x2b2   :  { %v3683_v28 = vpop.eup %3682 }
 0x2b3   :  { %v3685_v29 = vpop.eup %3684  ;;  %606 = vrot.lane.b32.xlu0 %v3683_v28, %s4322_s5 }
 0x2b4   :  { %608 = vrot.lane.b32.xlu1 %v3685_v29, %s4322_s5 }
 0x2b6   :  { %v3687_v30 = vpop.eup %3686 }
 0x2b7   :  { %610 = vrot.lane.b32.xlu0 %v3687_v30, %s4322_s5 }
 0x319   :  { %v597_v32 = vpop.permute.xlu1 %596 }
 0x31a   :  { %v620_v33 = vmul.f32 %v597_v32, %v580_v31 }
 0x31c   :  { %v4682_v45 = vadd.f32 %v628_v36, %v620_v33  ;;  %v635_v33 = vmul.f32 0.0, %v4657_v63 }
 0x31d   :  { %v601_v37 = vpop.permute.xlu0 %600 }
 0x31e   :  { %v622_v43 = vmul.f32 %v601_v37, %v582_v35  ;;  %v599_v44 = vpop.permute.xlu1 %598  ;;  %v644_v40 = vpack.c.bf16 %v4682_v45, %v4682_v45 }
 0x31f   :  { %v621_v51 = vmul.f32 %v599_v44, %v581_v38 }
 0x320   :  { %v4685_v52 = vadd.f32 %v630_v42, %v622_v43  ;;  %v660_v21 = vunpack.c.l.b16 %v644_v40 }
 0x321   :  { %v4688_v57 = vadd.f32 %v629_v50, %v621_v51  ;;  %v603_v59 = vpop.permute.xlu0 %602 }
 0x322   :  { %v646_v61 = vpack.c.bf16 %v4685_v52, %v4685_v52  ;;  %v623_v62 = vmul.f32 %v603_v59, %v583_v53  ;;  %v605_v1 = vpop.permute.xlu1 %604 }
 0x323   :  { %v645_v2 = vpack.c.bf16 %v4688_v57, %v4688_v57  ;;  %v624_v7 = vmul.f32 %v605_v1, %v584_v34 }
 0x324   :  { %v662_v8 = vunpack.c.l.b16 %v646_v61  ;;  %v4699_v9 = vadd.f32 %v631_v41, %v623_v62 }
 0x325   :  { %v661_v11 = vunpack.c.l.b16 %v645_v2  ;;  %v4702_v12 = vadd.f32 %v632_v3, %v624_v7  ;;  %v607_v14 = vpop.permute.xlu0 %606 }
 0x326   :  { %v647_v16 = vpack.c.bf16 %v4699_v9, %v4699_v9  ;;  %v625_v17 = vmul.f32 %v607_v14, %v585_v10  ;;  %v609_v19 = vpop.permute.xlu1 %608  ;;  %v671_v24 = vrot.slane %v662_v8, 6 }
 0x327   :  { %v668_v22 = vrot.slane %v661_v11, 7  ;;  %v648_v23 = vpack.c.bf16 %v4702_v12, %v4702_v12  ;;  %v626_v18 = vmul.f32 %v609_v19, %v586_v15 }
 0x328   :  { %v663_v25 = vunpack.c.l.b16 %v647_v16  ;;  %v4711_v54 = vadd.f32 %v633_v48, %v625_v17 }
 0x329   :  { %v670_v27 = vsel %vm669_vm2, %v668_v22, %v660_v21  ;;  %v664_v28 = vunpack.c.l.b16 %v648_v23  ;;  %v4715_v29 = vadd.f32 %v634_v49, %v626_v18  ;;  %v611_v55 = vpop.permute.xlu0 %610 }
 0x32a   :  { %v674_v30 = vrot.slane %v663_v25, 5  ;;  %v649_v31 = vpack.c.bf16 %v4711_v54, %v4711_v54  ;;  %v627_v35 = vmul.f32 %v611_v55, %v587_v26  ;;  %v673_v36 = vsel %vm672_vm3, %v671_v24, %v670_v27 }
 0x32b   :  { %v650_v32 = vpack.c.bf16 %v4715_v29, %v4715_v29  ;;  %v677_v37 = vrot.slane %v664_v28, 4 }
 0x32c   :  { %v665_v38 = vunpack.c.l.b16 %v649_v31  ;;  %v676_v42 = vsel %vm675_vm4, %v674_v30, %v673_v36  ;;  %v4724_v44 = vadd.f32 %v635_v33, %v627_v35 }
 0x32d   :  { %v666_v43 = vunpack.c.l.b16 %v650_v32  ;;  %v679_v59 = vsel %vm678_vm5, %v677_v37, %v676_v42 }
 0x32e   :  { %v680_v50 = vrot.slane %v665_v38, 3  ;;  %v651_v51 = vpack.c.bf16 %v4724_v44, %v4724_v44 }
 0x32f   :  { %v683_v53 = vrot.slane %v666_v43, 2 }
 0x330   :  { %v667_v63 = vunpack.c.l.b16 %v651_v51  ;;  %v682_v34 = vsel %vm681_vm6, %v680_v50, %v679_v59 }
 0x331   :  { %v685_v41 = vsel %vm684_vm7, %v683_v53, %v682_v34 }
 0x332   :  { %v686_v61 = vrot.slane %v667_v63, 1 }
 0x334   :  { %v688_v62 = vsel %vm687_vm8, %v686_v61, %v685_v41 }
 0x335   :  { %v689_v1 = vpack.c.b16 %v688_v62, %v688_v62 }
 0x337   :  { %690 = vrot.lane.b32.xlu1 %v689_v1, %s4322_s5 }
 0x3a9   :  { %v691_v40 = vpop.permute.xlu1 %690 }
 0x3aa   :  { %3518 = vmatmul.mubr.msk.bf16.vlgmr.msra.gmra.mrb[0].mxu1 %vm364_vm9, %v691_v40 }
 0x3ab   :  { %3530 = vmatpush3.bf16.msra.mxu1 %v4555_v4  ;;  %3533 = vmatprep.mubr.msk.bf16.mxu1 %vm4320_vm0, %v4319_v0 }
 0x3ac   :  { %3531 = vmatprep.subr.bf16.mxu1 %v4319_v0 }
 0x3af   :  { %3532 = vmatpush3.bf16.msra.mxu1 %v4560_v6 }
 0x3b0   :  { %3545 = vmatprep.subr.bf16.mxu1 %v4319_v0 }
 0x47d   :  { %v729_v2 = vpop.f32.mrb[0].mxu1 }
 0x47e   :  { %v3519_v3 = vpop.f32.mrb[1].mxu1  ;;  %v807_v10 = vadd.f32 %v729_v2, %v4582_v20  ;;  %v737_v17 = vrot.slane %v729_v2, 1  ;;  %v736_v49 = vrot.slane %v729_v2, 7  ;;  %v752_v19 = vadd.f32 %v729_v2, %v4603_v46 }
 0x47f   :  { %v732_v7 = vpop.f32.mrb[2].mxu1  ;;  %v738_v21 = vrot.slane %v729_v2, 2  ;;  %v739_v23 = vrot.slane %v729_v2, 3  ;;  %v740_v25 = vrot.slane %v729_v2, 4  ;;  %v741_v28 = vrot.slane %v729_v2, 5 }
 0x480   :  { %v3520_v8 = vpop.f32.mrb[3].mxu1  ;;  %818 = vrot.lane.b32.xlu0 %v807_v10, %s4309_s19  ;;  %v810_v11 = vrot.slane %v807_v10, 1  ;;  %v809_v4 = vrot.slane %v807_v10, 7  ;;  %v811_v48 = vrot.slane %v807_v10, 2  ;;  %v812_v6 = vrot.slane %v807_v10, 3 }
 0x481   :  { %v813_v14 = vrot.slane %v807_v10, 4  ;;  %v814_v15 = vrot.slane %v807_v10, 5  ;;  %v815_v16 = vrot.slane %v807_v10, 6  ;;  %v753_v22 = vadd.f32 %v737_v17, %v4605_v47 }
 0x482   :  { %820 = vrot.lane.b32.xlu1 %v810_v11, %s4309_s19  ;;  %v751_v18 = vadd.f32 %v736_v49, %v4597_v39  ;;  %v3365_v24 = vmul.f32 -1.442695, %v752_v19  ;;  %v754_v26 = vadd.f32 %v738_v21, %v4611_v56  ;;  %v755_v55 = vadd.f32 %v739_v23, %v4613_v58 }
 0x483   :  { %v3366_v27 = vmul.f32 -1.442695, %v753_v22  ;;  %v742_v31 = vrot.slane %v729_v2, 6  ;;  %v756_v32 = vadd.f32 %v740_v25, %v4615_v60  ;;  %v757_v35 = vadd.f32 %v741_v28, %v4621_v5 }
 0x484   :  { %816 = vrot.lane.b32.xlu0 %v809_v4, %s4309_s19  ;;  %v3364_v30 = vmul.f32 -1.442695, %v751_v18  ;;  %3688 = vpow2.f32 %v3365_v24  ;;  %v3367_v33 = vmul.f32 -1.442695, %v754_v26  ;;  %v3368_v36 = vmul.f32 -1.442695, %v755_v55 }
 0x485   :  { %3690 = vpow2.f32 %v3366_v27  ;;  %v758_v37 = vadd.f32 %v742_v31, %v4626_v13  ;;  %v3369_v38 = vmul.f32 -1.442695, %v756_v32  ;;  %v3370_v42 = vmul.f32 -1.442695, %v757_v35 }
 0x486   :  { %822 = vrot.lane.b32.xlu1 %v811_v48, %s4309_s19  ;;  %3692 = vpow2.f32 %v3364_v30 }
 0x487   :  { %3694 = vpow2.f32 %v3367_v33  ;;  %v3371_v50 = vmul.f32 -1.442695, %v758_v37 }
 0x488   :  { %824 = vrot.lane.b32.xlu0 %v812_v6, %s4309_s19  ;;  %3696 = vpow2.f32 %v3368_v36 }
 0x489   :  { %3698 = vpow2.f32 %v3369_v38 }
 0x48a   :  { %826 = vrot.lane.b32.xlu1 %v813_v14, %s4309_s19  ;;  %3700 = vpow2.f32 %v3370_v42 }
 0x48b   :  { %3702 = vpow2.f32 %v3371_v50 }
 0x48c   :  { %828 = vrot.lane.b32.xlu0 %v814_v15, %s4309_s19 }
 0x48e   :  { %830 = vrot.lane.b32.xlu1 %v815_v16, %s4309_s19  ;;  %v3689_v43 = vpop.eup %3688 }
 0x48f   :  { %v3691_v51 = vpop.eup %3690  ;;  %v784_v53 = vadd.f32 1.0, %v3689_v43 }
 0x490   :  { %v3693_v59 = vpop.eup %3692  ;;  %v785_v63 = vadd.f32 1.0, %v3691_v51 }
 0x491   :  { %v3695_v34 = vpop.eup %3694  ;;  %3704 = vrcp.f32 %v784_v53  ;;  %v783_v61 = vadd.f32 1.0, %v3693_v59 }
 0x492   :  { %v3697_v41 = vpop.eup %3696  ;;  %3706 = vrcp.f32 %v785_v63  ;;  %v786_v62 = vadd.f32 1.0, %v3695_v34 }
 0x493   :  { %v3699_v1 = vpop.eup %3698  ;;  %3708 = vrcp.f32 %v783_v61  ;;  %v787_v40 = vadd.f32 1.0, %v3697_v41 }
 0x494   :  { %v3701_v2 = vpop.eup %3700  ;;  %3710 = vrcp.f32 %v786_v62  ;;  %v788_v3 = vadd.f32 1.0, %v3699_v1 }
 0x495   :  { %v3703_v7 = vpop.eup %3702  ;;  %3712 = vrcp.f32 %v787_v40  ;;  %v789_v8 = vadd.f32 1.0, %v3701_v2 }
 0x496   :  { %3714 = vrcp.f32 %v788_v3  ;;  %v790_v4 = vadd.f32 1.0, %v3703_v7 }
 0x497   :  { %3716 = vrcp.f32 %v789_v8 }
 0x498   :  { %3718 = vrcp.f32 %v790_v4 }
 0x49b   :  { %v4757_v10 = vpop.eup %3704 }
 0x49c   :  { %v4760_v6 = vpop.eup %3706 }
 0x49d   :  { %v4764_v16 = vpop.eup %3708 }
 0x49e   :  { %v4768_v19 = vpop.eup %3710 }
 0x49f   :  { %v4772_v23 = vpop.eup %3712 }
 0x4a0   :  { %v4776_v25 = vpop.eup %3714 }
 0x4a1   :  { %v4780_v28 = vpop.eup %3716 }
 0x4a2   :  { %v4784_v31 = vpop.eup %3718 }
 0x4f2   :  { %v819_v11 = vpop.permute.xlu0 %818 }
 0x4f3   :  { %v841_v48 = vmul.f32 %v4757_v10, %v819_v11 }
 0x4f4   :  { %v821_v14 = vpop.permute.xlu1 %820 }
 0x4f5   :  { %858 = vrot.lane.b32.xlu0 %v841_v48, %s4309_s19  ;;  %v842_v15 = vmul.f32 %v4760_v6, %v821_v14  ;;  %v897_v14 = vsub.f32 1.0, %v4757_v10 }
 0x4f6   :  { %v817_v17 = vpop.permute.xlu0 %816 }
 0x4f7   :  { %860 = vrot.lane.b32.xlu1 %v842_v15, %s4309_s19  ;;  %v840_v49 = vmul.f32 %v4764_v16, %v817_v17  ;;  %v954_v17 = vrot.slane %v4685_v52, 7 }
 0x4f8   :  { %v823_v21 = vpop.permute.xlu1 %822 }
 0x4f9   :  { %856 = vrot.lane.b32.xlu0 %v840_v49, %s4309_s19  ;;  %v843_v22 = vmul.f32 %v4768_v19, %v823_v21  ;;  %v953_v49 = vrot.slane %v4688_v57, 7 }
 0x4fa   :  { %v825_v18 = vpop.permute.xlu0 %824 }
 0x4fb   :  { %862 = vrot.lane.b32.xlu1 %v843_v22, %s4309_s19  ;;  %v844_v24 = vmul.f32 %v4772_v23, %v825_v18  ;;  %v898_v22 = vsub.f32 1.0, %v4760_v6  ;;  %v952_v18 = vrot.slane %v4682_v45, 7  ;;  %v956_v45 = vrot.slane %v4702_v12, 7 }
 0x4fc   :  { %v827_v26 = vpop.permute.xlu1 %826 }
 0x4fd   :  { %864 = vrot.lane.b32.xlu0 %v844_v24, %s4309_s19  ;;  %v845_v27 = vmul.f32 %v4776_v25, %v827_v26  ;;  %v969_v26 = vmul.f32 %v4757_v10, %v953_v49  ;;  %v968_v52 = vmul.f32 %v4764_v16, %v952_v18 }
 0x4fe   :  { %v829_v55 = vpop.permute.xlu0 %828 }
 0x4ff   :  { %866 = vrot.lane.b32.xlu1 %v845_v27, %s4309_s19  ;;  %v846_v30 = vmul.f32 %v4780_v28, %v829_v55  ;;  %v970_v27 = vmul.f32 %v4760_v6, %v954_v17 }
 0x500   :  { %v831_v32 = vpop.permute.xlu1 %830 }
 0x501   :  { %868 = vrot.lane.b32.xlu0 %v846_v30, %s4309_s19  ;;  %v847_v33 = vmul.f32 %v4784_v31, %v831_v32  ;;  %v896_v30 = vsub.f32 1.0, %v4764_v16 }
 0x503   :  { %870 = vrot.lane.b32.xlu1 %v847_v33, %s4309_s19 }
 0x567   :  { %v859_v35 = vpop.permute.xlu0 %858 }
 0x568   :  { %v881_v36 = vadd.f32 %v859_v35, %v4603_v46 }
 0x569   :  { %v861_v37 = vpop.permute.xlu1 %860 }
 0x56a   :  { %3720 = vtanh.f32 %v881_v36  ;;  %v882_v38 = vadd.f32 %v861_v37, %v4605_v47  ;;  %v955_v36 = vrot.slane %v4699_v9, 7  ;;  %v899_v37 = vsub.f32 1.0, %v4768_v19 }
 0x56b   :  { %v857_v42 = vpop.permute.xlu0 %856 }
 0x56c   :  { %3722 = vtanh.f32 %v882_v38  ;;  %v880_v43 = vadd.f32 %v857_v42, %v4597_v39  ;;  %v900_v42 = vsub.f32 1.0, %v4772_v23 }
 0x56d   :  { %v863_v50 = vpop.permute.xlu1 %862 }
 0x56e   :  { %3724 = vtanh.f32 %v880_v43  ;;  %v883_v51 = vadd.f32 %v863_v50, %v4611_v56  ;;  %v957_v43 = vrot.slane %v4711_v54, 7  ;;  %v971_v50 = vmul.f32 %v4768_v19, %v955_v36 }
 0x56f   :  { %v865_v53 = vpop.permute.xlu0 %864 }
 0x570   :  { %3726 = vtanh.f32 %v883_v51  ;;  %v884_v59 = vadd.f32 %v865_v53, %v4613_v58  ;;  %v972_v51 = vmul.f32 %v4772_v23, %v956_v45  ;;  %v973_v23 = vmul.f32 %v4776_v25, %v957_v43 }
 0x571   :  { %v867_v63 = vpop.permute.xlu1 %866 }
 0x572   :  { %3728 = vtanh.f32 %v884_v59  ;;  %v885_v34 = vadd.f32 %v867_v63, %v4615_v60  ;;  %v901_v63 = vsub.f32 1.0, %v4776_v25 }
 0x573   :  { %v869_v61 = vpop.permute.xlu0 %868 }
 0x574   :  { %v3721_v41 = vpop.eup %3720  ;;  %3730 = vtanh.f32 %v885_v34  ;;  %v886_v62 = vadd.f32 %v869_v61, %v4621_v5  ;;  %v958_v34 = vrot.slane %v4715_v29, 7 }
 0x575   :  { %v871_v1 = vpop.permute.xlu1 %870  ;;  %914 = vrot.lane.b32.xlu0 %v3721_v41, %s4322_s5 }
 0x576   :  { %v3723_v40 = vpop.eup %3722  ;;  %3732 = vtanh.f32 %v886_v62  ;;  %v887_v2 = vadd.f32 %v871_v1, %v4626_v13 }
 0x577   :  { %916 = vrot.lane.b32.xlu1 %v3723_v40, %s4322_s5  ;;  %v959_v40 = vrot.slane %v4724_v44, 7  ;;  %v903_v44 = vsub.f32 1.0, %v4784_v31 }
 0x578   :  { %v3725_v3 = vpop.eup %3724  ;;  %3734 = vtanh.f32 %v887_v2 }
 0x579   :  { %912 = vrot.lane.b32.xlu0 %v3725_v3, %s4322_s5  ;;  %v902_v3 = vsub.f32 1.0, %v4780_v28 }
 0x57a   :  { %v3727_v7 = vpop.eup %3726 }
 0x57b   :  { %918 = vrot.lane.b32.xlu1 %v3727_v7, %s4322_s5  ;;  %v974_v7 = vmul.f32 %v4780_v28, %v958_v34 }
 0x57c   :  { %v3729_v8 = vpop.eup %3728 }
 0x57d   :  { %920 = vrot.lane.b32.xlu0 %v3729_v8, %s4322_s5 }
 0x57e   :  { %v3731_v11 = vpop.eup %3730 }
 0x57f   :  { %922 = vrot.lane.b32.xlu1 %v3731_v11, %s4322_s5 }
 0x580   :  { %v3733_v4 = vpop.eup %3732 }
 0x581   :  { %924 = vrot.lane.b32.xlu0 %v3733_v4, %s4322_s5 }
 0x582   :  { %v3735_v48 = vpop.eup %3734 }
 0x583   :  { %926 = vrot.lane.b32.xlu1 %v3735_v48, %s4322_s5 }
 0x5e7   :  { %v915_v15 = vpop.permute.xlu0 %914 }
 0x5e8   :  { %v937_v21 = vmul.f32 %v915_v15, %v897_v14 }
 0x5e9   :  { %v917_v24 = vpop.permute.xlu1 %916 }
 0x5ea   :  { %v938_v55 = vmul.f32 %v917_v24, %v898_v22  ;;  %v4813_v33 = vadd.f32 %v969_v26, %v937_v21  ;;  %v975_v22 = vmul.f32 %v4784_v31, %v959_v40 }
 0x5eb   :  { %v913_v32 = vpop.permute.xlu0 %912 }
 0x5ec   :  { %v4815_v35 = vadd.f32 %v970_v27, %v938_v55  ;;  %v936_v57 = vmul.f32 %v913_v32, %v896_v30  ;;  %v985_v12 = vpack.c.bf16 %v4813_v33, %v4813_v33 }
 0x5ed   :  { %v919_v10 = vpop.permute.xlu1 %918 }
 0x5ee   :  { %v986_v6 = vpack.c.bf16 %v4815_v35, %v4815_v35  ;;  %v4823_v38 = vadd.f32 %v968_v52, %v936_v57  ;;  %v939_v16 = vmul.f32 %v919_v10, %v899_v37  ;;  %v1001_v8 = vunpack.c.l.b16 %v985_v12  ;;  %v4870_v12 = vld [vmem:[#allocation10] sm:$0xff]  }
 0x5ef   :  { %v921_v9 = vpop.permute.xlu0 %920 }
 0x5f0   :  { %v984_v53 = vpack.c.bf16 %v4823_v38, %v4823_v38  ;;  %v940_v59 = vmul.f32 %v921_v9, %v900_v42  ;;  %v1002_v61 = vunpack.c.l.b16 %v986_v6  ;;  %v4835_v41 = vadd.f32 %v971_v50, %v939_v16 }
 0x5f1   :  { %v923_v54 = vpop.permute.xlu1 %922 }
 0x5f2   :  { %v1000_v19 = vunpack.c.l.b16 %v984_v53  ;;  %v4837_v62 = vadd.f32 %v972_v51, %v940_v59  ;;  %v941_v1 = vmul.f32 %v923_v54, %v901_v63  ;;  %v987_v2 = vpack.c.bf16 %v4835_v41, %v4835_v41  ;;  %v4876_v53 = vld [vmem:[#allocation10 + $0x8] sm:$0xff]  }
 0x5f3   :  { %v925_v29 = vpop.permute.xlu0 %924  ;;  %v1010_v14 = vrot.slane %v1002_v61, 7 }
 0x5f4   :  { %v1008_v11 = vrot.slane %v1000_v19, 1  ;;  %v988_v4 = vpack.c.bf16 %v4837_v62, %v4837_v62  ;;  %v4847_v48 = vadd.f32 %v973_v23, %v941_v1  ;;  %v1003_v25 = vunpack.c.l.b16 %v987_v2 }
 0x5f5   :  { %v942_v15 = vmul.f32 %v925_v29, %v902_v3  ;;  %v927_v17 = vpop.permute.xlu1 %926 }
 0x5f6   :  { %v1009_v49 = vsel %vm669_vm2, %v1001_v8, %v1008_v11  ;;  %v1004_v21 = vunpack.c.l.b16 %v988_v4  ;;  %v989_v28 = vpack.c.bf16 %v4847_v48, %v4847_v48  ;;  %v1012_v24 = vrot.slane %v1003_v25, 6 }
 0x5f7   :  { %v1011_v18 = vsel %vm672_vm3, %v1010_v14, %v1009_v49  ;;  %v4855_v26 = vadd.f32 %v974_v7, %v942_v15  ;;  %v943_v27 = vmul.f32 %v927_v17, %v903_v44 }
 0x5f8   :  { %v1014_v55 = vrot.slane %v1004_v21, 5  ;;  %v1005_v30 = vunpack.c.l.b16 %v989_v28  ;;  %v1013_v32 = vsel %vm675_vm4, %v1012_v24, %v1011_v18 }
 0x5f9   :  { %v990_v52 = vpack.c.bf16 %v4855_v26, %v4855_v26  ;;  %v4860_v57 = vadd.f32 %v975_v22, %v943_v27 }
 0x5fa   :  { %v1016_v36 = vrot.slane %v1005_v30, 4  ;;  %v1015_v45 = vsel %vm678_vm5, %v1014_v55, %v1013_v32 }
 0x5fb   :  { %v1006_v37 = vunpack.c.l.b16 %v990_v52  ;;  %v991_v31 = vpack.c.bf16 %v4860_v57, %v4860_v57 }
 0x5fc   :  { %v1017_v10 = vsel %vm681_vm6, %v1016_v36, %v1015_v45 }
 0x5fd   :  { %v1018_v6 = vrot.slane %v1006_v37, 3  ;;  %v1007_v42 = vunpack.c.l.b16 %v991_v31 }
 0x5ff   :  { %v1020_v43 = vrot.slane %v1007_v42, 2  ;;  %v1019_v50 = vsel %vm684_vm7, %v1018_v6, %v1017_v10 }
 0x601   :  { %v1021_v16 = vsel %vm687_vm8, %v1020_v43, %v1019_v50 }
 0x602   :  { %v1022_v51 = vpack.c.b16 %v1021_v16, %v1021_v16 }
 0x604   :  { %1023 = vrot.lane.b32.xlu0 %v1022_v51, %s4322_s5 }
 0x676   :  { %v1024_v9 = vpop.permute.xlu0 %1023 }
 0x677   :  { %3526 = vmatmul.mubr.msk.bf16.vlgmr.msra.gmra.mrb[12].mxu0 %vm364_vm9, %v1024_v9 }
 0x678   :  { %3538 = vmatpush3.bf16.msra.mxu0 %v4870_v12  ;;  %3541 = vmatprep.mubr.msk.bf16.mxu0 %vm4320_vm0, %v4319_v0 }
 0x679   :  { %3539 = vmatprep.subr.bf16.mxu0 %v4319_v0 }
 0x67c   :  { %3540 = vmatpush3.bf16.msra.mxu0 %v4876_v53 }
 0x67d   :  { %3553 = vmatprep.subr.bf16.mxu0 %v4319_v0 }
 0x74a   :  { %v1062_v59 = vpop.f32.mrb[12].mxu0 }
 0x74b   :  { %v3527_v63 = vpop.f32.mrb[13].mxu0  ;;  %v1140_v54 = vadd.f32 %v1062_v59, %v4582_v20  ;;  %v1069_v29 = vrot.slane %v1062_v59, 6  ;;  %v1070_v8 = vrot.slane %v1062_v59, 7  ;;  %v1086_v11 = vadd.f32 %v1062_v59, %v4605_v47 }
 0x74c   :  { %v1065_v34 = vpop.f32.mrb[14].mxu0  ;;  %v1071_v4 = vrot.slane %v1062_v59, 1  ;;  %v1073_v25 = vrot.slane %v1062_v59, 3  ;;  %v1072_v17 = vrot.slane %v1062_v59, 2  ;;  %v1075_v28 = vrot.slane %v1062_v59, 5 }
 0x74d   :  { %v3528_v61 = vpop.f32.mrb[15].mxu0  ;;  %1153 = vrot.lane.b32.xlu0 %v1140_v54, %s4309_s19  ;;  %v1142_v19 = vrot.slane %v1140_v54, 6  ;;  %v1143_v23 = vrot.slane %v1140_v54, 7  ;;  %v1144_v1 = vrot.slane %v1140_v54, 1  ;;  %v1146_v40 = vrot.slane %v1140_v54, 3 }
 0x74e   :  { %v1145_v2 = vrot.slane %v1140_v54, 2  ;;  %v1148_v3 = vrot.slane %v1140_v54, 5  ;;  %v1147_v7 = vrot.slane %v1140_v54, 4  ;;  %v1084_v14 = vadd.f32 %v1069_v29, %v4597_v39 }
 0x74f   :  { %1149 = vrot.lane.b32.xlu1 %v1142_v19, %s4309_s19  ;;  %v1085_v15 = vadd.f32 %v1070_v8, %v4603_v46  ;;  %v3375_v44 = vmul.f32 -1.442695, %v1086_v11  ;;  %v1087_v49 = vadd.f32 %v1071_v4, %v4611_v56  ;;  %v1089_v22 = vadd.f32 %v1073_v25, %v4615_v60 }
 0x750   :  { %v3373_v21 = vmul.f32 -1.442695, %v1084_v14  ;;  %v1074_v24 = vrot.slane %v1062_v59, 4  ;;  %v1088_v27 = vadd.f32 %v1072_v17, %v4613_v58  ;;  %v1091_v30 = vadd.f32 %v1075_v28, %v4626_v13 }
 0x751   :  { %1151 = vrot.lane.b32.xlu0 %v1143_v23, %s4309_s19  ;;  %v3374_v18 = vmul.f32 -1.442695, %v1085_v15  ;;  %3736 = vpow2.f32 %v3375_v44  ;;  %v3376_v55 = vmul.f32 -1.442695, %v1087_v49  ;;  %v3378_v32 = vmul.f32 -1.442695, %v1089_v22 }
 0x752   :  { %3738 = vpow2.f32 %v3373_v21  ;;  %v1090_v52 = vadd.f32 %v1074_v24, %v4621_v5  ;;  %v3377_v36 = vmul.f32 -1.442695, %v1088_v27  ;;  %v3380_v45 = vmul.f32 -1.442695, %v1091_v30 }
 0x753   :  { %1155 = vrot.lane.b32.xlu1 %v1144_v1, %s4309_s19  ;;  %3740 = vpow2.f32 %v3374_v18 }
 0x754   :  { %3742 = vpow2.f32 %v3376_v55  ;;  %v3379_v31 = vmul.f32 -1.442695, %v1090_v52 }
 0x755   :  { %1159 = vrot.lane.b32.xlu0 %v1146_v40, %s4309_s19  ;;  %3744 = vpow2.f32 %v3378_v32 }
 0x756   :  { %3746 = vpow2.f32 %v3377_v36 }
 0x757   :  { %1157 = vrot.lane.b32.xlu1 %v1145_v2, %s4309_s19  ;;  %3748 = vpow2.f32 %v3380_v45 }
 0x758   :  { %3750 = vpow2.f32 %v3379_v31 }
 0x759   :  { %1163 = vrot.lane.b32.xlu0 %v1148_v3, %s4309_s19 }
 0x75b   :  { %1161 = vrot.lane.b32.xlu1 %v1147_v7, %s4309_s19  ;;  %v3737_v37 = vpop.eup %3736 }
 0x75c   :  { %v3739_v10 = vpop.eup %3738  ;;  %v1118_v6 = vadd.f32 1.0, %v3737_v37 }
 0x75d   :  { %v3741_v42 = vpop.eup %3740  ;;  %v1116_v43 = vadd.f32 1.0, %v3739_v10 }
 0x75e   :  { %v3743_v50 = vpop.eup %3742  ;;  %3752 = vrcp.f32 %v1118_v6  ;;  %v1117_v16 = vadd.f32 1.0, %v3741_v42 }
 0x75f   :  { %v3745_v51 = vpop.eup %3744  ;;  %3754 = vrcp.f32 %v1116_v43  ;;  %v1119_v9 = vadd.f32 1.0, %v3743_v50 }
 0x760   :  { %v3747_v59 = vpop.eup %3746  ;;  %3756 = vrcp.f32 %v1117_v16  ;;  %v1121_v63 = vadd.f32 1.0, %v3745_v51 }
 0x761   :  { %v3749_v34 = vpop.eup %3748  ;;  %3758 = vrcp.f32 %v1119_v9  ;;  %v1120_v61 = vadd.f32 1.0, %v3747_v59 }
 0x762   :  { %v3751_v54 = vpop.eup %3750  ;;  %3760 = vrcp.f32 %v1121_v63  ;;  %v1123_v19 = vadd.f32 1.0, %v3749_v34 }
 0x763   :  { %3762 = vrcp.f32 %v1120_v61  ;;  %v1122_v40 = vadd.f32 1.0, %v3751_v54 }
 0x764   :  { %3764 = vrcp.f32 %v1123_v19 }
 0x765   :  { %3766 = vrcp.f32 %v1122_v40 }
 0x768   :  { %v4897_v23 = vpop.eup %3752 }
 0x769   :  { %v4900_v3 = vpop.eup %3754 }
 0x76a   :  { %v4904_v8 = vpop.eup %3756 }
 0x76b   :  { %v4908_v14 = vpop.eup %3758 }
 0x76c   :  { %v4912_v44 = vpop.eup %3760 }
 0x76d   :  { %v4916_v21 = vpop.eup %3762 }
 0x76e   :  { %v4920_v18 = vpop.eup %3764 }
 0x76f   :  { %v4924_v55 = vpop.eup %3766 }
 0x7bf   :  { %v1154_v1 = vpop.permute.xlu0 %1153 }
 0x7c0   :  { %v1175_v2 = vmul.f32 %v4897_v23, %v1154_v1 }
 0x7c1   :  { %v1150_v7 = vpop.permute.xlu1 %1149 }
 0x7c2   :  { %1193 = vrot.lane.b32.xlu0 %v1175_v2, %s4309_s19  ;;  %v1173_v29 = vmul.f32 %v4900_v3, %v1150_v7 }
 0x7c3   :  { %v1152_v11 = vpop.permute.xlu0 %1151 }
 0x7c4   :  { %1189 = vrot.lane.b32.xlu1 %v1173_v29, %s4309_s19  ;;  %v1174_v4 = vmul.f32 %v4904_v8, %v1152_v11  ;;  %v1231_v11 = vsub.f32 1.0, %v4897_v23 }
 0x7c5   :  { %v1156_v25 = vpop.permute.xlu1 %1155 }
 0x7c6   :  { %1191 = vrot.lane.b32.xlu0 %v1174_v4, %s4309_s19  ;;  %v1176_v15 = vmul.f32 %v4908_v14, %v1156_v25  ;;  %v1285_v25 = vrot.slane %v4823_v38, 7 }
 0x7c7   :  { %v1160_v17 = vpop.permute.xlu0 %1159 }
 0x7c8   :  { %1195 = vrot.lane.b32.xlu1 %v1176_v15, %s4309_s19  ;;  %v1178_v49 = vmul.f32 %v4912_v44, %v1160_v17  ;;  %v1229_v15 = vsub.f32 1.0, %v4900_v3  ;;  %v1287_v17 = vrot.slane %v4815_v35, 7 }
 0x7c9   :  { %v1158_v28 = vpop.permute.xlu1 %1157 }
 0x7ca   :  { %1199 = vrot.lane.b32.xlu0 %v1178_v49, %s4309_s19  ;;  %v1177_v22 = vmul.f32 %v4916_v21, %v1158_v28 }
 0x7cb   :  { %v1164_v24 = vpop.permute.xlu0 %1163 }
 0x7cc   :  { %1197 = vrot.lane.b32.xlu1 %v1177_v22, %s4309_s19  ;;  %v1180_v27 = vmul.f32 %v4920_v18, %v1164_v24  ;;  %v1286_v22 = vrot.slane %v4813_v33, 7  ;;  %v1301_v24 = vmul.f32 %v4900_v3, %v1285_v25  ;;  %v1290_v3 = vrot.slane %v4847_v48, 7 }
 0x7cd   :  { %v1162_v30 = vpop.permute.xlu1 %1161 }
 0x7ce   :  { %1203 = vrot.lane.b32.xlu0 %v1180_v27, %s4309_s19  ;;  %v1179_v32 = vmul.f32 %v4924_v55, %v1162_v30  ;;  %v1230_v30 = vsub.f32 1.0, %v4904_v8  ;;  %v1302_v38 = vmul.f32 %v4904_v8, %v1286_v22  ;;  %v1306_v48 = vmul.f32 %v4912_v44, %v1290_v3 }
 0x7d0   :  { %1201 = vrot.lane.b32.xlu1 %v1179_v32, %s4309_s19  ;;  %v1303_v32 = vmul.f32 %v4897_v23, %v1287_v17  ;;  %v1234_v23 = vsub.f32 1.0, %v4912_v44 }
 0x834   :  { %v1194_v52 = vpop.permute.xlu0 %1193 }
 0x835   :  { %v1215_v36 = vadd.f32 %v1194_v52, %v4605_v47 }
 0x836   :  { %v1190_v45 = vpop.permute.xlu1 %1189 }
 0x837   :  { %3768 = vtanh.f32 %v1215_v36  ;;  %v1213_v37 = vadd.f32 %v1190_v45, %v4597_v39 }
 0x838   :  { %v1192_v31 = vpop.permute.xlu0 %1191 }
 0x839   :  { %3770 = vtanh.f32 %v1213_v37  ;;  %v1214_v10 = vadd.f32 %v1192_v31, %v4603_v46  ;;  %v1288_v37 = vrot.slane %v4835_v41, 7  ;;  %v1232_v31 = vsub.f32 1.0, %v4908_v14 }
 0x83a   :  { %v1196_v6 = vpop.permute.xlu1 %1195 }
 0x83b   :  { %3772 = vtanh.f32 %v1214_v10  ;;  %v1216_v42 = vadd.f32 %v1196_v6, %v4611_v56  ;;  %v1304_v8 = vmul.f32 %v4908_v14, %v1288_v37 }
 0x83c   :  { %v1200_v43 = vpop.permute.xlu0 %1199 }
 0x83d   :  { %3774 = vtanh.f32 %v1216_v42  ;;  %v1218_v50 = vadd.f32 %v1200_v43, %v4615_v60  ;;  %v1289_v42 = vrot.slane %v4837_v62, 7 }
 0x83e   :  { %v1198_v16 = vpop.permute.xlu1 %1197 }
 0x83f   :  { %3776 = vtanh.f32 %v1218_v50  ;;  %v1217_v51 = vadd.f32 %v1198_v16, %v4613_v58  ;;  %v1233_v50 = vsub.f32 1.0, %v4916_v21 }
 0x840   :  { %v1204_v9 = vpop.permute.xlu0 %1203 }
 0x841   :  { %v3769_v59 = vpop.eup %3768  ;;  %3778 = vtanh.f32 %v1217_v51  ;;  %v1220_v63 = vadd.f32 %v1204_v9, %v4626_v13 }
 0x842   :  { %1249 = vrot.lane.b32.xlu0 %v3769_v59, %s4322_s5  ;;  %v1202_v34 = vpop.permute.xlu1 %1201  ;;  %v1291_v59 = vrot.slane %v4855_v26, 7 }
 0x843   :  { %v3771_v61 = vpop.eup %3770  ;;  %3780 = vtanh.f32 %v1220_v63  ;;  %v1219_v54 = vadd.f32 %v1202_v34, %v4621_v5 }
 0x844   :  { %1245 = vrot.lane.b32.xlu1 %v3771_v61, %s4322_s5 }
 0x845   :  { %v3773_v19 = vpop.eup %3772  ;;  %3782 = vtanh.f32 %v1219_v54  ;;  %v1305_v54 = vmul.f32 %v4916_v21, %v1289_v42 }
 0x846   :  { %1247 = vrot.lane.b32.xlu0 %v3773_v19, %s4322_s5 }
 0x847   :  { %v3775_v1 = vpop.eup %3774 }
 0x848   :  { %1251 = vrot.lane.b32.xlu1 %v3775_v1, %s4322_s5  ;;  %v1292_v1 = vrot.slane %v4860_v57, 7 }
 0x849   :  { %v3777_v40 = vpop.eup %3776 }
 0x84a   :  { %1255 = vrot.lane.b32.xlu0 %v3777_v40, %s4322_s5  ;;  %v1236_v40 = vsub.f32 1.0, %v4920_v18 }
 0x84b   :  { %v3779_v2 = vpop.eup %3778 }
 0x84c   :  { %1253 = vrot.lane.b32.xlu1 %v3779_v2, %s4322_s5  ;;  %v1235_v2 = vsub.f32 1.0, %v4924_v55 }
 0x84d   :  { %v3781_v7 = vpop.eup %3780 }
 0x84e   :  { %1259 = vrot.lane.b32.xlu0 %v3781_v7, %s4322_s5 }
 0x84f   :  { %v3783_v29 = vpop.eup %3782 }
 0x850   :  { %1257 = vrot.lane.b32.xlu1 %v3783_v29, %s4322_s5 }
 0x8b4   :  { %v1250_v4 = vpop.permute.xlu0 %1249 }
 0x8b5   :  { %v1271_v49 = vmul.f32 %v1250_v4, %v1231_v11 }
 0x8b6   :  { %v1246_v28 = vpop.permute.xlu1 %1245 }
 0x8b7   :  { %v1269_v27 = vmul.f32 %v1246_v28, %v1229_v15  ;;  %v4957_v35 = vadd.f32 %v1303_v32, %v1271_v49  ;;  %v1308_v15 = vmul.f32 %v4920_v18, %v1292_v1 }
 0x8b8   :  { %v1248_v52 = vpop.permute.xlu0 %1247 }
 0x8b9   :  { %v4953_v36 = vadd.f32 %v1301_v24, %v1269_v27  ;;  %v1270_v45 = vmul.f32 %v1248_v52, %v1230_v30  ;;  %v1319_v63 = vpack.c.bf16 %v4957_v35, %v4957_v35  ;;  %v1307_v24 = vmul.f32 %v4924_v55, %v1291_v59 }
 0x8ba   :  { %v1252_v33 = vpop.permute.xlu1 %1251 }
 0x8bb   :  { %v1317_v10 = vpack.c.bf16 %v4953_v36, %v4953_v36  ;;  %v4963_v6 = vadd.f32 %v1302_v38, %v1270_v45  ;;  %v1272_v43 = vmul.f32 %v1252_v33, %v1232_v31  ;;  %v1335_v25 = vunpack.c.l.b16 %v1319_v63 }
 0x8bc   :  { %v1256_v41 = vpop.permute.xlu0 %1255 }
 0x8bd   :  { %v1333_v16 = vunpack.c.l.b16 %v1317_v10  ;;  %v1318_v51 = vpack.c.bf16 %v4963_v6, %v4963_v6  ;;  %v1274_v9 = vmul.f32 %v1256_v41, %v1234_v23  ;;  %v4975_v34 = vadd.f32 %v1304_v8, %v1272_v43 }
 0x8be   :  { %v1254_v62 = vpop.permute.xlu1 %1253 }
 0x8bf   :  { %v1334_v14 = vunpack.c.l.b16 %v1318_v51  ;;  %v4977_v61 = vadd.f32 %v1306_v48, %v1274_v9  ;;  %v1273_v19 = vmul.f32 %v1254_v62, %v1233_v50  ;;  %v1320_v44 = vpack.c.bf16 %v4975_v34, %v4975_v34 }
 0x8c0   :  { %v1260_v26 = vpop.permute.xlu0 %1259  ;;  %v1341_v7 = vrot.slane %v1333_v16, 2 }
 0x8c1   :  { %v1342_v29 = vrot.slane %v1334_v14, 1  ;;  %v1322_v11 = vpack.c.bf16 %v4977_v61, %v4977_v61  ;;  %v4987_v4 = vadd.f32 %v1305_v54, %v1273_v19  ;;  %v1336_v21 = vunpack.c.l.b16 %v1320_v44 }
 0x8c2   :  { %v1276_v57 = vmul.f32 %v1260_v26, %v1236_v40  ;;  %v1258_v17 = vpop.permute.xlu1 %1257 }
 0x8c3   :  { %v1343_v49 = vsel %vm669_vm2, %v1342_v29, %v1341_v7  ;;  %v1338_v28 = vunpack.c.l.b16 %v1322_v11  ;;  %v1321_v22 = vpack.c.bf16 %v4987_v4, %v4987_v4  ;;  %v1345_v30 = vrot.slane %v1336_v21, 7 }
 0x8c4   :  { %v1344_v27 = vsel %vm672_vm3, %v1335_v25, %v1343_v49  ;;  %v4995_v32 = vadd.f32 %v1308_v15, %v1276_v57  ;;  %v1275_v52 = vmul.f32 %v1258_v17, %v1235_v2 }
 0x8c5   :  { %v1337_v38 = vunpack.c.l.b16 %v1321_v22  ;;  %v1346_v45 = vsel %vm675_vm4, %v1345_v30, %v1344_v27  ;;  %v1349_v33 = vrot.slane %v1338_v28, 5 }
 0x8c6   :  { %v1324_v18 = vpack.c.bf16 %v4995_v32, %v4995_v32  ;;  %v5000_v37 = vadd.f32 %v1307_v24, %v1275_v52 }
 0x8c7   :  { %v1347_v31 = vrot.slane %v1337_v38, 6 }
 0x8c8   :  { %v1323_v3 = vpack.c.bf16 %v5000_v37, %v5000_v37  ;;  %v1340_v55 = vunpack.c.l.b16 %v1324_v18 }
 0x8c9   :  { %v1348_v10 = vsel %vm678_vm5, %v1347_v31, %v1346_v45 }
 0x8ca   :  { %v1339_v23 = vunpack.c.l.b16 %v1323_v3  ;;  %v1350_v42 = vsel %vm681_vm6, %v1349_v33, %v1348_v10  ;;  %v1353_v43 = vrot.slane %v1340_v55, 3 }
 0x8cc   :  { %v1351_v8 = vrot.slane %v1339_v23, 4 }
 0x8ce   :  { %v1352_v41 = vsel %vm684_vm7, %v1351_v8, %v1350_v42 }
 0x8cf   :  { %v1354_v50 = vsel %vm687_vm8, %v1353_v43, %v1352_v41 }
 0x8d0   :  { %v1355_v16 = vpack.c.b16 %v1354_v50, %v1354_v50 }
 0x8d2   :  { %1356 = vrot.lane.b32.xlu1 %v1355_v16, %s4322_s5 }
 0x944   :  { %v1357_v51 = vpop.permute.xlu1 %1356 }
 0x945   :  { %3534 = vmatmul.mubr.msk.bf16.vlgmr.msra.gmra.mrb[4].mxu1 %vm364_vm9, %v1357_v51 }
 0x946   :  { %3546 = vmatpush3.bf16.msra.mxu1 %v4870_v12  ;;  %3549 = vmatprep.mubr.msk.bf16.mxu1 %vm4320_vm0, %v4319_v0 }
 0x947   :  { %3547 = vmatprep.subr.bf16.mxu1 %v4319_v0 }
 0x94a   :  { %3548 = vmatpush3.bf16.msra.mxu1 %v4876_v53 }
 0x94b   :  { %3561 = vmatprep.subr.bf16.mxu1 %v4319_v0 }
 0xa18   :  { %v1395_v48 = vpop.f32.mrb[4].mxu1 }
 0xa19   :  { %v3535_v9 = vpop.f32.mrb[5].mxu1  ;;  %v1473_v62 = vadd.f32 %v1395_v48, %v4582_v20  ;;  %v1403_v2 = vrot.slane %v1395_v48, 6  ;;  %v1402_v7 = vrot.slane %v1395_v48, 5  ;;  %v1420_v29 = vadd.f32 %v1395_v48, %v4611_v56 }
 0xa1a   :  { %v1398_v59 = vpop.f32.mrb[6].mxu1  ;;  %v1405_v11 = vrot.slane %v1395_v48, 1  ;;  %v1404_v21 = vrot.slane %v1395_v48, 7  ;;  %v1406_v17 = vrot.slane %v1395_v48, 2  ;;  %v1407_v22 = vrot.slane %v1395_v48, 3 }
 0xa1b   :  { %v3536_v63 = vpop.f32.mrb[7].mxu1  ;;  %1488 = vrot.lane.b32.xlu0 %v1473_v62, %s4309_s19  ;;  %v1476_v14 = vrot.slane %v1473_v62, 6  ;;  %v1475_v54 = vrot.slane %v1473_v62, 5  ;;  %v1478_v19 = vrot.slane %v1473_v62, 1  ;;  %v1477_v1 = vrot.slane %v1473_v62, 7 }
 0xa1c   :  { %v1479_v44 = vrot.slane %v1473_v62, 2  ;;  %v1480_v40 = vrot.slane %v1473_v62, 3  ;;  %v1481_v26 = vrot.slane %v1473_v62, 4  ;;  %v1418_v25 = vadd.f32 %v1403_v2, %v4603_v46 }
 0xa1d   :  { %1484 = vrot.lane.b32.xlu1 %v1476_v14, %s4309_s19  ;;  %v1417_v15 = vadd.f32 %v1402_v7, %v4597_v39  ;;  %v3385_v57 = vmul.f32 -1.442695, %v1420_v29  ;;  %v1421_v49 = vadd.f32 %v1405_v11, %v4613_v58  ;;  %v1419_v24 = vadd.f32 %v1404_v21, %v4605_v47 }
 0xa1e   :  { %v3383_v28 = vmul.f32 -1.442695, %v1418_v25  ;;  %v1408_v30 = vrot.slane %v1395_v48, 4  ;;  %v1422_v52 = vadd.f32 %v1406_v17, %v4615_v60  ;;  %v1423_v45 = vadd.f32 %v1407_v22, %v4621_v5 }
 0xa1f   :  { %1482 = vrot.lane.b32.xlu0 %v1475_v54, %s4309_s19  ;;  %v3382_v27 = vmul.f32 -1.442695, %v1417_v15  ;;  %3784 = vpow2.f32 %v3385_v57  ;;  %v3386_v38 = vmul.f32 -1.442695, %v1421_v49  ;;  %v3384_v18 = vmul.f32 -1.442695, %v1419_v24 }
 0xa20   :  { %3786 = vpow2.f32 %v3383_v28  ;;  %v1424_v31 = vadd.f32 %v1408_v30, %v4626_v13  ;;  %v3387_v33 = vmul.f32 -1.442695, %v1422_v52  ;;  %v3388_v3 = vmul.f32 -1.442695, %v1423_v45 }
 0xa21   :  { %1490 = vrot.lane.b32.xlu1 %v1478_v19, %s4309_s19  ;;  %3788 = vpow2.f32 %v3382_v27 }
 0xa22   :  { %3790 = vpow2.f32 %v3386_v38  ;;  %v3389_v10 = vmul.f32 -1.442695, %v1424_v31 }
 0xa23   :  { %1486 = vrot.lane.b32.xlu0 %v1477_v1, %s4309_s19  ;;  %3792 = vpow2.f32 %v3384_v18 }
 0xa24   :  { %3794 = vpow2.f32 %v3387_v33 }
 0xa25   :  { %1492 = vrot.lane.b32.xlu1 %v1479_v44, %s4309_s19  ;;  %3796 = vpow2.f32 %v3388_v3 }
 0xa26   :  { %3798 = vpow2.f32 %v3389_v10 }
 0xa27   :  { %1494 = vrot.lane.b32.xlu0 %v1480_v40, %s4309_s19 }
 0xa29   :  { %1496 = vrot.lane.b32.xlu1 %v1481_v26, %s4309_s19  ;;  %v3785_v55 = vpop.eup %3784 }
 0xa2a   :  { %v3787_v23 = vpop.eup %3786  ;;  %v1452_v42 = vadd.f32 1.0, %v3785_v55 }
 0xa2b   :  { %v3789_v8 = vpop.eup %3788  ;;  %v1450_v43 = vadd.f32 1.0, %v3787_v23 }
 0xa2c   :  { %v3791_v41 = vpop.eup %3790  ;;  %3800 = vrcp.f32 %v1452_v42  ;;  %v1449_v50 = vadd.f32 1.0, %v3789_v8 }
 0xa2d   :  { %v3793_v16 = vpop.eup %3792  ;;  %3802 = vrcp.f32 %v1450_v43  ;;  %v1453_v51 = vadd.f32 1.0, %v3791_v41 }
 0xa2e   :  { %v3795_v48 = vpop.eup %3794  ;;  %3804 = vrcp.f32 %v1449_v50  ;;  %v1451_v9 = vadd.f32 1.0, %v3793_v16 }
 0xa2f   :  { %v3797_v59 = vpop.eup %3796  ;;  %3806 = vrcp.f32 %v1453_v51  ;;  %v1454_v63 = vadd.f32 1.0, %v3795_v48 }
 0xa30   :  { %v3799_v62 = vpop.eup %3798  ;;  %3808 = vrcp.f32 %v1451_v9  ;;  %v1455_v14 = vadd.f32 1.0, %v3797_v59 }
 0xa31   :  { %3810 = vrcp.f32 %v1454_v63  ;;  %v1456_v1 = vadd.f32 1.0, %v3799_v62 }
 0xa32   :  { %3812 = vrcp.f32 %v1455_v14 }
 0xa33   :  { %3814 = vrcp.f32 %v1456_v1 }
 0xa36   :  { %v5033_v54 = vpop.eup %3800 }
 0xa37   :  { %v5036_v40 = vpop.eup %3802 }
 0xa38   :  { %v5040_v7 = vpop.eup %3804 }
 0xa39   :  { %v5044_v25 = vpop.eup %3806 }
 0xa3a   :  { %v5048_v57 = vpop.eup %3808 }
 0xa3b   :  { %v5052_v28 = vpop.eup %3810 }
 0xa3c   :  { %v5056_v27 = vpop.eup %3812 }
 0xa3d   :  { %v5060_v38 = vpop.eup %3814 }
 0xa8d   :  { %v1489_v19 = vpop.permute.xlu0 %1488 }
 0xa8e   :  { %v1509_v44 = vmul.f32 %v5033_v54, %v1489_v19 }
 0xa8f   :  { %v1485_v26 = vpop.permute.xlu1 %1484 }
 0xa90   :  { %1528 = vrot.lane.b32.xlu0 %v1509_v44, %s4309_s19  ;;  %v1507_v2 = vmul.f32 %v5036_v40, %v1485_v26 }
 0xa91   :  { %v1483_v29 = vpop.permute.xlu0 %1482 }
 0xa92   :  { %1524 = vrot.lane.b32.xlu1 %v1507_v2, %s4309_s19  ;;  %v1506_v11 = vmul.f32 %v5040_v7, %v1483_v29 }
 0xa93   :  { %v1491_v21 = vpop.permute.xlu1 %1490 }
 0xa94   :  { %1522 = vrot.lane.b32.xlu0 %v1506_v11, %s4309_s19  ;;  %v1510_v15 = vmul.f32 %v5044_v25, %v1491_v21  ;;  %v1619_v11 = vrot.slane %v4963_v6, 7  ;;  %v1563_v21 = vsub.f32 1.0, %v5036_v40 }
 0xa95   :  { %v1487_v17 = vpop.permute.xlu0 %1486 }
 0xa96   :  { %1530 = vrot.lane.b32.xlu1 %v1510_v15, %s4309_s19  ;;  %v1508_v49 = vmul.f32 %v5048_v57, %v1487_v17  ;;  %v1618_v17 = vrot.slane %v4953_v36, 7 }
 0xa97   :  { %v1493_v22 = vpop.permute.xlu1 %1492 }
 0xa98   :  { %1526 = vrot.lane.b32.xlu0 %v1508_v49, %s4309_s19  ;;  %v1511_v24 = vmul.f32 %v5052_v28, %v1493_v22  ;;  %v1635_v49 = vmul.f32 %v5036_v40, %v1619_v11  ;;  %v1566_v40 = vsub.f32 1.0, %v5044_v25 }
 0xa99   :  { %v1495_v30 = vpop.permute.xlu0 %1494 }
 0xa9a   :  { %1532 = vrot.lane.b32.xlu1 %v1511_v24, %s4309_s19  ;;  %v1512_v52 = vmul.f32 %v5056_v27, %v1495_v30  ;;  %v1562_v24 = vsub.f32 1.0, %v5040_v7  ;;  %v1565_v30 = vsub.f32 1.0, %v5033_v54 }
 0xa9b   :  { %v1497_v45 = vpop.permute.xlu1 %1496 }
 0xa9c   :  { %1534 = vrot.lane.b32.xlu0 %v1512_v52, %s4309_s19  ;;  %v1513_v18 = vmul.f32 %v5060_v38, %v1497_v45  ;;  %v1620_v45 = vrot.slane %v4957_v35, 7  ;;  %v1564_v35 = vsub.f32 1.0, %v5048_v57 }
 0xa9e   :  { %1536 = vrot.lane.b32.xlu1 %v1513_v18, %s4309_s19 }
 0xb02   :  { %v1529_v31 = vpop.permute.xlu0 %1528 }
 0xb03   :  { %v1549_v33 = vadd.f32 %v1529_v31, %v4611_v56  ;;  %v1634_v31 = vmul.f32 %v5040_v7, %v1618_v17 }
 0xb04   :  { %v1525_v3 = vpop.permute.xlu1 %1524 }
 0xb05   :  { %3816 = vtanh.f32 %v1549_v33  ;;  %v1547_v55 = vadd.f32 %v1525_v3, %v4603_v46  ;;  %v1621_v33 = vrot.slane %v4975_v34, 7  ;;  %v1622_v3 = vrot.slane %v4987_v4, 7 }
 0xb06   :  { %v1523_v10 = vpop.permute.xlu0 %1522  ;;  %v1636_v4 = vmul.f32 %v5048_v57, %v1620_v45  ;;  %v1625_v57 = vrot.slane %v4995_v32, 7 }
 0xb07   :  { %3818 = vtanh.f32 %v1547_v55  ;;  %v1546_v23 = vadd.f32 %v1523_v10, %v4597_v39  ;;  %v1623_v10 = vrot.slane %v4977_v61, 7  ;;  %v1637_v7 = vmul.f32 %v5033_v54, %v1621_v33 }
 0xb08   :  { %v1531_v42 = vpop.permute.xlu1 %1530 }
 0xb09   :  { %3820 = vtanh.f32 %v1546_v23  ;;  %v1550_v8 = vadd.f32 %v1531_v42, %v4613_v58 }
 0xb0a   :  { %v1527_v43 = vpop.permute.xlu0 %1526 }
 0xb0b   :  { %3822 = vtanh.f32 %v1550_v8  ;;  %v1548_v41 = vadd.f32 %v1527_v43, %v4605_v47  ;;  %v1638_v8 = vmul.f32 %v5044_v25, %v1622_v3  ;;  %v1639_v25 = vmul.f32 %v5052_v28, %v1623_v10 }
 0xb0c   :  { %v1533_v50 = vpop.permute.xlu1 %1532 }
 0xb0d   :  { %3824 = vtanh.f32 %v1548_v41  ;;  %v1551_v16 = vadd.f32 %v1533_v50, %v4615_v60 }
 0xb0e   :  { %v1535_v51 = vpop.permute.xlu0 %1534 }
 0xb0f   :  { %v3817_v48 = vpop.eup %3816  ;;  %3826 = vtanh.f32 %v1551_v16  ;;  %v1552_v9 = vadd.f32 %v1535_v51, %v4621_v5  ;;  %v1567_v16 = vsub.f32 1.0, %v5052_v28 }
 0xb10   :  { %v1537_v59 = vpop.permute.xlu1 %1536  ;;  %1584 = vrot.lane.b32.xlu0 %v3817_v48, %s4322_s5 }
 0xb11   :  { %v3819_v63 = vpop.eup %3818  ;;  %3828 = vtanh.f32 %v1552_v9  ;;  %v1553_v62 = vadd.f32 %v1537_v59, %v4626_v13 }
 0xb12   :  { %1580 = vrot.lane.b32.xlu1 %v3819_v63, %s4322_s5 }
 0xb13   :  { %v3821_v14 = vpop.eup %3820  ;;  %3830 = vtanh.f32 %v1553_v62  ;;  %v1624_v62 = vrot.slane %v5000_v37, 7  ;;  %v1569_v37 = vsub.f32 1.0, %v5060_v38 }
 0xb14   :  { %1578 = vrot.lane.b32.xlu0 %v3821_v14, %s4322_s5 }
 0xb15   :  { %v3823_v19 = vpop.eup %3822  ;;  %v1640_v32 = vmul.f32 %v5056_v27, %v1624_v62 }
 0xb16   :  { %1586 = vrot.lane.b32.xlu1 %v3823_v19, %s4322_s5  ;;  %v1568_v19 = vsub.f32 1.0, %v5056_v27 }
 0xb17   :  { %v3825_v1 = vpop.eup %3824 }
 0xb18   :  { %1582 = vrot.lane.b32.xlu0 %v3825_v1, %s4322_s5 }
 0xb19   :  { %v3827_v44 = vpop.eup %3826 }
 0xb1a   :  { %1588 = vrot.lane.b32.xlu1 %v3827_v44, %s4322_s5 }
 0xb1b   :  { %v3829_v26 = vpop.eup %3828 }
 0xb1c   :  { %1590 = vrot.lane.b32.xlu0 %v3829_v26, %s4322_s5 }
 0xb1d   :  { %v3831_v2 = vpop.eup %3830 }
 0xb1e   :  { %1592 = vrot.lane.b32.xlu1 %v3831_v2, %s4322_s5 }
 0xb82   :  { %v1585_v29 = vpop.permute.xlu0 %1584 }
 0xb83   :  { %v1605_v36 = vmul.f32 %v1585_v29, %v1565_v30  ;;  %v1641_v30 = vmul.f32 %v5060_v38, %v1625_v57 }
 0xb84   :  { %v1581_v15 = vpop.permute.xlu1 %1580 }
 0xb85   :  { %v1603_v22 = vmul.f32 %v1581_v15, %v1563_v21  ;;  %v5106_v51 = vadd.f32 %v1637_v7, %v1605_v36 }
 0xb86   :  { %v1579_v52 = vpop.permute.xlu0 %1578 }
 0xb87   :  { %v5088_v18 = vadd.f32 %v1635_v49, %v1603_v22  ;;  %v1602_v6 = vmul.f32 %v1579_v52, %v1562_v24  ;;  %v1653_v28 = vpack.c.bf16 %v5106_v51, %v5106_v51 }
 0xb88   :  { %v1587_v55 = vpop.permute.xlu1 %1586 }
 0xb89   :  { %v1651_v23 = vpack.c.bf16 %v5088_v18, %v5088_v18  ;;  %v5097_v42 = vadd.f32 %v1634_v31, %v1602_v6  ;;  %v1606_v34 = vmul.f32 %v1587_v55, %v1566_v40  ;;  %v1669_v6 = vunpack.c.l.b16 %v1653_v28 }
 0xb8a   :  { %v1583_v43 = vpop.permute.xlu0 %1582 }
 0xb8b   :  { %v1667_v41 = vunpack.c.l.b16 %v1651_v23  ;;  %v1650_v50 = vpack.c.bf16 %v5097_v42, %v5097_v42  ;;  %v1604_v61 = vmul.f32 %v1583_v43, %v1564_v35  ;;  %v5108_v48 = vadd.f32 %v1638_v8, %v1606_v34 }
 0xb8c   :  { %v1589_v9 = vpop.permute.xlu1 %1588 }
 0xb8d   :  { %v1666_v59 = vunpack.c.l.b16 %v1650_v50  ;;  %v5110_v54 = vadd.f32 %v1636_v4, %v1604_v61  ;;  %v1607_v63 = vmul.f32 %v1589_v9, %v1567_v16  ;;  %v1654_v14 = vpack.c.bf16 %v5108_v48, %v5108_v48 }
 0xb8e   :  { %v1591_v1 = vpop.permute.xlu0 %1590  ;;  %v1675_v44 = vrot.slane %v1667_v41, 2 }
 0xb8f   :  { %v1674_v26 = vrot.slane %v1666_v59, 3  ;;  %v1652_v2 = vpack.c.bf16 %v5110_v54, %v5110_v54  ;;  %v5120_v29 = vadd.f32 %v1639_v25, %v1607_v63  ;;  %v1608_v11 = vmul.f32 %v1591_v1, %v1568_v19 }
 0xb90   :  { %v1593_v21 = vpop.permute.xlu1 %1592  ;;  %v1670_v17 = vunpack.c.l.b16 %v1654_v14 }
 0xb91   :  { %v1676_v15 = vsel %vm669_vm2, %v1675_v44, %v1674_v26  ;;  %v1668_v49 = vunpack.c.l.b16 %v1652_v2  ;;  %v1655_v22 = vpack.c.bf16 %v5120_v29, %v5120_v29  ;;  %v5129_v24 = vadd.f32 %v1640_v32, %v1608_v11 }
 0xb92   :  { %v1609_v52 = vmul.f32 %v1593_v21, %v1569_v37  ;;  %v1680_v3 = vrot.slane %v1670_v17, 7 }
 0xb93   :  { %v1677_v45 = vrot.slane %v1668_v49, 1  ;;  %v1671_v31 = vunpack.c.l.b16 %v1655_v22  ;;  %v1656_v27 = vpack.c.bf16 %v5129_v24, %v5129_v24 }
 0xb94   :  { %v5134_v33 = vadd.f32 %v1641_v30, %v1609_v52 }
 0xb95   :  { %v1678_v36 = vsel %vm672_vm3, %v1677_v45, %v1676_v15  ;;  %v1682_v40 = vrot.slane %v1671_v31, 6  ;;  %v1672_v10 = vunpack.c.l.b16 %v1656_v27 }
 0xb96   :  { %v1679_v55 = vsel %vm675_vm4, %v1669_v6, %v1678_v36  ;;  %v1657_v23 = vpack.c.bf16 %v5134_v33, %v5134_v33 }
 0xb97   :  { %v1681_v38 = vsel %vm678_vm5, %v1680_v3, %v1679_v55  ;;  %v1684_v7 = vrot.slane %v1672_v10, 5 }
 0xb98   :  { %v1683_v35 = vsel %vm681_vm6, %v1682_v40, %v1681_v38  ;;  %v1673_v8 = vunpack.c.l.b16 %v1657_v23 }
 0xb99   :  { %v1685_v4 = vsel %vm684_vm7, %v1684_v7, %v1683_v35 }
 0xb9a   :  { %v1686_v34 = vrot.slane %v1673_v8, 4 }
 0xb9c   :  { %v1687_v43 = vsel %vm687_vm8, %v1686_v34, %v1685_v4 }
 0xb9d   :  { %v1688_v41 = vpack.c.b16 %v1687_v43, %v1687_v43 }
 0xb9f   :  { %1689 = vrot.lane.b32.xlu0 %v1688_v41, %s4322_s5 }
 0xc11   :  { %v1690_v50 = vpop.permute.xlu0 %1689 }
 0xc12   :  { %3542 = vmatmul.mubr.msk.bf16.vlgmr.msra.gmra.mrb[16].mxu0 %vm364_vm9, %v1690_v50 }
 0xc13   :  { %3554 = vmatpush3.bf16.msra.mxu0 %v4870_v12  ;;  %3557 = vmatprep.mubr.msk.bf16.mxu0 %vm4320_vm0, %v4319_v0 }
 0xc14   :  { %3555 = vmatprep.subr.bf16.mxu0 %v4319_v0 }
 0xc17   :  { %3556 = vmatpush3.bf16.msra.mxu0 %v4876_v53 }
 0xc18   :  { %3569 = vmatprep.subr.bf16.mxu0 %v4319_v0 }
 0xce5   :  { %v1728_v61 = vpop.f32.mrb[16].mxu0 }
 0xce6   :  { %v3543_v16 = vpop.f32.mrb[17].mxu0  ;;  %v1806_v25 = vadd.f32 %v1728_v61, %v4582_v20  ;;  %v1735_v1 = vrot.slane %v1728_v61, 4  ;;  %v1736_v44 = vrot.slane %v1728_v61, 5  ;;  %v1754_v26 = vadd.f32 %v1728_v61, %v4613_v58 }
 0xce7   :  { %v1731_v9 = vpop.f32.mrb[18].mxu0  ;;  %v1737_v2 = vrot.slane %v1728_v61, 6  ;;  %v1738_v32 = vrot.slane %v1728_v61, 7  ;;  %v1739_v21 = vrot.slane %v1728_v61, 1  ;;  %v1741_v49 = vrot.slane %v1728_v61, 3 }
 0xce8   :  { %v3544_v59 = vpop.f32.mrb[19].mxu0  ;;  %1823 = vrot.lane.b32.xlu0 %v1806_v25, %s4309_s19  ;;  %v1808_v63 = vrot.slane %v1806_v25, 4  ;;  %v1809_v12 = vrot.slane %v1806_v25, 5  ;;  %v1810_v57 = vrot.slane %v1806_v25, 6  ;;  %v1811_v53 = vrot.slane %v1806_v25, 7 }
 0xce9   :  { %v1812_v62 = vrot.slane %v1806_v25, 1  ;;  %v1814_v14 = vrot.slane %v1806_v25, 3  ;;  %v1813_v19 = vrot.slane %v1806_v25, 2  ;;  %v1750_v28 = vadd.f32 %v1735_v1, %v4597_v39 }
 0xcea   :  { %1815 = vrot.lane.b32.xlu1 %v1808_v63, %s4309_s19  ;;  %v1751_v11 = vadd.f32 %v1736_v44, %v4603_v46  ;;  %v3395_v37 = vmul.f32 -1.442695, %v1754_v26  ;;  %v1752_v15 = vadd.f32 %v1737_v2, %v4605_v47  ;;  %v1753_v22 = vadd.f32 %v1738_v32, %v4611_v56 }
 0xceb   :  { %v3391_v17 = vmul.f32 -1.442695, %v1750_v28  ;;  %v1740_v52 = vrot.slane %v1728_v61, 2  ;;  %v1755_v45 = vadd.f32 %v1739_v21, %v4615_v60  ;;  %v1757_v6 = vadd.f32 %v1741_v49, %v4626_v13 }
 0xcec   :  { %1817 = vrot.lane.b32.xlu0 %v1809_v12, %s4309_s19  ;;  %v3392_v30 = vmul.f32 -1.442695, %v1751_v11  ;;  %3832 = vpow2.f32 %v3395_v37  ;;  %v3393_v31 = vmul.f32 -1.442695, %v1752_v15  ;;  %v3394_v27 = vmul.f32 -1.442695, %v1753_v22 }
 0xced   :  { %3834 = vpow2.f32 %v3391_v17  ;;  %v1756_v3 = vadd.f32 %v1740_v52, %v4621_v5  ;;  %v3396_v36 = vmul.f32 -1.442695, %v1755_v45  ;;  %v3398_v40 = vmul.f32 -1.442695, %v1757_v6 }
 0xcee   :  { %1819 = vrot.lane.b32.xlu1 %v1810_v57, %s4309_s19  ;;  %3836 = vpow2.f32 %v3392_v30 }
 0xcef   :  { %3838 = vpow2.f32 %v3393_v31  ;;  %v3397_v10 = vmul.f32 -1.442695, %v1756_v3 }
 0xcf0   :  { %1821 = vrot.lane.b32.xlu0 %v1811_v53, %s4309_s19  ;;  %3840 = vpow2.f32 %v3394_v27 }
 0xcf1   :  { %3842 = vpow2.f32 %v3396_v36 }
 0xcf2   :  { %1825 = vrot.lane.b32.xlu1 %v1812_v62, %s4309_s19  ;;  %3844 = vpow2.f32 %v3398_v40 }
 0xcf3   :  { %3846 = vpow2.f32 %v3397_v10 }
 0xcf4   :  { %1829 = vrot.lane.b32.xlu0 %v1814_v14, %s4309_s19 }
 0xcf6   :  { %1827 = vrot.lane.b32.xlu1 %v1813_v19, %s4309_s19  ;;  %v3833_v55 = vpop.eup %3832 }
 0xcf7   :  { %v3835_v23 = vpop.eup %3834  ;;  %v1786_v38 = vadd.f32 1.0, %v3833_v55 }
 0xcf8   :  { %v3837_v35 = vpop.eup %3836  ;;  %v1782_v7 = vadd.f32 1.0, %v3835_v23 }
 0xcf9   :  { %v3839_v8 = vpop.eup %3838  ;;  %3848 = vrcp.f32 %v1786_v38  ;;  %v1783_v34 = vadd.f32 1.0, %v3837_v35 }
 0xcfa   :  { %v3841_v4 = vpop.eup %3840  ;;  %3850 = vrcp.f32 %v1782_v7  ;;  %v1784_v43 = vadd.f32 1.0, %v3839_v8 }
 0xcfb   :  { %v3843_v41 = vpop.eup %3842  ;;  %3852 = vrcp.f32 %v1783_v34  ;;  %v1785_v50 = vadd.f32 1.0, %v3841_v4 }
 0xcfc   :  { %v3845_v61 = vpop.eup %3844  ;;  %3854 = vrcp.f32 %v1784_v43  ;;  %v1787_v16 = vadd.f32 1.0, %v3843_v41 }
 0xcfd   :  { %v3847_v9 = vpop.eup %3846  ;;  %3856 = vrcp.f32 %v1785_v50  ;;  %v1789_v59 = vadd.f32 1.0, %v3845_v61 }
 0xcfe   :  { %3858 = vrcp.f32 %v1787_v16  ;;  %v1788_v12 = vadd.f32 1.0, %v3847_v9 }
 0xcff   :  { %3860 = vrcp.f32 %v1789_v59 }
 0xd00   :  { %3862 = vrcp.f32 %v1788_v12 }
 0xd03   :  { %v5169_v25 = vpop.eup %3848 }
 0xd04   :  { %v5172_v53 = vpop.eup %3850 }
 0xd05   :  { %v5176_v19 = vpop.eup %3852 }
 0xd06   :  { %v5180_v26 = vpop.eup %3854 }
 0xd07   :  { %v5184_v32 = vpop.eup %3856 }
 0xd08   :  { %v5188_v21 = vpop.eup %3858 }
 0xd09   :  { %v5192_v49 = vpop.eup %3860 }
 0xd0a   :  { %v5196_v52 = vpop.eup %3862 }
 0xd5a   :  { %v1824_v63 = vpop.permute.xlu0 %1823 }
 0xd5b   :  { %v1843_v57 = vmul.f32 %v5169_v25, %v1824_v63 }
 0xd5c   :  { %v1816_v62 = vpop.permute.xlu1 %1815 }
 0xd5d   :  { %v1839_v14 = vmul.f32 %v5172_v53, %v1816_v62  ;;  %1863 = vrot.lane.b32.xlu0 %v1843_v57, %s4309_s19 }
 0xd5e   :  { %v1818_v1 = vpop.permute.xlu0 %1817 }
 0xd5f   :  { %v1840_v44 = vmul.f32 %v5176_v19, %v1818_v1  ;;  %1855 = vrot.lane.b32.xlu1 %v1839_v14, %s4309_s19  ;;  %v1951_v14 = vrot.slane %v5097_v42, 7  ;;  %v1895_v1 = vsub.f32 1.0, %v5172_v53 }
 0xd60   :  { %v1820_v2 = vpop.permute.xlu1 %1819 }
 0xd61   :  { %v1841_v28 = vmul.f32 %v5180_v26, %v1820_v2  ;;  %1857 = vrot.lane.b32.xlu0 %v1840_v44, %s4309_s19  ;;  %v1952_v2 = vrot.slane %v5088_v18, 7 }
 0xd62   :  { %v1822_v11 = vpop.permute.xlu0 %1821 }
 0xd63   :  { %v1842_v37 = vmul.f32 %v5184_v32, %v1822_v11  ;;  %1859 = vrot.lane.b32.xlu1 %v1841_v28, %s4309_s19  ;;  %v1967_v28 = vmul.f32 %v5172_v53, %v1951_v14  ;;  %v1897_v53 = vsub.f32 1.0, %v5180_v26 }
 0xd64   :  { %v1826_v15 = vpop.permute.xlu1 %1825 }
 0xd65   :  { %v1844_v17 = vmul.f32 %v5188_v21, %v1826_v15  ;;  %1861 = vrot.lane.b32.xlu0 %v1842_v37, %s4309_s19  ;;  %v1896_v37 = vsub.f32 1.0, %v5176_v19  ;;  %v1899_v15 = vsub.f32 1.0, %v5169_v25 }
 0xd66   :  { %v1830_v22 = vpop.permute.xlu0 %1829 }
 0xd67   :  { %v1846_v30 = vmul.f32 %v5192_v49, %v1830_v22  ;;  %1865 = vrot.lane.b32.xlu1 %v1844_v17, %s4309_s19  ;;  %v1954_v22 = vrot.slane %v5106_v51, 7  ;;  %v1898_v51 = vsub.f32 1.0, %v5184_v32 }
 0xd68   :  { %v1828_v45 = vpop.permute.xlu1 %1827 }
 0xd69   :  { %v1845_v31 = vmul.f32 %v5196_v52, %v1828_v45  ;;  %1869 = vrot.lane.b32.xlu0 %v1846_v30, %s4309_s19  ;;  %v1968_v45 = vmul.f32 %v5176_v19, %v1952_v2 }
 0xd6b   :  { %1867 = vrot.lane.b32.xlu1 %v1845_v31, %s4309_s19  ;;  %v1955_v31 = vrot.slane %v5108_v48, 7 }
 0xd6d   :  { %v1971_v19 = vmul.f32 %v5169_v25, %v1955_v31 }
 0xdcf   :  { %v1864_v6 = vpop.permute.xlu0 %1863 }
 0xdd0   :  { %v1883_v27 = vadd.f32 %v1864_v6, %v4613_v58  ;;  %v1953_v6 = vrot.slane %v5110_v54, 7  ;;  %v1970_v54 = vmul.f32 %v5184_v32, %v1954_v22 }
 0xdd1   :  { %v1856_v3 = vpop.permute.xlu1 %1855 }
 0xdd2   :  { %3864 = vtanh.f32 %v1883_v27  ;;  %v1879_v36 = vadd.f32 %v1856_v3, %v4597_v39  ;;  %v1956_v3 = vrot.slane %v5120_v29, 7 }
 0xdd3   :  { %v1858_v40 = vpop.permute.xlu0 %1857 }
 0xdd4   :  { %3866 = vtanh.f32 %v1879_v36  ;;  %v1880_v55 = vadd.f32 %v1858_v40, %v4603_v46  ;;  %v1972_v32 = vmul.f32 %v5188_v21, %v1956_v3 }
 0xdd5   :  { %v1860_v10 = vpop.permute.xlu1 %1859 }
 0xdd6   :  { %3868 = vtanh.f32 %v1880_v55  ;;  %v1881_v23 = vadd.f32 %v1860_v10, %v4605_v47  ;;  %v1969_v55 = vmul.f32 %v5180_v26, %v1953_v6 }
 0xdd7   :  { %v1862_v38 = vpop.permute.xlu0 %1861 }
 0xdd8   :  { %3870 = vtanh.f32 %v1881_v23  ;;  %v1882_v35 = vadd.f32 %v1862_v38, %v4611_v56 }
 0xdd9   :  { %v1866_v7 = vpop.permute.xlu1 %1865 }
 0xdda   :  { %3872 = vtanh.f32 %v1882_v35  ;;  %v1884_v8 = vadd.f32 %v1866_v7, %v4615_v60  ;;  %v1900_v35 = vsub.f32 1.0, %v5188_v21  ;;  %v1957_v7 = vrot.slane %v5129_v24, 7 }
 0xddb   :  { %v1870_v34 = vpop.permute.xlu0 %1869  ;;  %v1901_v24 = vsub.f32 1.0, %v5196_v52 }
 0xddc   :  { %v3865_v4 = vpop.eup %3864  ;;  %3874 = vtanh.f32 %v1884_v8  ;;  %v1886_v43 = vadd.f32 %v1870_v34, %v4626_v13 }
 0xddd   :  { %1919 = vrot.lane.b32.xlu0 %v3865_v4, %s4322_s5  ;;  %v1868_v41 = vpop.permute.xlu1 %1867 }
 0xdde   :  { %v3867_v50 = vpop.eup %3866  ;;  %3876 = vtanh.f32 %v1886_v43  ;;  %v1885_v61 = vadd.f32 %v1868_v41, %v4621_v5  ;;  %v1958_v41 = vrot.slane %v5134_v33, 7 }
 0xddf   :  { %1911 = vrot.lane.b32.xlu1 %v3867_v50, %s4322_s5 }
 0xde0   :  { %v3869_v16 = vpop.eup %3868  ;;  %3878 = vtanh.f32 %v1885_v61  ;;  %v1902_v61 = vsub.f32 1.0, %v5192_v49  ;;  %v1974_v33 = vmul.f32 %v5192_v49, %v1958_v41 }
 0xde1   :  { %1913 = vrot.lane.b32.xlu0 %v3869_v16, %s4322_s5 }
 0xde2   :  { %v3871_v9 = vpop.eup %3870 }
 0xde3   :  { %1915 = vrot.lane.b32.xlu1 %v3871_v9, %s4322_s5 }
 0xde4   :  { %v3873_v59 = vpop.eup %3872 }
 0xde5   :  { %1917 = vrot.lane.b32.xlu0 %v3873_v59, %s4322_s5 }
 0xde6   :  { %v3875_v63 = vpop.eup %3874 }
 0xde7   :  { %1921 = vrot.lane.b32.xlu1 %v3875_v63, %s4322_s5 }
 0xde8   :  { %v3877_v12 = vpop.eup %3876 }
 0xde9   :  { %1925 = vrot.lane.b32.xlu0 %v3877_v12, %s4322_s5 }
 0xdea   :  { %v3879_v57 = vpop.eup %3878 }
 0xdeb   :  { %1923 = vrot.lane.b32.xlu1 %v3879_v57, %s4322_s5 }
 0xe4f   :  { %v1920_v62 = vpop.permute.xlu0 %1919 }
 0xe50   :  { %v1939_v18 = vmul.f32 %v1920_v62, %v1899_v15 }
 0xe51   :  { %v1912_v44 = vpop.permute.xlu1 %1911 }
 0xe52   :  { %v1935_v11 = vmul.f32 %v1912_v44, %v1895_v1  ;;  %v5243_v8 = vadd.f32 %v1971_v19, %v1939_v18 }
 0xe53   :  { %v1914_v17 = vpop.permute.xlu0 %1913 }
 0xe54   :  { %v5224_v30 = vadd.f32 %v1967_v28, %v1935_v11  ;;  %v1936_v42 = vmul.f32 %v1914_v17, %v1896_v37  ;;  %v1987_v21 = vpack.c.bf16 %v5243_v8, %v5243_v8  ;;  %v1973_v37 = vmul.f32 %v5196_v52, %v1957_v7 }
 0xe55   :  { %v1916_v27 = vpop.permute.xlu1 %1915 }
 0xe56   :  { %v1983_v36 = vpack.c.bf16 %v5224_v30, %v5224_v30  ;;  %v5233_v40 = vadd.f32 %v1968_v45, %v1936_v42  ;;  %v1937_v48 = vmul.f32 %v1916_v27, %v1897_v53  ;;  %v2003_v45 = vunpack.c.l.b16 %v1987_v21 }
 0xe57   :  { %v1918_v10 = vpop.permute.xlu0 %1917 }
 0xe58   :  { %v1999_v23 = vunpack.c.l.b16 %v1983_v36  ;;  %v1984_v38 = vpack.c.bf16 %v5233_v40, %v5233_v40  ;;  %v1938_v29 = vmul.f32 %v1918_v10, %v1898_v51  ;;  %v5245_v34 = vadd.f32 %v1969_v55, %v1937_v48 }
 0xe59   :  { %v1922_v25 = vpop.permute.xlu1 %1921 }
 0xe5a   :  { %v2000_v4 = vunpack.c.l.b16 %v1984_v38  ;;  %v5247_v26 = vadd.f32 %v1970_v54, %v1938_v29  ;;  %v1940_v43 = vmul.f32 %v1922_v25, %v1900_v35  ;;  %v1985_v50 = vpack.c.bf16 %v5245_v34, %v5245_v34  ;;  %v4027_v38 = vld [vmem:[#allocation10 + $0x8] sm:$0xff]  }
 0xe5b   :  { %v1926_v16 = vpop.permute.xlu0 %1925  ;;  %v2007_v9 = vrot.slane %v1999_v23, 4  ;;  %v4026_v23 = vld [vmem:[#allocation10] sm:$0xff]  }
 0xe5c   :  { %v2008_v59 = vrot.slane %v2000_v4, 3  ;;  %v1986_v63 = vpack.c.bf16 %v5247_v26, %v5247_v26  ;;  %v5257_v12 = vadd.f32 %v1972_v32, %v1940_v43  ;;  %v2001_v57 = vunpack.c.l.b16 %v1985_v50 }
 0xe5d   :  { %v1942_v62 = vmul.f32 %v1926_v16, %v1902_v61  ;;  %v1924_v14 = vpop.permute.xlu1 %1923 }
 0xe5e   :  { %v2009_v1 = vsel %vm669_vm2, %v2008_v59, %v2007_v9  ;;  %v2002_v44 = vunpack.c.l.b16 %v1986_v63  ;;  %v1988_v2 = vpack.c.bf16 %v5257_v12, %v5257_v12  ;;  %v2010_v28 = vrot.slane %v2001_v57, 2 }
 0xe5f   :  { %v5265_v11 = vadd.f32 %v1974_v33, %v1942_v62  ;;  %v1941_v15 = vmul.f32 %v1924_v14, %v1901_v24 }
 0xe60   :  { %v2012_v17 = vrot.slane %v2002_v44, 1  ;;  %v2004_v22 = vunpack.c.l.b16 %v1988_v2  ;;  %v2011_v42 = vsel %vm672_vm3, %v2010_v28, %v2009_v1 }
 0xe61   :  { %v1990_v49 = vpack.c.bf16 %v5265_v11, %v5265_v11  ;;  %v5271_v31 = vadd.f32 %v1973_v37, %v1941_v15 }
 0xe62   :  { %v2013_v6 = vsel %vm675_vm4, %v2012_v17, %v2011_v42  ;;  %v2015_v18 = vrot.slane %v2004_v22, 7 }
 0xe63   :  { %v2014_v53 = vsel %vm678_vm5, %v2003_v45, %v2013_v6  ;;  %v1989_v27 = vpack.c.bf16 %v5271_v31, %v5271_v31  ;;  %v2006_v3 = vunpack.c.l.b16 %v1990_v49 }
 0xe64   :  { %v2016_v52 = vsel %vm681_vm6, %v2015_v18, %v2014_v53 }
 0xe65   :  { %v2005_v36 = vunpack.c.l.b16 %v1989_v27  ;;  %v2019_v19 = vrot.slane %v2006_v3, 5 }
 0xe67   :  { %v2017_v51 = vrot.slane %v2005_v36, 6 }
 0xe69   :  { %v2018_v55 = vsel %vm684_vm7, %v2017_v51, %v2016_v52 }
 0xe6a   :  { %v2020_v48 = vsel %vm687_vm8, %v2019_v19, %v2018_v55 }
 0xe6b   :  { %v2021_v54 = vpack.c.b16 %v2020_v48, %v2020_v48 }
 0xe6d   :  { %2022 = vrot.lane.b32.xlu1 %v2021_v54, %s4322_s5 }
 0xedf   :  { %v2023_v10 = vpop.permute.xlu1 %2022 }
 0xee0   :  { %3550 = vmatmul.mubr.msk.bf16.vlgmr.msra.gmra.mrb[8].mxu1 %vm364_vm9, %v2023_v10 }
 0xee1   :  { %3562 = vmatpush3.bf16.msra.mxu1 %v4026_v23  ;;  %3565 = vmatprep.mubr.msk.bf16.mxu1 %vm4320_vm0, %v4319_v0 }
 0xee2   :  { %3563 = vmatprep.subr.bf16.mxu1 %v4319_v0 }
 0xee5   :  { %3564 = vmatpush3.bf16.msra.mxu1 %v4027_v38 }
 0xee6   :  { %3577 = vmatprep.subr.bf16.mxu1 %v4319_v0 }
 0xfb3   :  { %v2061_v29 = vpop.f32.mrb[8].mxu1 }
 0xfb4   :  { %v3551_v35 = vpop.f32.mrb[9].mxu1  ;;  %v2139_v4 = vadd.f32 %v2061_v29, %v4582_v20  ;;  %v2068_v9 = vrot.slane %v2061_v29, 3  ;;  %v2069_v59 = vrot.slane %v2061_v29, 4  ;;  %v2070_v63 = vrot.slane %v2061_v29, 5 }
 0xfb5   :  { %v2064_v7 = vpop.f32.mrb[10].mxu1  ;;  %v2071_v57 = vrot.slane %v2061_v29, 6  ;;  %v2072_v62 = vrot.slane %v2061_v29, 7  ;;  %v2073_v44 = vrot.slane %v2061_v29, 1  ;;  %v2074_v17 = vrot.slane %v2061_v29, 2 }
 0xfb6   :  { %v3552_v25 = vpop.f32.mrb[11].mxu1  ;;  %v2142_v32 = vrot.slane %v2139_v4, 4  ;;  %v2141_v43 = vrot.slane %v2139_v4, 3  ;;  %v2144_v41 = vrot.slane %v2139_v4, 6  ;;  %v2143_v50 = vrot.slane %v2139_v4, 5 }
 0xfb7   :  { %v2146_v61 = vrot.slane %v2139_v4, 1  ;;  %v2145_v16 = vrot.slane %v2139_v4, 7  ;;  %v2147_v24 = vrot.slane %v2139_v4, 2  ;;  %v2083_v21 = vadd.f32 %v2068_v9, %v4597_v39 }
 0xfb8   :  { %2150 = vrot.lane.b32.xlu1 %v2142_v32, %s4309_s19  ;;  %2148 = vrot.lane.b32.xlu0 %v2141_v43, %s4309_s19  ;;  %v2084_v33 = vadd.f32 %v2069_v59, %v4603_v46  ;;  %v2085_v14 = vadd.f32 %v2070_v63, %v4605_v47  ;;  %v2086_v2 = vadd.f32 %v2071_v57, %v4611_v56 }
 0xfb9   :  { %v3400_v1 = vmul.f32 -1.442695, %v2083_v21  ;;  %v2087_v37 = vadd.f32 %v2072_v62, %v4613_v58  ;;  %v2089_v22 = vadd.f32 %v2073_v44, %v4621_v5  ;;  %v2088_v42 = vadd.f32 %v2061_v29, %v4615_v60 }
 0xfba   :  { %v3401_v28 = vmul.f32 -1.442695, %v2084_v33  ;;  %v3402_v15 = vmul.f32 -1.442695, %v2085_v14  ;;  %v3403_v45 = vmul.f32 -1.442695, %v2086_v2  ;;  %v2090_v6 = vadd.f32 %v2074_v17, %v4626_v13 }
 0xfbb   :  { %3880 = vpow2.f32 %v3400_v1  ;;  %v3404_v49 = vmul.f32 -1.442695, %v2087_v37  ;;  %v3406_v18 = vmul.f32 -1.442695, %v2089_v22  ;;  %v3405_v53 = vmul.f32 -1.442695, %v2088_v42 }
 0xfbc   :  { %2154 = vrot.lane.b32.xlu1 %v2144_v41, %s4309_s19  ;;  %2152 = vrot.lane.b32.xlu0 %v2143_v50, %s4309_s19  ;;  %3882 = vpow2.f32 %v3401_v28  ;;  %v3407_v27 = vmul.f32 -1.442695, %v2090_v6 }
 0xfbd   :  { %3884 = vpow2.f32 %v3402_v15 }
 0xfbe   :  { %3886 = vpow2.f32 %v3403_v45 }
 0xfbf   :  { %3888 = vpow2.f32 %v3404_v49 }
 0xfc0   :  { %2160 = vrot.lane.b32.xlu1 %v2146_v61, %s4309_s19  ;;  %2156 = vrot.lane.b32.xlu0 %v2145_v16, %s4309_s19  ;;  %3890 = vpow2.f32 %v3406_v18 }
 0xfc1   :  { %3892 = vpow2.f32 %v3405_v53 }
 0xfc2   :  { %3894 = vpow2.f32 %v3407_v27 }
 0xfc4   :  { %2162 = vrot.lane.b32.xlu1 %v2147_v24, %s4309_s19  ;;  %2158 = vrot.lane.b32.xlu0 %v2139_v4, %s4309_s19 }
 0xfc5   :  { %v3881_v52 = vpop.eup %3880 }
 0xfc6   :  { %v3883_v3 = vpop.eup %3882  ;;  %v2115_v36 = vadd.f32 1.0, %v3881_v52 }
 0xfc7   :  { %v3885_v51 = vpop.eup %3884  ;;  %v2116_v19 = vadd.f32 1.0, %v3883_v3 }
 0xfc8   :  { %v3887_v55 = vpop.eup %3886  ;;  %3896 = vrcp.f32 %v2115_v36  ;;  %v2117_v48 = vadd.f32 1.0, %v3885_v51 }
 0xfc9   :  { %v3889_v54 = vpop.eup %3888  ;;  %3898 = vrcp.f32 %v2116_v19  ;;  %v2118_v10 = vadd.f32 1.0, %v3887_v55 }
 0xfca   :  { %v3891_v23 = vpop.eup %3890  ;;  %3900 = vrcp.f32 %v2117_v48  ;;  %v2119_v38 = vadd.f32 1.0, %v3889_v54 }
 0xfcb   :  { %v3893_v29 = vpop.eup %3892  ;;  %3902 = vrcp.f32 %v2118_v10  ;;  %v2121_v35 = vadd.f32 1.0, %v3891_v23 }
 0xfcc   :  { %v3895_v7 = vpop.eup %3894  ;;  %3904 = vrcp.f32 %v2119_v38  ;;  %v2120_v25 = vadd.f32 1.0, %v3893_v29 }
 0xfcd   :  { %3906 = vrcp.f32 %v2121_v35  ;;  %v2122_v4 = vadd.f32 1.0, %v3895_v7 }
 0xfce   :  { %3908 = vrcp.f32 %v2120_v25 }
 0xfcf   :  { %3910 = vrcp.f32 %v2122_v4 }
 0xfd2   :  { %v5303_v32 = vpop.eup %3896 }
 0xfd3   :  { %v5305_v43 = vpop.eup %3898 }
 0xfd4   :  { %v5309_v24 = vpop.eup %3900 }
 0xfd5   :  { %v5313_v9 = vpop.eup %3902 }
 0xfd6   :  { %v5317_v33 = vpop.eup %3904 }
 0xfd7   :  { %v5321_v62 = vpop.eup %3906 }
 0xfd8   :  { %v5325_v28 = vpop.eup %3908 }
 0xfd9   :  { %v5329_v37 = vpop.eup %3910 }
0x102a   :  { %v2151_v41 = vpop.permute.xlu1 %2150  ;;  %v2149_v50 = vpop.permute.xlu0 %2148 }
0x102b   :  { %v2173_v61 = vmul.f32 %v5305_v43, %v2151_v41  ;;  %v2172_v16 = vmul.f32 %v5303_v32, %v2149_v50 }
0x102d   :  { %2190 = vrot.lane.b32.xlu1 %v2173_v61, %s4309_s19  ;;  %2188 = vrot.lane.b32.xlu0 %v2172_v16, %s4309_s19  ;;  %v2285_v61 = vrot.slane %v5233_v40, 7  ;;  %v2229_v16 = vsub.f32 1.0, %v5305_v43  ;;  %v2231_v40 = vsub.f32 1.0, %v5313_v9 }
0x102e   :  { %v2155_v59 = vpop.permute.xlu1 %2154  ;;  %v2153_v63 = vpop.permute.xlu0 %2152 }
0x102f   :  { %v2175_v21 = vmul.f32 %v5313_v9, %v2155_v59  ;;  %v2174_v57 = vmul.f32 %v5309_v24, %v2153_v63  ;;  %v2284_v59 = vrot.slane %v5224_v30, 7 }
0x1031   :  { %2194 = vrot.lane.b32.xlu1 %v2175_v21, %s4309_s19  ;;  %2192 = vrot.lane.b32.xlu0 %v2174_v57, %s4309_s19  ;;  %v2228_v21 = vsub.f32 1.0, %v5303_v32  ;;  %v2301_v57 = vmul.f32 %v5305_v43, %v2285_v61 }
0x1032   :  { %v2161_v14 = vpop.permute.xlu1 %2160  ;;  %v2157_v1 = vpop.permute.xlu0 %2156 }
0x1033   :  { %v2178_v44 = vmul.f32 %v5321_v62, %v2161_v14  ;;  %v2176_v2 = vmul.f32 %v5317_v33, %v2157_v1 }
0x1035   :  { %2200 = vrot.lane.b32.xlu1 %v2178_v44, %s4309_s19  ;;  %2196 = vrot.lane.b32.xlu0 %v2176_v2, %s4309_s19  ;;  %v2300_v44 = vmul.f32 %v5303_v32, %v2284_v59 }
0x1036   :  { %v2163_v15 = vpop.permute.xlu1 %2162  ;;  %v2159_v17 = vpop.permute.xlu0 %2158 }
0x1037   :  { %v2179_v22 = vmul.f32 %v5329_v37, %v2163_v15  ;;  %v2177_v45 = vmul.f32 %v5325_v28, %v2159_v17  ;;  %v2287_v15 = vrot.slane %v5247_v26, 7  ;;  %v2288_v26 = vrot.slane %v5243_v8, 7 }
0x1038   :  { %v2232_v8 = vsub.f32 1.0, %v5317_v33 }
0x1039   :  { %2202 = vrot.lane.b32.xlu1 %v2179_v22, %s4309_s19  ;;  %2198 = vrot.lane.b32.xlu0 %v2177_v45, %s4309_s19  ;;  %v2286_v22 = vrot.slane %v5245_v34, 7 }
0x109f   :  { %v2191_v42 = vpop.permute.xlu1 %2190  ;;  %v2189_v49 = vpop.permute.xlu0 %2188 }
0x10a0   :  { %v2213_v6 = vadd.f32 %v2191_v42, %v4603_v46  ;;  %v2212_v18 = vadd.f32 %v2189_v49, %v4597_v39  ;;  %v2230_v42 = vsub.f32 1.0, %v5309_v24  ;;  %v2303_v49 = vmul.f32 %v5313_v9, %v2287_v15 }
0x10a2   :  { %3912 = vtanh.f32 %v2213_v6 }
0x10a3   :  { %3914 = vtanh.f32 %v2212_v18  ;;  %v2195_v53 = vpop.permute.xlu1 %2194  ;;  %v2193_v27 = vpop.permute.xlu0 %2192 }
0x10a4   :  { %v2215_v52 = vadd.f32 %v2195_v53, %v4611_v56  ;;  %v2214_v3 = vadd.f32 %v2193_v27, %v4605_v47  ;;  %v2302_v53 = vmul.f32 %v5309_v24, %v2286_v22  ;;  %v2290_v27 = vrot.slane %v5271_v31, 7 }
0x10a6   :  { %3916 = vtanh.f32 %v2215_v52 }
0x10a7   :  { %3918 = vtanh.f32 %v2214_v3  ;;  %v2201_v36 = vpop.permute.xlu1 %2200  ;;  %v2197_v51 = vpop.permute.xlu0 %2196 }
0x10a8   :  { %v2218_v19 = vadd.f32 %v2201_v36, %v4621_v5  ;;  %v2216_v55 = vadd.f32 %v2197_v51, %v4613_v58  ;;  %v2234_v36 = vsub.f32 1.0, %v5321_v62  ;;  %v2289_v51 = vrot.slane %v5257_v12, 7 }
0x10a9   :  { %v2304_v12 = vmul.f32 %v5317_v33, %v2288_v26 }
0x10aa   :  { %3920 = vtanh.f32 %v2218_v19 }
0x10ab   :  { %3922 = vtanh.f32 %v2216_v55  ;;  %v2203_v48 = vpop.permute.xlu1 %2202  ;;  %v2199_v54 = vpop.permute.xlu0 %2198 }
0x10ac   :  { %v3913_v10 = vpop.eup %3912  ;;  %v2219_v23 = vadd.f32 %v2203_v48, %v4626_v13  ;;  %v2217_v38 = vadd.f32 %v2199_v54, %v4615_v60  ;;  %v2306_v54 = vmul.f32 %v5321_v62, %v2290_v27 }
0x10ad   :  { %v3915_v29 = vpop.eup %3914  ;;  %2246 = vrot.lane.b32.xlu1 %v3913_v10, %s4322_s5 }
0x10ae   :  { %3924 = vtanh.f32 %v2219_v23  ;;  %2244 = vrot.lane.b32.xlu0 %v3915_v29, %s4322_s5 }
0x10af   :  { %3926 = vtanh.f32 %v2217_v38 }
0x10b0   :  { %v3917_v35 = vpop.eup %3916 }
0x10b1   :  { %v3919_v7 = vpop.eup %3918  ;;  %2250 = vrot.lane.b32.xlu1 %v3917_v35, %s4322_s5  ;;  %v2291_v35 = vrot.slane %v5265_v11, 7 }
0x10b2   :  { %2248 = vrot.lane.b32.xlu0 %v3919_v7, %s4322_s5 }
0x10b4   :  { %v3921_v25 = vpop.eup %3920 }
0x10b5   :  { %v3923_v4 = vpop.eup %3922  ;;  %2256 = vrot.lane.b32.xlu1 %v3921_v25, %s4322_s5 }
0x10b6   :  { %2252 = vrot.lane.b32.xlu0 %v3923_v4, %s4322_s5  ;;  %v2235_v4 = vsub.f32 1.0, %v5329_v37 }
0x10b8   :  { %v3925_v41 = vpop.eup %3924 }
0x10b9   :  { %v3927_v50 = vpop.eup %3926  ;;  %2258 = vrot.lane.b32.xlu1 %v3925_v41, %s4322_s5 }
0x10ba   :  { %2254 = vrot.lane.b32.xlu0 %v3927_v50, %s4322_s5 }
0x111f   :  { %v2247_v63 = vpop.permute.xlu1 %2246 }
0x1120   :  { %v2269_v14 = vmul.f32 %v2247_v63, %v2229_v16  ;;  %v2245_v1 = vpop.permute.xlu0 %2244  ;;  %v2233_v16 = vsub.f32 1.0, %v5325_v28  ;;  %v2307_v63 = vmul.f32 %v5329_v37, %v2291_v35 }
0x1121   :  { %v2268_v2 = vmul.f32 %v2245_v1, %v2228_v21  ;;  %v2305_v1 = vmul.f32 %v5325_v28, %v2289_v51 }
0x1122   :  { %v5358_v17 = vadd.f32 %v2301_v57, %v2269_v14 }
0x1123   :  { %v5362_v45 = vadd.f32 %v2300_v44, %v2268_v2  ;;  %v2251_v30 = vpop.permute.xlu1 %2250 }
0x1124   :  { %v2317_v43 = vpack.c.bf16 %v5358_v17, %v5358_v17  ;;  %v2271_v32 = vmul.f32 %v2251_v30, %v2231_v40  ;;  %v2249_v6 = vpop.permute.xlu0 %2248 }
0x1125   :  { %v2316_v18 = vpack.c.bf16 %v5362_v45, %v5362_v45  ;;  %v2270_v34 = vmul.f32 %v2249_v6, %v2230_v42 }
0x1126   :  { %v2333_v52 = vunpack.c.l.b16 %v2317_v43  ;;  %v5373_v3 = vadd.f32 %v2303_v49, %v2271_v32 }
0x1127   :  { %v2332_v9 = vunpack.c.l.b16 %v2316_v18  ;;  %v5377_v19 = vadd.f32 %v2302_v53, %v2270_v34  ;;  %v2257_v55 = vpop.permute.xlu1 %2256 }
0x1128   :  { %v2341_v48 = vrot.slane %v2333_v52, 4  ;;  %v2319_v24 = vpack.c.bf16 %v5373_v3, %v5373_v3  ;;  %v2274_v31 = vmul.f32 %v2257_v55, %v2234_v36  ;;  %v2253_v10 = vpop.permute.xlu0 %2252 }
0x1129   :  { %v2340_v23 = vrot.slane %v2332_v9, 5  ;;  %v2318_v38 = vpack.c.bf16 %v5377_v19, %v5377_v19  ;;  %v2272_v29 = vmul.f32 %v2253_v10, %v2232_v8 }
0x112a   :  { %v2335_v7 = vunpack.c.l.b16 %v2319_v24  ;;  %v5387_v25 = vadd.f32 %v2306_v54, %v2274_v31 }
0x112b   :  { %v2342_v41 = vsel %vm669_vm2, %v2341_v48, %v2340_v23  ;;  %v2334_v50 = vunpack.c.l.b16 %v2318_v38  ;;  %v5391_v62 = vadd.f32 %v2304_v12, %v2272_v29  ;;  %v2259_v61 = vpop.permute.xlu1 %2258 }
0x112c   :  { %v2345_v59 = vrot.slane %v2335_v7, 2  ;;  %v2322_v33 = vpack.c.bf16 %v5387_v25, %v5387_v25  ;;  %v2275_v11 = vmul.f32 %v2259_v61, %v2235_v4  ;;  %v2255_v21 = vpop.permute.xlu0 %2254 }
0x112d   :  { %v2343_v57 = vrot.slane %v2334_v50, 3  ;;  %v2320_v14 = vpack.c.bf16 %v5391_v62, %v5391_v62  ;;  %v2273_v44 = vmul.f32 %v2255_v21, %v2233_v16 }
0x112e   :  { %v5400_v2 = vadd.f32 %v2307_v63, %v2275_v11  ;;  %v2338_v30 = vunpack.c.l.b16 %v2322_v33 }
0x112f   :  { %v2344_v15 = vsel %vm672_vm3, %v2343_v57, %v2342_v41  ;;  %v2336_v40 = vunpack.c.l.b16 %v2320_v14  ;;  %v5403_v22 = vadd.f32 %v2305_v1, %v2273_v44 }
0x1130   :  { %v2346_v42 = vsel %vm675_vm4, %v2345_v59, %v2344_v15  ;;  %v2323_v37 = vpack.c.bf16 %v5400_v2, %v5400_v2  ;;  %v2350_v26 = vrot.slane %v2338_v30, 7 }
0x1131   :  { %v2347_v43 = vrot.slane %v2336_v40, 1  ;;  %v2321_v49 = vpack.c.bf16 %v5403_v22, %v5403_v22 }
0x1132   :  { %v2339_v32 = vunpack.c.l.b16 %v2323_v37 }
0x1133   :  { %v2348_v28 = vsel %vm678_vm5, %v2347_v43, %v2346_v42  ;;  %v2337_v6 = vunpack.c.l.b16 %v2321_v49 }
0x1134   :  { %v2352_v18 = vrot.slane %v2339_v32, 6 }
0x1135   :  { %v2349_v53 = vsel %vm681_vm6, %v2337_v6, %v2348_v28 }
0x1136   :  { %v2351_v34 = vsel %vm684_vm7, %v2350_v26, %v2349_v53 }
0x1137   :  { %v2353_v27 = vsel %vm687_vm8, %v2352_v18, %v2351_v34 }
0x1138   :  { %v2354_v52 = vpack.c.b16 %v2353_v27, %v2353_v27 }
0x113a   :  { %2355 = vrot.lane.b32.xlu0 %v2354_v52, %s4322_s5 }
0x11ac   :  { %v2356_v36 = vpop.permute.xlu0 %2355 }
0x11ad   :  { %3558 = vmatmul.mubr.msk.bf16.vlgmr.msra.gmra.mrb[20].mxu0 %vm364_vm9, %v2356_v36 }
0x11ae   :  { %3573 = vmatprep.mubr.msk.bf16.mxu0 %vm4320_vm0, %v4319_v0 }
0x1280   :  { %v2394_v51 = vpop.f32.mrb[20].mxu0 }
0x1281   :  { %v3559_v9 = vpop.f32.mrb[21].mxu0  ;;  %v2472_v48 = vadd.f32 %v2394_v51, %v4582_v20  ;;  %v2401_v29 = vrot.slane %v2394_v51, 2  ;;  %v2402_v35 = vrot.slane %v2394_v51, 3  ;;  %v2403_v7 = vrot.slane %v2394_v51, 4 }
0x1282   :  { %v2397_v55 = vpop.f32.mrb[22].mxu0  ;;  %v2404_v41 = vrot.slane %v2394_v51, 5  ;;  %v2405_v61 = vrot.slane %v2394_v51, 6  ;;  %v2406_v33 = vrot.slane %v2394_v51, 7  ;;  %v2407_v14 = vrot.slane %v2394_v51, 1 }
0x1283   :  { %v3560_v8 = vpop.f32.mrb[23].mxu0  ;;  %v2475_v24 = vrot.slane %v2472_v48, 3  ;;  %v2474_v54 = vrot.slane %v2472_v48, 2  ;;  %v2477_v31 = vrot.slane %v2472_v48, 5  ;;  %v2476_v10 = vrot.slane %v2472_v48, 4 }
0x1284   :  { %v2479_v23 = vrot.slane %v2472_v48, 7  ;;  %v2478_v38 = vrot.slane %v2472_v48, 6  ;;  %v2480_v12 = vrot.slane %v2472_v48, 1  ;;  %v2416_v4 = vadd.f32 %v2401_v29, %v4597_v39 }
0x1285   :  { %2483 = vrot.lane.b32.xlu0 %v2475_v24, %s4309_s19  ;;  %2481 = vrot.lane.b32.xlu1 %v2474_v54, %s4309_s19  ;;  %v2417_v50 = vadd.f32 %v2402_v35, %v4603_v46  ;;  %v2418_v16 = vadd.f32 %v2403_v7, %v4605_v47  ;;  %v2419_v63 = vadd.f32 %v2404_v41, %v4611_v56 }
0x1286   :  { %v3409_v59 = vmul.f32 -1.442695, %v2416_v4  ;;  %v2420_v21 = vadd.f32 %v2405_v61, %v4613_v58  ;;  %v2421_v1 = vadd.f32 %v2406_v33, %v4615_v60  ;;  %v2422_v15 = vadd.f32 %v2394_v51, %v4621_v5 }
0x1287   :  { %v3410_v11 = vmul.f32 -1.442695, %v2417_v50  ;;  %v3411_v57 = vmul.f32 -1.442695, %v2418_v16  ;;  %v3412_v44 = vmul.f32 -1.442695, %v2419_v63  ;;  %v2423_v30 = vadd.f32 %v2407_v14, %v4626_v13 }
0x1288   :  { %3928 = vpow2.f32 %v3409_v59  ;;  %v3413_v40 = vmul.f32 -1.442695, %v2420_v21  ;;  %v3414_v42 = vmul.f32 -1.442695, %v2421_v1  ;;  %v3415_v37 = vmul.f32 -1.442695, %v2422_v15 }
0x1289   :  { %2487 = vrot.lane.b32.xlu0 %v2477_v31, %s4309_s19  ;;  %2485 = vrot.lane.b32.xlu1 %v2476_v10, %s4309_s19  ;;  %3930 = vpow2.f32 %v3410_v11  ;;  %v3416_v43 = vmul.f32 -1.442695, %v2423_v30 }
0x128a   :  { %3932 = vpow2.f32 %v3411_v57 }
0x128b   :  { %3934 = vpow2.f32 %v3412_v44 }
0x128c   :  { %3936 = vpow2.f32 %v3413_v40 }
0x128d   :  { %2491 = vrot.lane.b32.xlu0 %v2479_v23, %s4309_s19  ;;  %2489 = vrot.lane.b32.xlu1 %v2478_v38, %s4309_s19  ;;  %3938 = vpow2.f32 %v3414_v42 }
0x128e   :  { %3940 = vpow2.f32 %v3415_v37 }
0x128f   :  { %3942 = vpow2.f32 %v3416_v43 }
0x1291   :  { %2493 = vrot.lane.b32.xlu0 %v2472_v48, %s4309_s19  ;;  %2495 = vrot.lane.b32.xlu1 %v2480_v12, %s4309_s19 }
0x1292   :  { %v3929_v49 = vpop.eup %3928 }
0x1293   :  { %v3931_v32 = vpop.eup %3930  ;;  %v2448_v28 = vadd.f32 1.0, %v3929_v49 }
0x1294   :  { %v3933_v6 = vpop.eup %3932  ;;  %v2449_v26 = vadd.f32 1.0, %v3931_v32 }
0x1295   :  { %v3935_v18 = vpop.eup %3934  ;;  %3944 = vrcp.f32 %v2448_v28  ;;  %v2450_v53 = vadd.f32 1.0, %v3933_v6 }
0x1296   :  { %v3937_v34 = vpop.eup %3936  ;;  %3946 = vrcp.f32 %v2449_v26  ;;  %v2451_v27 = vadd.f32 1.0, %v3935_v18 }
0x1297   :  { %v3939_v52 = vpop.eup %3938  ;;  %3948 = vrcp.f32 %v2450_v53  ;;  %v2452_v36 = vadd.f32 1.0, %v3937_v34 }
0x1298   :  { %v3941_v51 = vpop.eup %3940  ;;  %3950 = vrcp.f32 %v2451_v27  ;;  %v2453_v9 = vadd.f32 1.0, %v3939_v52 }
0x1299   :  { %v3943_v55 = vpop.eup %3942  ;;  %3952 = vrcp.f32 %v2452_v36  ;;  %v2454_v8 = vadd.f32 1.0, %v3941_v51 }
0x129a   :  { %3954 = vrcp.f32 %v2453_v9  ;;  %v2455_v48 = vadd.f32 1.0, %v3943_v55 }
0x129b   :  { %3956 = vrcp.f32 %v2454_v8 }
0x129c   :  { %3958 = vrcp.f32 %v2455_v48 }
0x129f   :  { %v5435_v24 = vpop.eup %3944 }
0x12a0   :  { %v5437_v54 = vpop.eup %3946 }
0x12a1   :  { %v5441_v12 = vpop.eup %3948 }
0x12a2   :  { %v5445_v29 = vpop.eup %3950 }
0x12a3   :  { %v5449_v50 = vpop.eup %3952 }
0x12a4   :  { %v5453_v61 = vpop.eup %3954 }
0x12a5   :  { %v5457_v11 = vpop.eup %3956 }
0x12a6   :  { %v5461_v21 = vpop.eup %3958 }
0x12f7   :  { %v2484_v31 = vpop.permute.xlu0 %2483  ;;  %v2482_v10 = vpop.permute.xlu1 %2481 }
0x12f8   :  { %v2506_v23 = vmul.f32 %v5437_v54, %v2484_v31  ;;  %v2505_v38 = vmul.f32 %v5435_v24, %v2482_v10 }
0x12fa   :  { %2523 = vrot.lane.b32.xlu0 %v2506_v23, %s4309_s19  ;;  %2521 = vrot.lane.b32.xlu1 %v2505_v38, %s4309_s19  ;;  %v2618_v23 = vrot.slane %v5358_v17, 7  ;;  %v2562_v38 = vsub.f32 1.0, %v5437_v54  ;;  %v2564_v17 = vsub.f32 1.0, %v5445_v29 }
0x12fb   :  { %v2488_v35 = vpop.permute.xlu0 %2487  ;;  %v2486_v7 = vpop.permute.xlu1 %2485 }
0x12fc   :  { %v2508_v4 = vmul.f32 %v5445_v29, %v2488_v35  ;;  %v2507_v41 = vmul.f32 %v5441_v12, %v2486_v7  ;;  %v2617_v35 = vrot.slane %v5362_v45, 7 }
0x12fe   :  { %2527 = vrot.lane.b32.xlu0 %v2508_v4, %s4309_s19  ;;  %2525 = vrot.lane.b32.xlu1 %v2507_v41, %s4309_s19  ;;  %v2561_v4 = vsub.f32 1.0, %v5435_v24  ;;  %v2634_v41 = vmul.f32 %v5437_v54, %v2618_v23 }
0x12ff   :  { %v2492_v16 = vpop.permute.xlu0 %2491  ;;  %v2490_v59 = vpop.permute.xlu1 %2489 }
0x1300   :  { %v2510_v33 = vmul.f32 %v5453_v61, %v2492_v16  ;;  %v2509_v63 = vmul.f32 %v5449_v50, %v2490_v59 }
0x1302   :  { %2531 = vrot.lane.b32.xlu0 %v2510_v33, %s4309_s19  ;;  %2529 = vrot.lane.b32.xlu1 %v2509_v63, %s4309_s19  ;;  %v2633_v33 = vmul.f32 %v5435_v24, %v2617_v35 }
0x1303   :  { %v2494_v57 = vpop.permute.xlu0 %2493  ;;  %v2496_v14 = vpop.permute.xlu1 %2495 }
0x1304   :  { %v2511_v1 = vmul.f32 %v5457_v11, %v2494_v57  ;;  %v2512_v44 = vmul.f32 %v5461_v21, %v2496_v14  ;;  %v2620_v57 = vrot.slane %v5373_v3, 7  ;;  %v2623_v3 = vrot.slane %v5387_v25, 7 }
0x1305   :  { %v2565_v25 = vsub.f32 1.0, %v5449_v50 }
0x1306   :  { %2533 = vrot.lane.b32.xlu0 %v2511_v1, %s4309_s19  ;;  %2535 = vrot.lane.b32.xlu1 %v2512_v44, %s4309_s19  ;;  %v2619_v1 = vrot.slane %v5377_v19, 7 }
0x136c   :  { %v2524_v15 = vpop.permute.xlu0 %2523  ;;  %v2522_v40 = vpop.permute.xlu1 %2521 }
0x136d   :  { %v2546_v30 = vadd.f32 %v2524_v15, %v4603_v46  ;;  %v2545_v42 = vadd.f32 %v2522_v40, %v4597_v39  ;;  %v2563_v15 = vsub.f32 1.0, %v5441_v12  ;;  %v2636_v40 = vmul.f32 %v5445_v29, %v2620_v57 }
0x136f   :  { %3960 = vtanh.f32 %v2546_v30 }
0x1370   :  { %3962 = vtanh.f32 %v2545_v42  ;;  %v2528_v37 = vpop.permute.xlu0 %2527  ;;  %v2526_v43 = vpop.permute.xlu1 %2525 }
0x1371   :  { %v2548_v49 = vadd.f32 %v2528_v37, %v4611_v56  ;;  %v2547_v32 = vadd.f32 %v2526_v43, %v4605_v47  ;;  %v2635_v37 = vmul.f32 %v5441_v12, %v2619_v1  ;;  %v2622_v43 = vrot.slane %v5403_v22, 7 }
0x1373   :  { %3964 = vtanh.f32 %v2548_v49 }
0x1374   :  { %3966 = vtanh.f32 %v2547_v32  ;;  %v2532_v28 = vpop.permute.xlu0 %2531  ;;  %v2530_v6 = vpop.permute.xlu1 %2529 }
0x1375   :  { %v2550_v26 = vadd.f32 %v2532_v28, %v4615_v60  ;;  %v2549_v18 = vadd.f32 %v2530_v6, %v4613_v58  ;;  %v2566_v28 = vsub.f32 1.0, %v5453_v61  ;;  %v2621_v6 = vrot.slane %v5391_v62, 7 }
0x1377   :  { %3968 = vtanh.f32 %v2550_v26  ;;  %v2637_v62 = vmul.f32 %v5449_v50, %v2621_v6 }
0x1378   :  { %3970 = vtanh.f32 %v2549_v18  ;;  %v2534_v53 = vpop.permute.xlu0 %2533  ;;  %v2536_v34 = vpop.permute.xlu1 %2535 }
0x1379   :  { %v3961_v27 = vpop.eup %3960  ;;  %v2551_v52 = vadd.f32 %v2534_v53, %v4621_v5  ;;  %v2552_v36 = vadd.f32 %v2536_v34, %v4626_v13  ;;  %v2638_v34 = vmul.f32 %v5453_v61, %v2622_v43 }
0x137a   :  { %v3963_v51 = vpop.eup %3962  ;;  %2579 = vrot.lane.b32.xlu0 %v3961_v27, %s4322_s5 }
0x137b   :  { %3972 = vtanh.f32 %v2551_v52  ;;  %2577 = vrot.lane.b32.xlu1 %v3963_v51, %s4322_s5 }
0x137c   :  { %3974 = vtanh.f32 %v2552_v36 }
0x137d   :  { %v3965_v9 = vpop.eup %3964 }
0x137e   :  { %v3967_v55 = vpop.eup %3966  ;;  %2583 = vrot.lane.b32.xlu0 %v3965_v9, %s4322_s5  ;;  %v2624_v9 = vrot.slane %v5400_v2, 7 }
0x137f   :  { %2581 = vrot.lane.b32.xlu1 %v3967_v55, %s4322_s5 }
0x1381   :  { %v3969_v8 = vpop.eup %3968 }
0x1382   :  { %v3971_v48 = vpop.eup %3970  ;;  %2587 = vrot.lane.b32.xlu0 %v3969_v8, %s4322_s5 }
0x1383   :  { %2585 = vrot.lane.b32.xlu1 %v3971_v48, %s4322_s5  ;;  %v2567_v48 = vsub.f32 1.0, %v5457_v11 }
0x1385   :  { %v3973_v31 = vpop.eup %3972 }
0x1386   :  { %v3975_v10 = vpop.eup %3974  ;;  %2589 = vrot.lane.b32.xlu0 %v3973_v31, %s4322_s5 }
0x1387   :  { %2591 = vrot.lane.b32.xlu1 %v3975_v10, %s4322_s5 }
0x13ec   :  { %v2580_v7 = vpop.permute.xlu0 %2579 }
0x13ed   :  { %v2602_v16 = vmul.f32 %v2580_v7, %v2562_v38  ;;  %v2578_v59 = vpop.permute.xlu1 %2577  ;;  %v2568_v38 = vsub.f32 1.0, %v5461_v21  ;;  %v2639_v7 = vmul.f32 %v5457_v11, %v2623_v3 }
0x13ee   :  { %v2601_v63 = vmul.f32 %v2578_v59, %v2561_v4  ;;  %v2640_v59 = vmul.f32 %v5461_v21, %v2624_v9 }
0x13ef   :  { %v5490_v14 = vadd.f32 %v2634_v41, %v2602_v16 }
0x13f0   :  { %v5494_v44 = vadd.f32 %v2633_v33, %v2601_v63  ;;  %v2584_v45 = vpop.permute.xlu0 %2583 }
0x13f1   :  { %v2650_v54 = vpack.c.bf16 %v5490_v14, %v5490_v14  ;;  %v2604_v24 = vmul.f32 %v2584_v45, %v2564_v17  ;;  %v2582_v30 = vpop.permute.xlu1 %2581 }
0x13f2   :  { %v2649_v42 = vpack.c.bf16 %v5494_v44, %v5494_v44  ;;  %v2603_v19 = vmul.f32 %v2582_v30, %v2563_v15 }
0x13f3   :  { %v2666_v49 = vunpack.c.l.b16 %v2650_v54  ;;  %v5505_v32 = vadd.f32 %v2636_v40, %v2604_v24 }
0x13f4   :  { %v2665_v29 = vunpack.c.l.b16 %v2649_v42  ;;  %v5509_v26 = vadd.f32 %v2635_v37, %v2603_v19  ;;  %v2588_v18 = vpop.permute.xlu0 %2587 }
0x13f5   :  { %v2674_v53 = vrot.slane %v2666_v49, 5  ;;  %v2652_v12 = vpack.c.bf16 %v5505_v32, %v5505_v32  ;;  %v2606_v22 = vmul.f32 %v2588_v18, %v2566_v28  ;;  %v2586_v27 = vpop.permute.xlu1 %2585 }
0x13f6   :  { %v2673_v52 = vrot.slane %v2665_v29, 6  ;;  %v2651_v36 = vpack.c.bf16 %v5509_v26, %v5509_v26  ;;  %v2605_v51 = vmul.f32 %v2586_v27, %v2565_v25 }
0x13f7   :  { %v2668_v55 = vunpack.c.l.b16 %v2652_v12  ;;  %v5519_v8 = vadd.f32 %v2638_v34, %v2606_v22 }
0x13f8   :  { %v2675_v31 = vsel %vm669_vm2, %v2674_v53, %v2673_v52  ;;  %v2667_v10 = vunpack.c.l.b16 %v2651_v36  ;;  %v5523_v61 = vadd.f32 %v2637_v62, %v2605_v51  ;;  %v2590_v23 = vpop.permute.xlu0 %2589 }
0x13f9   :  { %v2678_v35 = vrot.slane %v2668_v55, 3  ;;  %v2654_v50 = vpack.c.bf16 %v5519_v8, %v5519_v8  ;;  %v2607_v2 = vmul.f32 %v2590_v23, %v2567_v48  ;;  %v2592_v4 = vpop.permute.xlu1 %2591 }
0x13fa   :  { %v2676_v41 = vrot.slane %v2667_v10, 4  ;;  %v2653_v16 = vpack.c.bf16 %v5523_v61, %v5523_v61  ;;  %v2608_v33 = vmul.f32 %v2592_v4, %v2568_v38 }
0x13fb   :  { %v2670_v63 = vunpack.c.l.b16 %v2654_v50  ;;  %v5532_v57 = vadd.f32 %v2639_v7, %v2607_v2 }
0x13fc   :  { %v2677_v17 = vsel %vm672_vm3, %v2676_v41, %v2675_v31  ;;  %v2669_v1 = vunpack.c.l.b16 %v2653_v16  ;;  %v5535_v45 = vadd.f32 %v2640_v59, %v2608_v33 }
0x13fd   :  { %v2682_v15 = vrot.slane %v2670_v63, 1  ;;  %v2679_v11 = vsel %vm675_vm4, %v2678_v35, %v2677_v17  ;;  %v2655_v54 = vpack.c.bf16 %v5532_v57, %v5532_v57 }
0x13fe   :  { %v2680_v40 = vrot.slane %v2669_v1, 2  ;;  %v2656_v24 = vpack.c.bf16 %v5535_v45, %v5535_v45 }
0x13ff   :  { %v2671_v21 = vunpack.c.l.b16 %v2655_v54 }
0x1400   :  { %v2681_v30 = vsel %vm678_vm5, %v2680_v40, %v2679_v11  ;;  %v2672_v3 = vunpack.c.l.b16 %v2656_v24 }
0x1401   :  { %v2683_v42 = vsel %vm681_vm6, %v2682_v15, %v2681_v30 }
0x1402   :  { %v2684_v37 = vsel %vm684_vm7, %v2671_v21, %v2683_v42  ;;  %v2685_v19 = vrot.slane %v2672_v3, 7 }
0x1404   :  { %v2686_v43 = vsel %vm687_vm8, %v2685_v19, %v2684_v37 }
0x1405   :  { %v2687_v49 = vpack.c.b16 %v2686_v43, %v2686_v43 }
0x1407   :  { %2688 = vrot.lane.b32.xlu1 %v2687_v49, %s4322_s5 }
0x1479   :  { %v2689_v28 = vpop.permute.xlu1 %2688 }
0x147a   :  { %3566 = vmatmul.mubr.msk.bf16.vlgmr.msra.gmra.mrb[12].mxu1 %vm364_vm9, %v2689_v28 }
0x147b   :  { %3581 = vmatprep.mubr.msk.bf16.mxu1 %vm4320_vm0, %v4319_v0 }
0x154d   :  { %v2727_v6 = vpop.f32.mrb[12].mxu1 }
0x154e   :  { %v3567_v29 = vpop.f32.mrb[13].mxu1  ;;  %v2805_v53 = vadd.f32 %v2727_v6, %v4582_v20  ;;  %v2734_v20 = vrot.slane %v2727_v6, 1  ;;  %v2735_v51 = vrot.slane %v2727_v6, 2  ;;  %v2736_v9 = vrot.slane %v2727_v6, 3 }
0x154f   :  { %v2730_v18 = vpop.f32.mrb[14].mxu1  ;;  %v2737_v48 = vrot.slane %v2727_v6, 4  ;;  %v2738_v10 = vrot.slane %v2727_v6, 5  ;;  %v2739_v35 = vrot.slane %v2727_v6, 6  ;;  %v2740_v41 = vrot.slane %v2727_v6, 7 }
0x1550   :  { %v3568_v25 = vpop.f32.mrb[15].mxu1  ;;  %v2808_v12 = vrot.slane %v2805_v53, 2  ;;  %v2807_v34 = vrot.slane %v2805_v53, 1  ;;  %v2810_v22 = vrot.slane %v2805_v53, 4  ;;  %v2809_v27 = vrot.slane %v2805_v53, 3 }
0x1551   :  { %v2812_v52 = vrot.slane %v2805_v53, 6  ;;  %v2811_v36 = vrot.slane %v2805_v53, 5  ;;  %v2813_v62 = vrot.slane %v2805_v53, 7  ;;  %v2749_v55 = vadd.f32 %v2734_v20, %v4597_v39 }
0x1552   :  { %2816 = vrot.lane.b32.xlu1 %v2808_v12, %s4309_s19  ;;  %2814 = vrot.lane.b32.xlu0 %v2807_v34, %s4309_s19  ;;  %v2750_v31 = vadd.f32 %v2735_v51, %v4603_v46  ;;  %v2751_v23 = vadd.f32 %v2736_v9, %v4605_v47  ;;  %v2752_v50 = vadd.f32 %v2737_v48, %v4611_v56 }
0x1553   :  { %v3418_v38 = vmul.f32 -1.442695, %v2749_v55  ;;  %v2753_v2 = vadd.f32 %v2738_v10, %v4613_v58  ;;  %v2754_v16 = vadd.f32 %v2739_v35, %v4615_v60  ;;  %v2756_v33 = vadd.f32 %v2727_v6, %v4626_v13 }
0x1554   :  { %v3419_v7 = vmul.f32 -1.442695, %v2750_v31  ;;  %v3420_v4 = vmul.f32 -1.442695, %v2751_v23  ;;  %v3421_v59 = vmul.f32 -1.442695, %v2752_v50  ;;  %v2755_v17 = vadd.f32 %v2740_v41, %v4621_v5 }
0x1555   :  { %3976 = vpow2.f32 %v3418_v38  ;;  %v3422_v63 = vmul.f32 -1.442695, %v2753_v2  ;;  %v3423_v1 = vmul.f32 -1.442695, %v2754_v16  ;;  %v3425_v15 = vmul.f32 -1.442695, %v2756_v33 }
0x1556   :  { %2820 = vrot.lane.b32.xlu1 %v2810_v22, %s4309_s19  ;;  %2818 = vrot.lane.b32.xlu0 %v2809_v27, %s4309_s19  ;;  %3978 = vpow2.f32 %v3419_v7  ;;  %v3424_v11 = vmul.f32 -1.442695, %v2755_v17 }
0x1557   :  { %3980 = vpow2.f32 %v3420_v4 }
0x1558   :  { %3982 = vpow2.f32 %v3421_v59 }
0x1559   :  { %3984 = vpow2.f32 %v3422_v63 }
0x155a   :  { %2824 = vrot.lane.b32.xlu1 %v2812_v52, %s4309_s19  ;;  %2822 = vrot.lane.b32.xlu0 %v2811_v36, %s4309_s19  ;;  %3986 = vpow2.f32 %v3423_v1 }
0x155b   :  { %3988 = vpow2.f32 %v3425_v15 }
0x155c   :  { %3990 = vpow2.f32 %v3424_v11 }
0x155e   :  { %2828 = vrot.lane.b32.xlu1 %v2805_v53, %s4309_s19  ;;  %2826 = vrot.lane.b32.xlu0 %v2813_v62, %s4309_s19 }
0x155f   :  { %v3977_v54 = vpop.eup %3976 }
0x1560   :  { %v3979_v40 = vpop.eup %3978  ;;  %v2781_v24 = vadd.f32 1.0, %v3977_v54 }
0x1561   :  { %v3981_v21 = vpop.eup %3980  ;;  %v2782_v30 = vadd.f32 1.0, %v3979_v40 }
0x1562   :  { %v3983_v3 = vpop.eup %3982  ;;  %3992 = vrcp.f32 %v2781_v24  ;;  %v2783_v42 = vadd.f32 1.0, %v3981_v21 }
0x1563   :  { %v3985_v37 = vpop.eup %3984  ;;  %3994 = vrcp.f32 %v2782_v30  ;;  %v2784_v19 = vadd.f32 1.0, %v3983_v3 }
0x1564   :  { %v3987_v43 = vpop.eup %3986  ;;  %3996 = vrcp.f32 %v2783_v42  ;;  %v2785_v49 = vadd.f32 1.0, %v3985_v37 }
0x1565   :  { %v3989_v28 = vpop.eup %3988  ;;  %3998 = vrcp.f32 %v2784_v19  ;;  %v2786_v6 = vadd.f32 1.0, %v3987_v43  ;;  %v3630_v43 = vld [vmem:[#allocation14] sm:$0xff]  }
0x1566   :  { %v3991_v29 = vpop.eup %3990  ;;  %4000 = vrcp.f32 %v2785_v49  ;;  %v2788_v18 = vadd.f32 1.0, %v3989_v28  ;;  %v3631_v49 = vld [vmem:[%s5702_s7] sm:$0xff]   ;;  %3578 = vmatpush3.bf16.msra.mxu1 %v3630_v43 }
0x1567   :  { %4002 = vrcp.f32 %v2786_v6  ;;  %v2787_v25 = vadd.f32 1.0, %v3991_v29  ;;  %3570 = vmatpush3.bf16.msra.mxu0 %v3631_v49  ;;  %v3632_v28 = vld [vmem:[#allocation14 + $0x8] sm:$0xff]   ;;  %v3633_v6 = vld [vmem:[%s5702_s7 + $0x8] sm:$0xff]   ;;  %3579 = vmatprep.subr.bf16.mxu1 %v4319_v0  ;;  %v3090_v29 = vld [vmem:[#allocation2] sm:$0xf] }
0x1568   :  { %4004 = vrcp.f32 %v2788_v18  ;;  %3571 = vmatprep.subr.bf16.mxu0 %v4319_v0  ;;  %v2951_v18 = vrot.slane %v5490_v14, 7  ;;  %v2952_v14 = vrot.slane %v5509_v26, 7 }
0x1569   :  { %4006 = vrcp.f32 %v2787_v25 }
0x156a   :  { %3580 = vmatpush3.bf16.msra.mxu1 %v3632_v28 }
0x156b   :  { %3572 = vmatpush3.bf16.msra.mxu0 %v3633_v6  ;;  %3593 = vmatprep.subr.bf16.mxu1 %v4319_v0 }
0x156c   :  { %v5567_v53 = vpop.eup %3992  ;;  %3585 = vmatprep.subr.bf16.mxu0 %v4319_v0 }
0x156d   :  { %v5569_v12 = vpop.eup %3994  ;;  %3582 = vmatmul.mubr.msk.bf16.vlgmr.msra.gmra.mrb[16].mxu1 %vm364_vm9, %v3090_v29 }
0x156e   :  { %v5573_v36 = vpop.eup %3996  ;;  %3601 = vmatprep.mubr.msk.bf16.mxu1 %vm4320_vm0, %v4319_v0  ;;  %v2895_v25 = vsub.f32 1.0, %v5569_v12 }
0x156f   :  { %v5577_v62 = vpop.eup %3998 }
0x1570   :  { %v5581_v48 = vpop.eup %4000 }
0x1571   :  { %v5585_v31 = vpop.eup %4002 }
0x1572   :  { %v5589_v50 = vpop.eup %4004  ;;  %v2899_v26 = vsub.f32 1.0, %v5585_v31 }
0x1573   :  { %v5593_v7 = vpop.eup %4006 }
0x15c4   :  { %v2817_v34 = vpop.permute.xlu1 %2816  ;;  %v2815_v22 = vpop.permute.xlu0 %2814 }
0x15c5   :  { %v2839_v27 = vmul.f32 %v5569_v12, %v2817_v34  ;;  %v2838_v52 = vmul.f32 %v5567_v53, %v2815_v22  ;;  %v2950_v34 = vrot.slane %v5494_v44, 7  ;;  %v2896_v44 = vsub.f32 1.0, %v5573_v36 }
0x15c7   :  { %2856 = vrot.lane.b32.xlu1 %v2839_v27, %s4309_s19  ;;  %2854 = vrot.lane.b32.xlu0 %v2838_v52, %s4309_s19  ;;  %v2894_v27 = vsub.f32 1.0, %v5567_v53  ;;  %v2967_v52 = vmul.f32 %v5569_v12, %v2951_v18 }
0x15c8   :  { %v2821_v20 = vpop.permute.xlu1 %2820  ;;  %v2819_v51 = vpop.permute.xlu0 %2818 }
0x15c9   :  { %v2841_v9 = vmul.f32 %v5577_v62, %v2821_v20  ;;  %v2840_v55 = vmul.f32 %v5573_v36, %v2819_v51 }
0x15cb   :  { %2860 = vrot.lane.b32.xlu1 %v2841_v9, %s4309_s19  ;;  %2858 = vrot.lane.b32.xlu0 %v2840_v55, %s4309_s19  ;;  %v2966_v9 = vmul.f32 %v5567_v53, %v2950_v34 }
0x15cc   :  { %v2825_v10 = vpop.permute.xlu1 %2824  ;;  %v2823_v23 = vpop.permute.xlu0 %2822 }
0x15cd   :  { %v2843_v38 = vmul.f32 %v5585_v31, %v2825_v10  ;;  %v2842_v35 = vmul.f32 %v5581_v48, %v2823_v23  ;;  %v2953_v10 = vrot.slane %v5505_v32, 7 }
0x15cf   :  { %2864 = vrot.lane.b32.xlu1 %v2843_v38, %s4309_s19  ;;  %2862 = vrot.lane.b32.xlu0 %v2842_v35, %s4309_s19  ;;  %v2897_v38 = vsub.f32 1.0, %v5577_v62 }
0x15d0   :  { %v2829_v2 = vpop.permute.xlu1 %2828  ;;  %v2827_v4 = vpop.permute.xlu0 %2826 }
0x15d1   :  { %v2845_v41 = vmul.f32 %v5589_v50, %v2829_v2  ;;  %v2844_v16 = vmul.f32 %v5593_v7, %v2827_v4 }
0x15d3   :  { %2868 = vrot.lane.b32.xlu1 %v2845_v41, %s4309_s19  ;;  %2866 = vrot.lane.b32.xlu0 %v2844_v16, %s4309_s19  ;;  %v2969_v41 = vmul.f32 %v5577_v62, %v2953_v10  ;;  %v2898_v62 = vsub.f32 1.0, %v5581_v48 }
0x1639   :  { %v2857_v59 = vpop.permute.xlu1 %2856  ;;  %v2855_v33 = vpop.permute.xlu0 %2854 }
0x163a   :  { %v2879_v63 = vadd.f32 %v2857_v59, %v4603_v46  ;;  %v2878_v17 = vadd.f32 %v2855_v33, %v4597_v39  ;;  %v2955_v59 = vrot.slane %v5519_v8, 7  ;;  %v2968_v33 = vmul.f32 %v5573_v36, %v2952_v14 }
0x163c   :  { %4008 = vtanh.f32 %v2879_v63  ;;  %v2954_v63 = vrot.slane %v5523_v61, 7  ;;  %v2971_v8 = vmul.f32 %v5585_v31, %v2955_v59  ;;  %v2900_v31 = vsub.f32 1.0, %v5593_v7  ;;  %v3634_v59 = vld [vmem:[#allocation17] sm:$0xff]  }
0x163d   :  { %4010 = vtanh.f32 %v2878_v17  ;;  %v2861_v1 = vpop.permute.xlu1 %2860  ;;  %v2859_v15 = vpop.permute.xlu0 %2858 }
0x163e   :  { %v2881_v11 = vadd.f32 %v2861_v1, %v4611_v56  ;;  %v2880_v54 = vadd.f32 %v2859_v15, %v4605_v47  ;;  %v2956_v15 = vrot.slane %v5532_v57, 7  ;;  %v2970_v61 = vmul.f32 %v5581_v48, %v2954_v63  ;;  %v3430_v63 = vld [vmem:[#allocation16] ss:$0 sm:$0xff] }
0x1640   :  { %4012 = vtanh.f32 %v2881_v11 }
0x1641   :  { %4014 = vtanh.f32 %v2880_v54  ;;  %v2865_v40 = vpop.permute.xlu1 %2864  ;;  %v2863_v24 = vpop.permute.xlu0 %2862 }
0x1642   :  { %v2883_v21 = vadd.f32 %v2865_v40, %v4615_v60  ;;  %v2882_v30 = vadd.f32 %v2863_v24, %v4613_v58 }
0x1644   :  { %4016 = vtanh.f32 %v2883_v21 }
0x1645   :  { %4018 = vtanh.f32 %v2882_v30  ;;  %v2869_v46 = vpop.permute.xlu1 %2868  ;;  %v2867_v39 = vpop.permute.xlu0 %2866 }
0x1646   :  { %v4009_v3 = vpop.eup %4008  ;;  %v2885_v42 = vadd.f32 %v2869_v46, %v4626_v13  ;;  %v2884_v37 = vadd.f32 %v2867_v39, %v4621_v5 }
0x1647   :  { %v4011_v56 = vpop.eup %4010  ;;  %2912 = vrot.lane.b32.xlu1 %v4009_v3, %s4322_s5 }
0x1648   :  { %4020 = vtanh.f32 %v2885_v42  ;;  %2910 = vrot.lane.b32.xlu0 %v4011_v56, %s4322_s5  ;;  %v2957_v42 = vrot.slane %v5535_v45, 7  ;;  %v2901_v56 = vsub.f32 1.0, %v5589_v50  ;;  %v2972_v45 = vmul.f32 %v5593_v7, %v2956_v15 }
0x1649   :  { %4022 = vtanh.f32 %v2884_v37 }
0x164a   :  { %v4013_v47 = vpop.eup %4012  ;;  %v2973_v43 = vmul.f32 %v5589_v50, %v2957_v42 }
0x164b   :  { %v4015_v60 = vpop.eup %4014  ;;  %2916 = vrot.lane.b32.xlu1 %v4013_v47, %s4322_s5 }
0x164c   :  { %2914 = vrot.lane.b32.xlu0 %v4015_v60, %s4322_s5 }
0x164e   :  { %v4017_v58 = vpop.eup %4016 }
0x164f   :  { %v4019_v19 = vpop.eup %4018  ;;  %2920 = vrot.lane.b32.xlu1 %v4017_v58, %s4322_s5 }
0x1650   :  { %2918 = vrot.lane.b32.xlu0 %v4019_v19, %s4322_s5 }
0x1652   :  { %v4021_v5 = vpop.eup %4020 }
0x1653   :  { %v4023_v13 = vpop.eup %4022  ;;  %2924 = vrot.lane.b32.xlu1 %v4021_v5, %s4322_s5 }
0x1654   :  { %2922 = vrot.lane.b32.xlu0 %v4023_v13, %s4322_s5 }
0x16b9   :  { %v2913_v22 = vpop.permute.xlu1 %2912 }
0x16ba   :  { %v2935_v20 = vmul.f32 %v2913_v22, %v2895_v25  ;;  %v2911_v51 = vpop.permute.xlu0 %2910 }
0x16bb   :  { %v2934_v55 = vmul.f32 %v2911_v51, %v2894_v27 }
0x16bc   :  { %v2975_v23 = vadd.f32 %v2967_v52, %v2935_v20 }
0x16bd   :  { %v2974_v35 = vadd.f32 %v2966_v9, %v2934_v55  ;;  %v2917_v2 = vpop.permute.xlu1 %2916 }
0x16be   :  { %v2983_v4 = vpack.c.bf16 %v2975_v23, %v2975_v23  ;;  %v2937_v12 = vmul.f32 %v2917_v2, %v2897_v38  ;;  %v2915_v16 = vpop.permute.xlu0 %2914 }
0x16bf   :  { %v2982_v53 = vpack.c.bf16 %v2974_v35, %v2974_v35  ;;  %v2936_v32 = vmul.f32 %v2915_v16, %v2896_v44  ;;  %v3151_v44 = vpop.f32.mrb[16].mxu1 }
0x16c0   :  { %v3010_v17 = vunpack.c.l.b16 %v2983_v4  ;;  %v2977_v1 = vadd.f32 %v2969_v41, %v2937_v12  ;;  %v3583_v4 = vpop.f32.mrb[17].mxu1 }
0x16c1   :  { %v3009_v11 = vunpack.c.l.b16 %v2982_v53  ;;  %v2976_v54 = vadd.f32 %v2968_v33, %v2936_v32  ;;  %v2921_v40 = vpop.permute.xlu1 %2920  ;;  %v3154_v41 = vpop.f32.mrb[18].mxu1  ;;  %v3635_v53 = vld [vmem:[#allocation17 + $0x8] sm:$0xff]   ;;  %v3636_v33 = vld [vmem:[%s5708_s13] sm:$0xff]   ;;  %v3637_v32 = vld [vmem:[%s5708_s13 + $0x8] sm:$0xff]  }
0x16c2   :  { %v3018_v24 = vrot.slane %v3010_v17, 6  ;;  %v2985_v21 = vpack.c.bf16 %v2977_v1, %v2977_v1  ;;  %v2939_v30 = vmul.f32 %v2921_v40, %v2899_v26  ;;  %v2919_v36 = vpop.permute.xlu0 %2918  ;;  %v3584_v12 = vpop.f32.mrb[19].mxu1  ;;  %3594 = vmatpush3.bf16.msra.mxu1 %v3636_v33  ;;  %v3152_v17 = vadd.f32 %v3430_v63, %v3151_v44  ;;  %v3426_v1 = vld [vmem:[#allocation13] ss:$0 sm:$0xff] }
0x16c3   :  { %v3017_v46 = vrot.slane %v3009_v11, 7  ;;  %v2984_v39 = vpack.c.bf16 %v2976_v54, %v2976_v54  ;;  %v2938_v3 = vmul.f32 %v2919_v36, %v2898_v62  ;;  %3595 = vmatprep.subr.bf16.mxu1 %v4319_v0 }
0x16c4   :  { %v3012_v37 = vunpack.c.l.b16 %v2985_v21  ;;  %v2979_v57 = vadd.f32 %v2971_v8, %v2939_v30  ;;  %v3157_v15 = vmax.f32 %v3152_v17, 0.0  ;;  %v3158_v21 = vld [vmem:[#allocation5] sm:$0xff] }
0x16c5   :  { %v3019_v47 = vsel %vm669_vm2, %v3018_v24, %v3017_v46  ;;  %v3011_v60 = vunpack.c.l.b16 %v2984_v39  ;;  %v2978_v58 = vadd.f32 %v2970_v61, %v2938_v3  ;;  %v2925_v19 = vpop.permute.xlu1 %2924  ;;  %v3638_v46 = vld [vmem:[%s5708_s13 + $0x10] sm:$0xff]   ;;  %v3639_v39 = vld [vmem:[%s5708_s13 + $0x18] sm:$0xff]   ;;  %s4270_s13 = scalar_lea.vmem %s3321_s0, 128 }
0x16c6   :  { %v3022_v5 = vrot.slane %v3012_v37, 4  ;;  %v2987_v13 = vpack.c.bf16 %v2979_v57, %v2979_v57  ;;  %v2941_v49 = vmul.f32 %v2925_v19, %v2901_v56  ;;  %v2923_v48 = vpop.permute.xlu0 %2922  ;;  %3596 = vmatpush3.bf16.msra.mxu1 %v3637_v32  ;;  %v3434_v61 = vld [vmem:[#allocation19] ss:$0 sm:$0xff]  ;;  %p4271_p4 = scmp.ne.s32.totalorder %s3321_s0, %s4270_s13  ;;  %p4276_p6 = scmp.lt.s32.totalorder %s4270_s13, %s4270_s13 }
0x16c7   :  { %v3020_v28 = vrot.slane %v3011_v60, 5  ;;  %v2986_v6 = vpack.c.bf16 %v2978_v58, %v2978_v58  ;;  %v2940_v29 = vmul.f32 %v2923_v48, %v2900_v31  ;;  %3597 = vmatprep.subr.bf16.mxu1 %v4319_v0  ;;  %v3438_v58 = vld [vmem:[%s5709_s14] ss:$0 sm:$0xff] }
0x16c8   :  { %v3014_v18 = vunpack.c.l.b16 %v2987_v13  ;;  %v2981_v25 = vadd.f32 %v2973_v43, %v2941_v49  ;;  %p4277_p7 = por %p4276_p6, %p4275_p5 }
0x16c9   :  { %v3021_v34 = vsel %vm672_vm3, %v3020_v28, %v3019_v47  ;;  %v3013_v22 = vunpack.c.l.b16 %v2986_v6  ;;  %v2980_v27 = vadd.f32 %v2972_v45, %v2940_v29 }
0x16ca   :  { %v3026_v52 = vrot.slane %v3014_v18, 2  ;;  %v3023_v20 = vsel %vm675_vm4, %v3022_v5, %v3021_v34  ;;  %v2989_v55 = vpack.c.bf16 %v2981_v25, %v2981_v25  ;;  %3598 = vmatpush3.bf16.msra.mxu1 %v3638_v46  ;;  %p4278_p8 = pnand %p4277_p7, %p4271_p4 }
0x16cb   :  { %v3024_v51 = vrot.slane %v3013_v22, 3  ;;  %v2988_v9 = vpack.c.bf16 %v2980_v27, %v2980_v27  ;;  %3599 = vmatprep.subr.bf16.mxu1 %v4319_v0 }
0x16cc   :  { %v3016_v7 = vunpack.c.l.b16 %v2989_v55 }
0x16cd   :  { %v3025_v50 = vsel %vm678_vm5, %v3024_v51, %v3023_v20  ;;  %v3015_v10 = vunpack.c.l.b16 %v2988_v9 }
0x16ce   :  { %v3027_v23 = vsel %vm681_vm6, %v3026_v52, %v3025_v50  ;;  %3600 = vmatpush3.bf16.msra.mxu1 %v3639_v39 }
0x16cf   :  { %v3028_v38 = vrot.slane %v3015_v10, 1 }
0x16d1   :  { %v3029_v14 = vsel %vm684_vm7, %v3028_v38, %v3027_v23 }
0x16d2   :  { %v3030_v35 = vsel %vm687_vm8, %v3016_v7, %v3029_v14 }
0x16d3   :  { %v3031_v2 = vpack.c.b16 %v3030_v35, %v3030_v35 }
0x16d5   :  { %3032 = vrot.lane.b32.xlu0 %v3031_v2, %s4322_s5 }
0x1747   :  { %v3033_v16 = vpop.permute.xlu0 %3032 }
0x1748   :  { %3574 = vmatmul.mubr.msk.bf16.vlgmr.msra.gmra.mrb[24].mxu0 %vm364_vm9, %v3033_v16 }
0x1749   :  { %3589 = vmatprep.mubr.msk.bf16.mxu0 %vm4320_vm0, %v4319_v0  ;;  %3586 = vmatpush3.bf16.msra.mxu0 %v3634_v59 }
0x174a   :  { %3587 = vmatprep.subr.bf16.mxu0 %v4319_v0 }
0x174d   :  { %3588 = vmatpush3.bf16.msra.mxu0 %v3635_v53 }
0x181b   :  { %v3083_v26 = vpop.f32.mrb[24].mxu0 }
0x181c   :  { %v3084_v11 = vadd.f32 %v3426_v1, %v3083_v26  ;;  %v3575_v54 = vpop.f32.mrb[25].mxu0 }
0x181d   :  { %v3086_v40 = vpop.f32.mrb[26].mxu0 }
0x181e   :  { %v3089_v62 = vmax.f32 %v3084_v11, 0.0  ;;  %v3576_v24 = vpop.f32.mrb[27].mxu0 }
0x1820   :  { %v3159_v8 = vadd.f32 %v3157_v15, %v3089_v62 }
0x1822   :  { %v3160_v30 = vmul.f32 %v3159_v8, %v3158_v21 }
0x1824   :  { %v3161_v36 = vpack.c.bf16 %v3160_v30, %v3160_v30 }
0x1826   :  { %3590 = vmatmul.mubr.msk.bf16.vlgmr.msra.gmra.mrb[28].mxu0 %vm364_vm9, %v3161_v36 }
0x18f9   :  { %v3222_v3 = vpop.f32.mrb[28].mxu0 }
0x18fa   :  { %v3223_v42 = vadd.f32 %v3434_v61, %v3222_v3  ;;  %v3591_v37 = vpop.f32.mrb[29].mxu0 }
0x18fb   :  { %v3225_v57 = vpop.f32.mrb[30].mxu0 }
0x18fc   :  { %v3228_v56 = vmax.f32 %v3223_v42, 0.0  ;;  %v3592_v47 = vpop.f32.mrb[31].mxu0 }
0x18fe   :  { %v3229_v60 = vpack.c.bf16 %v3228_v56, %v3228_v56 }
0x1900   :  { %3602 = vmatmul.mubr.msk.bf16.vlgmr.msra.gmra.mrb[20].mxu1 %vm3269_vm10, %v3229_v60 }
0x19d3   :  { %v3307_v0 = vpop.f32.mrb[20].mxu1 }
0x19d4   :  { %v3308_v19 = vadd.f32 %v3438_v58, %v3307_v0  ;;  %v3603_v31 = vpop.f32.mrb[21].mxu1 }
0x19d5   :  { %v3310_v5 = vpop.f32.mrb[22].mxu1 }
0x19d6   :  { %3313 = vst [vmem:[#allocation20] sm:$0xff] %v3308_v19  ;;  %v3604_v13 = vpop.f32.mrb[23].mxu1 }
0x19d7   :  { %4281 = shalt.err (!%p4278_p8)
}
0x19d8   :  { %s4282_s14 = scalar_lea.hbm %s5710_s15, 128 }
0x19d9   :  { %p4283_p9 = scmp.ne.s32.totalorder %s5710_s15, %s4282_s14  ;;  %p4286_p10 = scmp.lt.u32.totalorder %s4282_s14, %s5710_s15 }
0x19db   :  { %p4288_p11 = pnand %p4286_p10, %p4283_p9 }
0x19dd   :  { %4291 = shalt.err (!%p4288_p11)
}
0x19de   :  { %3323 = dma.vmem_to_hbm [thread:$0]  %s3321_s0, 128, %s5710_s15, [#allocation4]  }
0x19df   :  { %4304 = dma.done.wait [#allocation4], 128  }
0x19e0   :  { %4305 = vsyncadd [#allocation4], 4294967168 }
0x19e1   :  { %3327 = vsyncpa [#allocation3], 1 }
0x19e2   :  { %3328 = vsyncpa [#allocation6], 1 }
0x19e3   :  { %3329 = vsyncpa [#allocation9], 1 }
0x19e4   :  { %3330 = vsyncpa [#allocation12], 1 }
0x19e5   :  { %3331 = vsyncpa [#allocation15], 1 }
0x19e6   :  { %3332 = vsyncpa [#allocation18], 1 }
0x19e7   :  { %3333 = vsyncpa [#allocation4], 1 }

</bundles_post_ra>
